<compile_context>
chip_gen: v5e
topology: v5e:2x2
jax: 0.10.0
libtpu: 0.0.40
codegen_flags: <defaults>
</compile_context>

<pallas_src>
import jax
import jax.numpy as jnp
from jax.experimental import pallas as pl
from jax.experimental.pallas import tpu as pltpu

_LANES = 128
_VMEM_LIMIT = 32 * 1024 * 1024   # safe on v5e(16 default/128 phys) .. v7x(64 phys)


def _round_up(a, b):
    return pl.cdiv(a, b) * b


# ----------------------------------------------------------------------------
# Pallas kernels
# ----------------------------------------------------------------------------
def _silu(y):
    # y * sigmoid(y); the reciprocal rides the EUP slot (approx mode).
    return y * pl.reciprocal(1.0 + jnp.exp(-y), approx=True)


def _mm_bias_silu_kernel(p_ref, w_ref, b_ref, o_ref):
    """(TM, K) bf16 @ (K, TN) bf16 -> f32 acc, + folded-BN bias, SiLU."""
    y = jnp.dot(p_ref[...], w_ref[...], preferred_element_type=jnp.float32)
    y = y + b_ref[...]
    o_ref[...] = _silu(y).astype(o_ref.dtype)


def _make_conv3x3_kernel(taps, OH, OW, cin, tn):
    """Conv(3x3) + folded-BN + SiLU with in-kernel patch construction.

    `taps` is a static list of (phase_idx, row_off, col_off).  Each tap is a
    contiguous in-VMEM slice of the phase-split padded activation, fed to the
    MXU as a (OH*OW, cin) x (cin, tn) matmul accumulated in f32.
    """
    def kernel(ph_ref, w_ref, b_ref, o_ref):
        # ph_ref: (1, n_phase, PH, PW, cin) bf16
        # w_ref : (9, cin, tn) bf16 (BN scale folded in)
        # b_ref : (1, tn) f32
        # o_ref : (1, OH*OW, tn)
        acc = jnp.zeros((OH * OW, tn), jnp.float32)
        for t, (ph, ro, co) in enumerate(taps):
            tap = ph_ref[0, ph, ro:ro + OH, co:co + OW, :]      # (OH, OW, cin)
            acc = acc + jnp.dot(tap.reshape(OH * OW, cin), w_ref[t],
                                preferred_element_type=jnp.float32)
        y = acc + b_ref[...]
        o_ref[0] = _silu(y).astype(o_ref.dtype)
    return kernel


def _make_pool_kernel(OH, OW, C):
    """Fused 3x3/stride-2/pad-1 max pool: column 3-tap max + row pooling."""
    def kernel(c0_ref, c1_ref, c2_ref, o_ref):
        # c*_ref: (1, Hp, OW, C) column-phase views of the -inf padded input.
        cm = jnp.maximum(jnp.maximum(c0_ref[0], c1_ref[0]), c2_ref[0])
        # Row pooling with leading-dim reshapes only (free vreg selects).
        a = cm[0:2 * OH].reshape(OH, 2, OW, C)        # rows 2oh, 2oh+1
        b = cm[2:2 * OH + 2].reshape(OH, 2, OW, C)    # rows 2oh+2 (b[:, 0])
        o_ref[0] = jnp.maximum(jnp.maximum(a[:, 0], a[:, 1]), b[:, 0])
    return kernel


# ----------------------------------------------------------------------------
# Fused max pool (one Pallas kernel per level)
# ----------------------------------------------------------------------------
def maxpool_3x3_s2_p1(x):
    """MaxPool2d(kernel=3, stride=2, padding=1) on NHWC input."""
    B, H, W, C = x.shape
    OH = (H - 1) // 2 + 1
    OW = (W - 1) // 2 + 1
    pad_b = max(1, 2 * OH + 2 - (H + 1))
    pad_r = max(0, 2 * OW + 1 - (W + 1))
    xp = jnp.pad(x, ((0, 0), (1, pad_b), (1, pad_r), (0, 0)),
                 constant_values=-jnp.inf)
    Hp = H + 1 + pad_b
    # Column-phase strided views (thin XLA glue).
    # TODO(synk): replace with an in-kernel sublane-strided ref load
    # (ref[..., pl.ds(c, OW, stride=2), :]) to reach ~1x HBM read.
    cols = [xp[:, :, c:c + 2 * OW - 1:2, :] for c in range(3)]

    spec = pl.BlockSpec((1, Hp, OW, C), lambda b: (b, 0, 0, 0))
    return pl.pallas_call(
        _make_pool_kernel(OH, OW, C),
        grid=(B,),
        in_specs=[spec, spec, spec],
        out_specs=pl.BlockSpec((1, OH, OW, C), lambda b: (b, 0, 0, 0)),
        out_shape=jax.ShapeDtypeStruct((B, OH, OW, C), x.dtype),
        compiler_params=pltpu.CompilerParams(
            dimension_semantics=("parallel",),
            vmem_limit_bytes=_VMEM_LIMIT),
    )(*cols)


# ----------------------------------------------------------------------------
# Conv + folded-BN + SiLU
# ----------------------------------------------------------------------------
def _cout_tiling(cout):
    c128 = _round_up(cout, _LANES)
    tn = 256 if c128 >= 256 else 128          # 256-wide MXU on v6e/v7x
    return tn, _round_up(cout, tn)


def _matmul_bias_silu(patches, w2d, bias, out_dtype):
    """SiLU(patches @ w2d + bias), tiled over (row, Cout) blocks (1x1 convs)."""
    n, kk = patches.shape
    cout = w2d.shape[1]
    tn, c_pad = _cout_tiling(cout)

    # Row tiling: cap 512, keep >=2 blocks when possible (v7x 2nd TensorCore)
    # and avoid near-doubling the padded tail.
    n16 = _round_up(n, 16)
    nblk = max(pl.cdiv(n16, 512), 2 if n16 >= 32 else 1)
    tm = _round_up(pl.cdiv(n16, nblk), 16)
    n_pad = _round_up(n, tm)

    p = jnp.pad(patches.astype(jnp.bfloat16), ((0, n_pad - n), (0, 0)))
    w = jnp.pad(w2d, ((0, 0), (0, c_pad - cout))).astype(jnp.bfloat16)
    b = jnp.pad(bias, (0, c_pad - cout)).astype(jnp.float32).reshape(1, c_pad)

    out = pl.pallas_call(
        _mm_bias_silu_kernel,
        grid=(n_pad // tm, c_pad // tn),
        in_specs=[pl.BlockSpec((tm, kk), lambda i, j: (i, 0)),
                  pl.BlockSpec((kk, tn), lambda i, j: (0, j)),
                  pl.BlockSpec((1, tn), lambda i, j: (0, j))],
        out_specs=pl.BlockSpec((tm, tn), lambda i, j: (i, j)),
        out_shape=jax.ShapeDtypeStruct((n_pad, c_pad), out_dtype),
        compiler_params=pltpu.CompilerParams(
            dimension_semantics=("parallel", "parallel"),
            vmem_limit_bytes=_VMEM_LIMIT),
    )(p, w, b)
    return out[:n, :cout]


def conv_bn_silu(x, w, gamma, beta, mean, var, k, s,
                 out_dtype=jnp.bfloat16, eps=1e-5):
    """Conv2d(k,k,stride=s,pad=k//2,bias=False) + folded BN + SiLU, NHWC."""
    B, H, W, Cin = x.shape
    Cout = w.shape[-1]
    p = k // 2
    OH = (H + 2 * p - k) // s + 1
    OW = (W + 2 * p - k) // s + 1

    scale = gamma / jnp.sqrt(var + eps)
    bias = beta - mean * scale
    wf = w * scale                                   # fold BN scale into weights

    if k == 1 and s == 1:
        # 1x1 conv: flattened-activation matmul, no patch construction.
        patches = x.reshape(B * H * W, Cin)
        out = _matmul_bias_silu(patches, wf.reshape(Cin, Cout), bias, out_dtype)
        return out.reshape(B, OH, OW, Cout)

    assert k == 3 and s in (1, 2)
    # In-kernel patch construction: pass the padded activation (phase-split
    # for stride 2 so every in-kernel tap slice is contiguous).
    if s == 1:
        xp = jnp.pad(x, ((0, 0), (p, p), (p, p), (0, 0)))
        phases = xp[:, None].astype(jnp.bfloat16)             # (B,1,H+2,W+2,Cin)
        taps = [(0, kr, kc) for kr in range(3) for kc in range(3)]
    else:
        eh = max(0, 2 * (OH + 1) - (H + 2 * p))
        ew = max(0, 2 * (OW + 1) - (W + 2 * p))
        xp = jnp.pad(x, ((0, 0), (p, p + eh), (p, p + ew), (0, 0)))
        phases = jnp.stack(
            [xp[:, a::2, c::2, :] for a in range(2) for c in range(2)],
            axis=1).astype(jnp.bfloat16)                       # (B,4,.,.,Cin)
        taps = [((kr % 2) * 2 + (kc % 2), kr // 2, kc // 2)
                for kr in range(3) for kc in range(3)]

    _, NP, PH, PW, _ = phases.shape
    tn, c_pad = _cout_tiling(Cout)
    w3 = jnp.pad(wf.reshape(k * k, Cin, Cout),
                 ((0, 0), (0, 0), (0, c_pad - Cout))).astype(jnp.bfloat16)
    bvec = jnp.pad(bias, (0, c_pad - Cout)).astype(jnp.float32).reshape(1, c_pad)

    # TODO(synk): add a K ("arbitrary") grid axis with an accumulator scratch
    # for very large 9*Cin so the untiled-K blocks never outgrow v7x's 64 MiB.
    kernel = _make_conv3x3_kernel(taps, OH, OW, Cin, tn)
    out = pl.pallas_call(
        kernel,
        grid=(B, c_pad // tn),
        in_specs=[pl.BlockSpec((1, NP, PH, PW, Cin),
                               lambda b, j: (b, 0, 0, 0, 0)),
                  pl.BlockSpec((k * k, Cin, tn), lambda b, j: (0, 0, j)),
                  pl.BlockSpec((1, tn), lambda b, j: (0, j))],
        out_specs=pl.BlockSpec((1, OH * OW, tn), lambda b, j: (b, 0, j)),
        out_shape=jax.ShapeDtypeStruct((B, OH * OW, c_pad), out_dtype),
        compiler_params=pltpu.CompilerParams(
            dimension_semantics=("parallel", "parallel"),
            vmem_limit_bytes=_VMEM_LIMIT),
    )(phases, w3, bvec)
    return out[:, :, :Cout].reshape(B, OH, OW, Cout)


def nearest_upsample(x, oh, ow):
    """F.interpolate(mode='nearest') to (oh, ow) on NHWC."""
    B, H, W, C = x.shape
    if oh % H == 0 and ow % W == 0:
        fh, fw = oh // H, ow // W                 # broadcast, no gathers
        y = jnp.broadcast_to(x[:, :, None, :, None, :], (B, H, fh, W, fw, C))
        return y.reshape(B, oh, ow, C)
    ih = (jnp.arange(oh) * H) // oh               # gather fallback
    iw = (jnp.arange(ow) * W) // ow
    return x[:, ih][:, :, iw]


# ----------------------------------------------------------------------------
# MultiPool forward
# ----------------------------------------------------------------------------
def multipool_forward(x_nchw, params):
    # bf16 activations everywhere (MXU-native; halves HBM traffic).  On v5e
    # (no bf16 VALU) the pool maxes upconvert in-register — still correct.
    x = jnp.transpose(x_nchw, (0, 2, 3, 1)).astype(jnp.bfloat16)   # NCHW->NHWC

    r1 = maxpool_3x3_s2_p1(x)                        # H/2
    r2 = maxpool_3x3_s2_p1(r1)                       # H/4
    r3 = maxpool_3x3_s2_p1(r2)                       # H/8

    r1c = conv_bn_silu(r1, **params["cov1x1_1"], k=1, s=1)
    r4 = conv_bn_silu(x, **params["cov3x3_2"], k=3, s=2)

    oh, ow = r1c.shape[1], r1c.shape[2]
    # 1x1 conv (+BN+SiLU, pointwise) commutes with nearest upsample ->
    # convolve at low resolution, then broadcast-upsample.
    r2c = nearest_upsample(conv_bn_silu(r2, **params["cov1x1_2"], k=1, s=1), oh, ow)
    r3c = nearest_upsample(conv_bn_silu(r3, **params["cov1x1_3"], k=1, s=1), oh, ow)

    # TODO(synk): write the four branch convs straight into channel-offset
    # blocks of one preallocated buffer (input_output_aliases) so `cat` never
    # round-trips HBM before the final 3x3 conv.
    cat = jnp.concatenate([r1c, r2c, r3c, r4], axis=-1)        # c2//2 channels
    out = conv_bn_silu(cat, **params["cov3x3_1"], k=3, s=1,
                       out_dtype=jnp.float32)                  # final stays f32
    return jnp.transpose(out, (0, 3, 1, 2))                    # NHWC -> NCHW


# ----------------------------------------------------------------------------
# Pure-JAX f32 reference (original PyTorch op ordering)
# ----------------------------------------------------------------------------
def _ref_conv(x, w, gamma, beta, mean, var, k, s, eps=1e-5):
    y = jax.lax.conv_general_dilated(
        x, w, window_strides=(s, s),
        padding=[(k // 2, k // 2), (k // 2, k // 2)],
        dimension_numbers=("NHWC", "HWIO", "NHWC"),
        precision=jax.lax.Precision.HIGHEST)
    scale = gamma / jnp.sqrt(var + eps)
    y = y * scale + (beta - mean * scale)
    return y * jax.nn.sigmoid(y)


def _ref_pool(x):
    return jax.lax.reduce_window(x, -jnp.inf, jax.lax.max,
                                 (1, 3, 3, 1), (1, 2, 2, 1),
                                 [(0, 0), (1, 1), (1, 1), (0, 0)])


def _ref_nearest(x, oh, ow):
    B, H, W, C = x.shape
    ih = (jnp.arange(oh) * H) // oh
    iw = (jnp.arange(ow) * W) // ow
    return x[:, ih][:, :, iw]


def multipool_reference(x_nchw, params):
    x = jnp.transpose(x_nchw, (0, 2, 3, 1))
    r1 = _ref_pool(x)
    r2 = _ref_pool(r1)
    r3 = _ref_pool(r2)
    r1c = _ref_conv(r1, **params["cov1x1_1"], k=1, s=1)
    r4 = _ref_conv(x, **params["cov3x3_2"], k=3, s=2)
    oh, ow = r1c.shape[1], r1c.shape[2]
    r2c = _ref_conv(_ref_nearest(r2, oh, ow), **params["cov1x1_2"], k=1, s=1)
    r3c = _ref_conv(_ref_nearest(r3, oh, ow), **params["cov1x1_3"], k=1, s=1)
    cat = jnp.concatenate([r1c, r2c, r3c, r4], axis=-1)
    out = _ref_conv(cat, **params["cov3x3_1"], k=3, s=1)
    return jnp.transpose(out, (0, 3, 1, 2))


# ----------------------------------------------------------------------------
# Deterministic parameter init (synthetic; shapes follow the nn.Module)
# ----------------------------------------------------------------------------
def init_conv_params(key, cin, cout, k):
    k1, k2, k3, k4, k5 = jax.random.split(key, 5)
    w = jax.random.normal(k1, (k, k, cin, cout), jnp.float32)
    w = w / jnp.sqrt(float(k * k * cin))
    return dict(
        w=w,
        gamma=1.0 + 0.1 * jax.random.normal(k2, (cout,), jnp.float32),
        beta=0.1 * jax.random.normal(k3, (cout,), jnp.float32),
        mean=0.1 * jax.random.normal(k4, (cout,), jnp.float32),
        var=1.0 + 0.1 * jax.random.uniform(k5, (cout,), jnp.float32),
    )


if __name__ == "__main__":
    B, c1, H, W = 2, 4, 16, 16
    c2 = 16

    key = jax.random.PRNGKey(0)
    kx, k1, k2, k3, k4, k5 = jax.random.split(key, 6)
    x = jax.random.normal(kx, (B, c1, H, W), jnp.float32)   # NCHW like PyTorch

    params = {
        "cov1x1_1": init_conv_params(k1, c1, c2 // 8, 1),
        "cov1x1_2": init_conv_params(k2, c1, c2 // 8, 1),
        "cov1x1_3": init_conv_params(k3, c1, c2 // 8, 1),
        "cov3x3_2": init_conv_params(k4, c1, c2 // 8, 3),
        "cov3x3_1": init_conv_params(k5, c2 // 2, c2, 3),
    }

    out = jax.block_until_ready(jax.jit(multipool_forward)(x, params))
    assert out.shape == (B, c2, H // 2, W // 2), out.shape

    ref = jax.block_until_ready(jax.jit(multipool_reference)(x, params))
    # bf16 operands/intermediates (f32 MXU accumulation) + the approx-EUP
    # sigmoid deviate a few 1e-2 from the all-f32 reference across the two
    # stacked conv layers; real bugs produce O(1) errors.
    err = float(jnp.max(jnp.abs(out - ref)))
    assert jnp.allclose(out, ref, rtol=4e-2, atol=4e-2), err

    print("KERNEL_OK")
</pallas_src>

<mosaic_0001>
module attributes {stable_mosaic.version = 11 : i64} {
  func.func @kernel(%arg0: i32, %arg1: memref<1x18x8x4xbf16, #tpu.memory_space<vmem>>, %arg2: memref<1x18x8x4xbf16, #tpu.memory_space<vmem>>, %arg3: memref<1x18x8x4xbf16, #tpu.memory_space<vmem>>, %arg4: memref<1x8x8x4xbf16, #tpu.memory_space<vmem>>) attributes {dimension_semantics = [#tpu.dimension_semantics<parallel>], iteration_bounds = array<i64: 2>, scalar_prefetch = 0 : i64, scratch_operands = 0 : i64, tpu.core_type = #tpu.core_type<tc>, window_params = [{transform_indices = @transform_0, window_bounds = array<i64: 1, 18, 8, 4>}, {transform_indices = @transform_1, window_bounds = array<i64: 1, 18, 8, 4>}, {transform_indices = @transform_2, window_bounds = array<i64: 1, 18, 8, 4>}, {transform_indices = @transform_3, window_bounds = array<i64: 1, 8, 8, 4>}]} {
    %c0 = arith.constant 0 : index
    %c0_0 = arith.constant 0 : index
    %c0_1 = arith.constant 0 : index
    %c0_2 = arith.constant 0 : index
    %0 = vector.load %arg1[%c0, %c0_0, %c0_1, %c0_2] : memref<1x18x8x4xbf16, #tpu.memory_space<vmem>>, vector<1x18x8x4xbf16>
    %1 = vector.shape_cast %0 : vector<1x18x8x4xbf16> to vector<18x8x4xbf16>
    %c0_3 = arith.constant 0 : index
    %c0_4 = arith.constant 0 : index
    %c0_5 = arith.constant 0 : index
    %c0_6 = arith.constant 0 : index
    %2 = vector.load %arg2[%c0_3, %c0_4, %c0_5, %c0_6] : memref<1x18x8x4xbf16, #tpu.memory_space<vmem>>, vector<1x18x8x4xbf16>
    %3 = vector.shape_cast %2 : vector<1x18x8x4xbf16> to vector<18x8x4xbf16>
    %4 = arith.maximumf %1, %3 : vector<18x8x4xbf16>
    %c0_7 = arith.constant 0 : index
    %c0_8 = arith.constant 0 : index
    %c0_9 = arith.constant 0 : index
    %c0_10 = arith.constant 0 : index
    %5 = vector.load %arg3[%c0_7, %c0_8, %c0_9, %c0_10] : memref<1x18x8x4xbf16, #tpu.memory_space<vmem>>, vector<1x18x8x4xbf16>
    %6 = vector.shape_cast %5 : vector<1x18x8x4xbf16> to vector<18x8x4xbf16>
    %7 = arith.maximumf %4, %6 : vector<18x8x4xbf16>
    %8 = vector.extract_strided_slice %7 {offsets = [0, 0, 0], sizes = [16, 8, 4], strides = [1, 1, 1]} : vector<18x8x4xbf16> to vector<16x8x4xbf16>
    %9 = vector.shape_cast %8 : vector<16x8x4xbf16> to vector<8x2x8x4xbf16>
    %10 = vector.extract_strided_slice %7 {offsets = [2, 0, 0], sizes = [16, 8, 4], strides = [1, 1, 1]} : vector<18x8x4xbf16> to vector<16x8x4xbf16>
    %11 = vector.shape_cast %10 : vector<16x8x4xbf16> to vector<8x2x8x4xbf16>
    %12 = vector.extract_strided_slice %9 {offsets = [0, 0, 0, 0], sizes = [8, 1, 8, 4], strides = [1, 1, 1, 1]} : vector<8x2x8x4xbf16> to vector<8x1x8x4xbf16>
    %13 = vector.shape_cast %12 : vector<8x1x8x4xbf16> to vector<8x8x4xbf16>
    %14 = vector.extract_strided_slice %9 {offsets = [0, 1, 0, 0], sizes = [8, 1, 8, 4], strides = [1, 1, 1, 1]} : vector<8x2x8x4xbf16> to vector<8x1x8x4xbf16>
    %15 = vector.shape_cast %14 : vector<8x1x8x4xbf16> to vector<8x8x4xbf16>
    %16 = arith.maximumf %13, %15 : vector<8x8x4xbf16>
    %17 = vector.extract_strided_slice %11 {offsets = [0, 0, 0, 0], sizes = [8, 1, 8, 4], strides = [1, 1, 1, 1]} : vector<8x2x8x4xbf16> to vector<8x1x8x4xbf16>
    %18 = vector.shape_cast %17 : vector<8x1x8x4xbf16> to vector<8x8x4xbf16>
    %19 = arith.maximumf %16, %18 : vector<8x8x4xbf16>
    %c0_11 = arith.constant 0 : index
    %c0_12 = arith.constant 0 : index
    %c0_13 = arith.constant 0 : index
    %c0_14 = arith.constant 0 : index
    %20 = vector.load %arg4[%c0_11, %c0_12, %c0_13, %c0_14] : memref<1x8x8x4xbf16, #tpu.memory_space<vmem>>, vector<1x8x8x4xbf16>
    %21 = vector.shape_cast %20 : vector<1x8x8x4xbf16> to vector<8x8x4xbf16>
    %22 = vector.shape_cast %19 : vector<8x8x4xbf16> to vector<1x8x8x4xbf16>
    tpu.vector_store %arg4[%c0_11, %c0_12, %c0_13, %c0_14], %22 {strides = array<i32>} : memref<1x8x8x4xbf16, #tpu.memory_space<vmem>>, vector<1x8x8x4xbf16>,
    return
  }
  func.func @transform_0(%arg0: i32) -> (i32, i32, i32, i32) {
    %c0_i32 = arith.constant 0 : i32
    %c0_i32_0 = arith.constant 0 : i32
    %c0_i32_1 = arith.constant 0 : i32
    %c0_i32_2 = arith.constant 0 : i32
    return %arg0, %c0_i32, %c0_i32_0, %c0_i32_1 : i32, i32, i32, i32
  }
  func.func @transform_1(%arg0: i32) -> (i32, i32, i32, i32) {
    %c0_i32 = arith.constant 0 : i32
    %c0_i32_0 = arith.constant 0 : i32
    %c0_i32_1 = arith.constant 0 : i32
    %c0_i32_2 = arith.constant 0 : i32
    return %arg0, %c0_i32, %c0_i32_0, %c0_i32_1 : i32, i32, i32, i32
  }
  func.func @transform_2(%arg0: i32) -> (i32, i32, i32, i32) {
    %c0_i32 = arith.constant 0 : i32
    %c0_i32_0 = arith.constant 0 : i32
    %c0_i32_1 = arith.constant 0 : i32
    %c0_i32_2 = arith.constant 0 : i32
    return %arg0, %c0_i32, %c0_i32_0, %c0_i32_1 : i32, i32, i32, i32
  }
  func.func @transform_3(%arg0: i32) -> (i32, i32, i32, i32) {
    %c0_i32 = arith.constant 0 : i32
    %c0_i32_0 = arith.constant 0 : i32
    %c0_i32_1 = arith.constant 0 : i32
    %c0_i32_2 = arith.constant 0 : i32
    return %arg0, %c0_i32, %c0_i32_0, %c0_i32_1 : i32, i32, i32, i32
  }
}

module attributes {stable_mosaic.version = 11 : i64} {
  func.func @kernel(%arg0: i32, %arg1: memref<1x10x4x4xbf16, #tpu.memory_space<vmem>>, %arg2: memref<1x10x4x4xbf16, #tpu.memory_space<vmem>>, %arg3: memref<1x10x4x4xbf16, #tpu.memory_space<vmem>>, %arg4: memref<1x4x4x4xbf16, #tpu.memory_space<vmem>>) attributes {dimension_semantics = [#tpu.dimension_semantics<parallel>], iteration_bounds = array<i64: 2>, scalar_prefetch = 0 : i64, scratch_operands = 0 : i64, tpu.core_type = #tpu.core_type<tc>, window_params = [{transform_indices = @transform_0, window_bounds = array<i64: 1, 10, 4, 4>}, {transform_indices = @transform_1, window_bounds = array<i64: 1, 10, 4, 4>}, {transform_indices = @transform_2, window_bounds = array<i64: 1, 10, 4, 4>}, {transform_indices = @transform_3, window_bounds = array<i64: 1, 4, 4, 4>}]} {
    %c0 = arith.constant 0 : index
    %c0_0 = arith.constant 0 : index
    %c0_1 = arith.constant 0 : index
    %c0_2 = arith.constant 0 : index
    %0 = vector.load %arg1[%c0, %c0_0, %c0_1, %c0_2] : memref<1x10x4x4xbf16, #tpu.memory_space<vmem>>, vector<1x10x4x4xbf16>
    %1 = vector.shape_cast %0 : vector<1x10x4x4xbf16> to vector<10x4x4xbf16>
    %c0_3 = arith.constant 0 : index
    %c0_4 = arith.constant 0 : index
    %c0_5 = arith.constant 0 : index
    %c0_6 = arith.constant 0 : index
    %2 = vector.load %arg2[%c0_3, %c0_4, %c0_5, %c0_6] : memref<1x10x4x4xbf16, #tpu.memory_space<vmem>>, vector<1x10x4x4xbf16>
    %3 = vector.shape_cast %2 : vector<1x10x4x4xbf16> to vector<10x4x4xbf16>
    %4 = arith.maximumf %1, %3 : vector<10x4x4xbf16>
    %c0_7 = arith.constant 0 : index
    %c0_8 = arith.constant 0 : index
    %c0_9 = arith.constant 0 : index
    %c0_10 = arith.constant 0 : index
    %5 = vector.load %arg3[%c0_7, %c0_8, %c0_9, %c0_10] : memref<1x10x4x4xbf16, #tpu.memory_space<vmem>>, vector<1x10x4x4xbf16>
    %6 = vector.shape_cast %5 : vector<1x10x4x4xbf16> to vector<10x4x4xbf16>
    %7 = arith.maximumf %4, %6 : vector<10x4x4xbf16>
    %8 = vector.extract_strided_slice %7 {offsets = [0, 0, 0], sizes = [8, 4, 4], strides = [1, 1, 1]} : vector<10x4x4xbf16> to vector<8x4x4xbf16>
    %9 = vector.shape_cast %8 : vector<8x4x4xbf16> to vector<4x2x4x4xbf16>
    %10 = vector.extract_strided_slice %7 {offsets = [2, 0, 0], sizes = [8, 4, 4], strides = [1, 1, 1]} : vector<10x4x4xbf16> to vector<8x4x4xbf16>
    %11 = vector.shape_cast %10 : vector<8x4x4xbf16> to vector<4x2x4x4xbf16>
    %12 = vector.extract_strided_slice %9 {offsets = [0, 0, 0, 0], sizes = [4, 1, 4, 4], strides = [1, 1, 1, 1]} : vector<4x2x4x4xbf16> to vector<4x1x4x4xbf16>
    %13 = vector.shape_cast %12 : vector<4x1x4x4xbf16> to vector<4x4x4xbf16>
    %14 = vector.extract_strided_slice %9 {offsets = [0, 1, 0, 0], sizes = [4, 1, 4, 4], strides = [1, 1, 1, 1]} : vector<4x2x4x4xbf16> to vector<4x1x4x4xbf16>
    %15 = vector.shape_cast %14 : vector<4x1x4x4xbf16> to vector<4x4x4xbf16>
    %16 = arith.maximumf %13, %15 : vector<4x4x4xbf16>
    %17 = vector.extract_strided_slice %11 {offsets = [0, 0, 0, 0], sizes = [4, 1, 4, 4], strides = [1, 1, 1, 1]} : vector<4x2x4x4xbf16> to vector<4x1x4x4xbf16>
    %18 = vector.shape_cast %17 : vector<4x1x4x4xbf16> to vector<4x4x4xbf16>
    %19 = arith.maximumf %16, %18 : vector<4x4x4xbf16>
    %c0_11 = arith.constant 0 : index
    %c0_12 = arith.constant 0 : index
    %c0_13 = arith.constant 0 : index
    %c0_14 = arith.constant 0 : index
    %20 = vector.load %arg4[%c0_11, %c0_12, %c0_13, %c0_14] : memref<1x4x4x4xbf16, #tpu.memory_space<vmem>>, vector<1x4x4x4xbf16>
    %21 = vector.shape_cast %20 : vector<1x4x4x4xbf16> to vector<4x4x4xbf16>
    %22 = vector.shape_cast %19 : vector<4x4x4xbf16> to vector<1x4x4x4xbf16>
    tpu.vector_store %arg4[%c0_11, %c0_12, %c0_13, %c0_14], %22 {strides = array<i32>} : memref<1x4x4x4xbf16, #tpu.memory_space<vmem>>, vector<1x4x4x4xbf16>,
    return
  }
  func.func @transform_0(%arg0: i32) -> (i32, i32, i32, i32) {
    %c0_i32 = arith.constant 0 : i32
    %c0_i32_0 = arith.constant 0 : i32
    %c0_i32_1 = arith.constant 0 : i32
    %c0_i32_2 = arith.constant 0 : i32
    return %arg0, %c0_i32, %c0_i32_0, %c0_i32_1 : i32, i32, i32, i32
  }
  func.func @transform_1(%arg0: i32) -> (i32, i32, i32, i32) {
    %c0_i32 = arith.constant 0 : i32
    %c0_i32_0 = arith.constant 0 : i32
    %c0_i32_1 = arith.constant 0 : i32
    %c0_i32_2 = arith.constant 0 : i32
    return %arg0, %c0_i32, %c0_i32_0, %c0_i32_1 : i32, i32, i32, i32
  }
  func.func @transform_2(%arg0: i32) -> (i32, i32, i32, i32) {
    %c0_i32 = arith.constant 0 : i32
    %c0_i32_0 = arith.constant 0 : i32
    %c0_i32_1 = arith.constant 0 : i32
    %c0_i32_2 = arith.constant 0 : i32
    return %arg0, %c0_i32, %c0_i32_0, %c0_i32_1 : i32, i32, i32, i32
  }
  func.func @transform_3(%arg0: i32) -> (i32, i32, i32, i32) {
    %c0_i32 = arith.constant 0 : i32
    %c0_i32_0 = arith.constant 0 : i32
    %c0_i32_1 = arith.constant 0 : i32
    %c0_i32_2 = arith.constant 0 : i32
    return %arg0, %c0_i32, %c0_i32_0, %c0_i32_1 : i32, i32, i32, i32
  }
}

module attributes {stable_mosaic.version = 11 : i64} {
  func.func @kernel(%arg0: i32, %arg1: memref<1x6x2x4xbf16, #tpu.memory_space<vmem>>, %arg2: memref<1x6x2x4xbf16, #tpu.memory_space<vmem>>, %arg3: memref<1x6x2x4xbf16, #tpu.memory_space<vmem>>, %arg4: memref<1x2x2x4xbf16, #tpu.memory_space<vmem>>) attributes {dimension_semantics = [#tpu.dimension_semantics<parallel>], iteration_bounds = array<i64: 2>, scalar_prefetch = 0 : i64, scratch_operands = 0 : i64, tpu.core_type = #tpu.core_type<tc>, window_params = [{transform_indices = @transform_0, window_bounds = array<i64: 1, 6, 2, 4>}, {transform_indices = @transform_1, window_bounds = array<i64: 1, 6, 2, 4>}, {transform_indices = @transform_2, window_bounds = array<i64: 1, 6, 2, 4>}, {transform_indices = @transform_3, window_bounds = array<i64: 1, 2, 2, 4>}]} {
    %c0 = arith.constant 0 : index
    %c0_0 = arith.constant 0 : index
    %c0_1 = arith.constant 0 : index
    %c0_2 = arith.constant 0 : index
    %0 = vector.load %arg1[%c0, %c0_0, %c0_1, %c0_2] : memref<1x6x2x4xbf16, #tpu.memory_space<vmem>>, vector<1x6x2x4xbf16>
    %1 = vector.shape_cast %0 : vector<1x6x2x4xbf16> to vector<6x2x4xbf16>
    %c0_3 = arith.constant 0 : index
    %c0_4 = arith.constant 0 : index
    %c0_5 = arith.constant 0 : index
    %c0_6 = arith.constant 0 : index
    %2 = vector.load %arg2[%c0_3, %c0_4, %c0_5, %c0_6] : memref<1x6x2x4xbf16, #tpu.memory_space<vmem>>, vector<1x6x2x4xbf16>
    %3 = vector.shape_cast %2 : vector<1x6x2x4xbf16> to vector<6x2x4xbf16>
    %4 = arith.maximumf %1, %3 : vector<6x2x4xbf16>
    %c0_7 = arith.constant 0 : index
    %c0_8 = arith.constant 0 : index
    %c0_9 = arith.constant 0 : index
    %c0_10 = arith.constant 0 : index
    %5 = vector.load %arg3[%c0_7, %c0_8, %c0_9, %c0_10] : memref<1x6x2x4xbf16, #tpu.memory_space<vmem>>, vector<1x6x2x4xbf16>
    %6 = vector.shape_cast %5 : vector<1x6x2x4xbf16> to vector<6x2x4xbf16>
    %7 = arith.maximumf %4, %6 : vector<6x2x4xbf16>
    %8 = vector.extract_strided_slice %7 {offsets = [0, 0, 0], sizes = [4, 2, 4], strides = [1, 1, 1]} : vector<6x2x4xbf16> to vector<4x2x4xbf16>
    %9 = vector.shape_cast %8 : vector<4x2x4xbf16> to vector<2x2x2x4xbf16>
    %10 = vector.extract_strided_slice %7 {offsets = [2, 0, 0], sizes = [4, 2, 4], strides = [1, 1, 1]} : vector<6x2x4xbf16> to vector<4x2x4xbf16>
    %11 = vector.shape_cast %10 : vector<4x2x4xbf16> to vector<2x2x2x4xbf16>
    %12 = vector.extract_strided_slice %9 {offsets = [0, 0, 0, 0], sizes = [2, 1, 2, 4], strides = [1, 1, 1, 1]} : vector<2x2x2x4xbf16> to vector<2x1x2x4xbf16>
    %13 = vector.shape_cast %12 : vector<2x1x2x4xbf16> to vector<2x2x4xbf16>
    %14 = vector.extract_strided_slice %9 {offsets = [0, 1, 0, 0], sizes = [2, 1, 2, 4], strides = [1, 1, 1, 1]} : vector<2x2x2x4xbf16> to vector<2x1x2x4xbf16>
    %15 = vector.shape_cast %14 : vector<2x1x2x4xbf16> to vector<2x2x4xbf16>
    %16 = arith.maximumf %13, %15 : vector<2x2x4xbf16>
    %17 = vector.extract_strided_slice %11 {offsets = [0, 0, 0, 0], sizes = [2, 1, 2, 4], strides = [1, 1, 1, 1]} : vector<2x2x2x4xbf16> to vector<2x1x2x4xbf16>
    %18 = vector.shape_cast %17 : vector<2x1x2x4xbf16> to vector<2x2x4xbf16>
    %19 = arith.maximumf %16, %18 : vector<2x2x4xbf16>
    %c0_11 = arith.constant 0 : index
    %c0_12 = arith.constant 0 : index
    %c0_13 = arith.constant 0 : index
    %c0_14 = arith.constant 0 : index
    %20 = vector.load %arg4[%c0_11, %c0_12, %c0_13, %c0_14] : memref<1x2x2x4xbf16, #tpu.memory_space<vmem>>, vector<1x2x2x4xbf16>
    %21 = vector.shape_cast %20 : vector<1x2x2x4xbf16> to vector<2x2x4xbf16>
    %22 = vector.shape_cast %19 : vector<2x2x4xbf16> to vector<1x2x2x4xbf16>
    tpu.vector_store %arg4[%c0_11, %c0_12, %c0_13, %c0_14], %22 {strides = array<i32>} : memref<1x2x2x4xbf16, #tpu.memory_space<vmem>>, vector<1x2x2x4xbf16>,
    return
  }
  func.func @transform_0(%arg0: i32) -> (i32, i32, i32, i32) {
    %c0_i32 = arith.constant 0 : i32
    %c0_i32_0 = arith.constant 0 : i32
    %c0_i32_1 = arith.constant 0 : i32
    %c0_i32_2 = arith.constant 0 : i32
    return %arg0, %c0_i32, %c0_i32_0, %c0_i32_1 : i32, i32, i32, i32
  }
  func.func @transform_1(%arg0: i32) -> (i32, i32, i32, i32) {
    %c0_i32 = arith.constant 0 : i32
    %c0_i32_0 = arith.constant 0 : i32
    %c0_i32_1 = arith.constant 0 : i32
    %c0_i32_2 = arith.constant 0 : i32
    return %arg0, %c0_i32, %c0_i32_0, %c0_i32_1 : i32, i32, i32, i32
  }
  func.func @transform_2(%arg0: i32) -> (i32, i32, i32, i32) {
    %c0_i32 = arith.constant 0 : i32
    %c0_i32_0 = arith.constant 0 : i32
    %c0_i32_1 = arith.constant 0 : i32
    %c0_i32_2 = arith.constant 0 : i32
    return %arg0, %c0_i32, %c0_i32_0, %c0_i32_1 : i32, i32, i32, i32
  }
  func.func @transform_3(%arg0: i32) -> (i32, i32, i32, i32) {
    %c0_i32 = arith.constant 0 : i32
    %c0_i32_0 = arith.constant 0 : i32
    %c0_i32_1 = arith.constant 0 : i32
    %c0_i32_2 = arith.constant 0 : i32
    return %arg0, %c0_i32, %c0_i32_0, %c0_i32_1 : i32, i32, i32, i32
  }
}

module attributes {stable_mosaic.version = 11 : i64} {
  func.func @_mm_bias_silu_kernel(%arg0: i32, %arg1: i32, %arg2: memref<16x4xbf16, #tpu.memory_space<vmem>>, %arg3: memref<4x128xbf16, #tpu.memory_space<vmem>>, %arg4: memref<1x128xf32, #tpu.memory_space<vmem>>, %arg5: memref<16x128xbf16, #tpu.memory_space<vmem>>) attributes {dimension_semantics = [#tpu.dimension_semantics<parallel>, #tpu.dimension_semantics<parallel>], iteration_bounds = array<i64: 2, 1>, scalar_prefetch = 0 : i64, scratch_operands = 0 : i64, tpu.core_type = #tpu.core_type<tc>, window_params = [{transform_indices = @transform_0, window_bounds = array<i64: 16, 4>}, {transform_indices = @transform_1, window_bounds = array<i64: 4, 128>}, {transform_indices = @transform_2, window_bounds = array<i64: 1, 128>}, {transform_indices = @transform_3, window_bounds = array<i64: 16, 128>}]} {
    %c0 = arith.constant 0 : index
    %c0_0 = arith.constant 0 : index
    %0 = vector.load %arg2[%c0, %c0_0] : memref<16x4xbf16, #tpu.memory_space<vmem>>, vector<16x4xbf16>
    %c0_1 = arith.constant 0 : index
    %c0_2 = arith.constant 0 : index
    %1 = vector.load %arg3[%c0_1, %c0_2] : memref<4x128xbf16, #tpu.memory_space<vmem>>, vector<4x128xbf16>
    %cst = arith.constant dense<0.000000e+00> : vector<16x128xf32>
    %2 = tpu.matmul %0, %1, %cst {dimension_numbers = #tpu.dot_dimension_numbers<[1], [0], [0], [1], [0, 0, 1, 1], [], []>} : vector<16x4xbf16>, vector<4x128xbf16>, vector<16x128xf32> -> vector<16x128xf32>
    %c0_3 = arith.constant 0 : index
    %c0_4 = arith.constant 0 : index
    %3 = vector.load %arg4[%c0_3, %c0_4] : memref<1x128xf32, #tpu.memory_space<vmem>>, vector<1x128xf32>
    %4 = vector.broadcast %3 : vector<1x128xf32> to vector<16x128xf32>
    %5 = arith.addf %2, %4 : vector<16x128xf32>
    %cst_5 = arith.constant 0.000000e+00 : f32
    %6 = vector.broadcast %cst_5 : f32 to vector<16x128xf32>
    %7 = arith.subf %6, %5 : vector<16x128xf32>
    %8 = math.exp %7 : vector<16x128xf32>
    %cst_6 = arith.constant 1.000000e+00 : f32
    %9 = vector.broadcast %cst_6 : f32 to vector<16x128xf32>
    %10 = arith.addf %9, %8 : vector<16x128xf32>
    %11 = tpu.reciprocal %10 {approx = true} : vector<16x128xf32> -> vector<16x128xf32>
    %12 = arith.mulf %5, %11 : vector<16x128xf32>
    %13 = arith.truncf %12 : vector<16x128xf32> to vector<16x128xbf16>
    %c0_7 = arith.constant 0 : index
    %c0_8 = arith.constant 0 : index
    %14 = vector.load %arg5[%c0_7, %c0_8] : memref<16x128xbf16, #tpu.memory_space<vmem>>, vector<16x128xbf16>
    tpu.vector_store %arg5[%c0_7, %c0_8], %13 {strides = array<i32>} : memref<16x128xbf16, #tpu.memory_space<vmem>>, vector<16x128xbf16>,
    return
  }
  func.func @transform_0(%arg0: i32, %arg1: i32) -> (i32, i32) {
    %c0_i32 = arith.constant 0 : i32
    %c0_i32_0 = arith.constant 0 : i32
    return %arg0, %c0_i32 : i32, i32
  }
  func.func @transform_1(%arg0: i32, %arg1: i32) -> (i32, i32) {
    %c0_i32 = arith.constant 0 : i32
    %c0_i32_0 = arith.constant 0 : i32
    return %c0_i32, %arg1 : i32, i32
  }
  func.func @transform_2(%arg0: i32, %arg1: i32) -> (i32, i32) {
    %c0_i32 = arith.constant 0 : i32
    %c0_i32_0 = arith.constant 0 : i32
    return %c0_i32, %arg1 : i32, i32
  }
  func.func @transform_3(%arg0: i32, %arg1: i32) -> (i32, i32) {
    %c0_i32 = arith.constant 0 : i32
    return %arg0, %arg1 : i32, i32
  }
}

module attributes {stable_mosaic.version = 11 : i64} {
  func.func @_mm_bias_silu_kernel(%arg0: i32, %arg1: i32, %arg2: memref<16x4xbf16, #tpu.memory_space<vmem>>, %arg3: memref<4x128xbf16, #tpu.memory_space<vmem>>, %arg4: memref<1x128xf32, #tpu.memory_space<vmem>>, %arg5: memref<16x128xbf16, #tpu.memory_space<vmem>>) attributes {dimension_semantics = [#tpu.dimension_semantics<parallel>, #tpu.dimension_semantics<parallel>], iteration_bounds = array<i64: 1, 1>, scalar_prefetch = 0 : i64, scratch_operands = 0 : i64, tpu.core_type = #tpu.core_type<tc>, window_params = [{transform_indices = @transform_0, window_bounds = array<i64: 16, 4>}, {transform_indices = @transform_1, window_bounds = array<i64: 4, 128>}, {transform_indices = @transform_2, window_bounds = array<i64: 1, 128>}, {transform_indices = @transform_3, window_bounds = array<i64: 16, 128>}]} {
    %c0 = arith.constant 0 : index
    %c0_0 = arith.constant 0 : index
    %0 = vector.load %arg2[%c0, %c0_0] : memref<16x4xbf16, #tpu.memory_space<vmem>>, vector<16x4xbf16>
    %c0_1 = arith.constant 0 : index
    %c0_2 = arith.constant 0 : index
    %1 = vector.load %arg3[%c0_1, %c0_2] : memref<4x128xbf16, #tpu.memory_space<vmem>>, vector<4x128xbf16>
    %cst = arith.constant dense<0.000000e+00> : vector<16x128xf32>
    %2 = tpu.matmul %0, %1, %cst {dimension_numbers = #tpu.dot_dimension_numbers<[1], [0], [0], [1], [0, 0, 1, 1], [], []>} : vector<16x4xbf16>, vector<4x128xbf16>, vector<16x128xf32> -> vector<16x128xf32>
    %c0_3 = arith.constant 0 : index
    %c0_4 = arith.constant 0 : index
    %3 = vector.load %arg4[%c0_3, %c0_4] : memref<1x128xf32, #tpu.memory_space<vmem>>, vector<1x128xf32>
    %4 = vector.broadcast %3 : vector<1x128xf32> to vector<16x128xf32>
    %5 = arith.addf %2, %4 : vector<16x128xf32>
    %cst_5 = arith.constant 0.000000e+00 : f32
    %6 = vector.broadcast %cst_5 : f32 to vector<16x128xf32>
    %7 = arith.subf %6, %5 : vector<16x128xf32>
    %8 = math.exp %7 : vector<16x128xf32>
    %cst_6 = arith.constant 1.000000e+00 : f32
    %9 = vector.broadcast %cst_6 : f32 to vector<16x128xf32>
    %10 = arith.addf %9, %8 : vector<16x128xf32>
    %11 = tpu.reciprocal %10 {approx = true} : vector<16x128xf32> -> vector<16x128xf32>
    %12 = arith.mulf %5, %11 : vector<16x128xf32>
    %13 = arith.truncf %12 : vector<16x128xf32> to vector<16x128xbf16>
    %c0_7 = arith.constant 0 : index
    %c0_8 = arith.constant 0 : index
    %14 = vector.load %arg5[%c0_7, %c0_8] : memref<16x128xbf16, #tpu.memory_space<vmem>>, vector<16x128xbf16>
    tpu.vector_store %arg5[%c0_7, %c0_8], %13 {strides = array<i32>} : memref<16x128xbf16, #tpu.memory_space<vmem>>, vector<16x128xbf16>,
    return
  }
  func.func @transform_0(%arg0: i32, %arg1: i32) -> (i32, i32) {
    %c0_i32 = arith.constant 0 : i32
    %c0_i32_0 = arith.constant 0 : i32
    return %arg0, %c0_i32 : i32, i32
  }
  func.func @transform_1(%arg0: i32, %arg1: i32) -> (i32, i32) {
    %c0_i32 = arith.constant 0 : i32
    %c0_i32_0 = arith.constant 0 : i32
    return %c0_i32, %arg1 : i32, i32
  }
  func.func @transform_2(%arg0: i32, %arg1: i32) -> (i32, i32) {
    %c0_i32 = arith.constant 0 : i32
    %c0_i32_0 = arith.constant 0 : i32
    return %c0_i32, %arg1 : i32, i32
  }
  func.func @transform_3(%arg0: i32, %arg1: i32) -> (i32, i32) {
    %c0_i32 = arith.constant 0 : i32
    return %arg0, %arg1 : i32, i32
  }
}

module attributes {stable_mosaic.version = 11 : i64} {
  func.func @kernel(%arg0: i32, %arg1: i32, %arg2: memref<1x4x9x9x4xbf16, #tpu.memory_space<vmem>>, %arg3: memref<9x4x128xbf16, #tpu.memory_space<vmem>>, %arg4: memref<1x128xf32, #tpu.memory_space<vmem>>, %arg5: memref<1x64x128xbf16, #tpu.memory_space<vmem>>) attributes {dimension_semantics = [#tpu.dimension_semantics<parallel>, #tpu.dimension_semantics<parallel>], iteration_bounds = array<i64: 2, 1>, scalar_prefetch = 0 : i64, scratch_operands = 0 : i64, tpu.core_type = #tpu.core_type<tc>, window_params = [{transform_indices = @transform_0, window_bounds = array<i64: 1, 4, 9, 9, 4>}, {transform_indices = @transform_1, window_bounds = array<i64: 9, 4, 128>}, {transform_indices = @transform_2, window_bounds = array<i64: 1, 128>}, {transform_indices = @transform_3, window_bounds = array<i64: 1, 64, 128>}]} {
    %cst = arith.constant 0.000000e+00 : f32
    %0 = vector.broadcast %cst : f32 to vector<64x128xf32>
    %c0 = arith.constant 0 : index
    %c0_0 = arith.constant 0 : index
    %c0_1 = arith.constant 0 : index
    %c0_2 = arith.constant 0 : index
    %c0_3 = arith.constant 0 : index
    %1 = vector.load %arg2[%c0, %c0_0, %c0_1, %c0_2, %c0_3] : memref<1x4x9x9x4xbf16, #tpu.memory_space<vmem>>, vector<1x1x8x8x4xbf16>
    %2 = vector.shape_cast %1 : vector<1x1x8x8x4xbf16> to vector<8x8x4xbf16>
    %3 = vector.shape_cast %2 : vector<8x8x4xbf16> to vector<64x4xbf16>
    %c0_4 = arith.constant 0 : index
    %c0_5 = arith.constant 0 : index
    %c0_6 = arith.constant 0 : index
    %4 = vector.load %arg3[%c0_4, %c0_5, %c0_6] : memref<9x4x128xbf16, #tpu.memory_space<vmem>>, vector<1x4x128xbf16>
    %5 = vector.shape_cast %4 : vector<1x4x128xbf16> to vector<4x128xbf16>
    %cst_7 = arith.constant dense<0.000000e+00> : vector<64x128xf32>
    %6 = tpu.matmul %3, %5, %cst_7 {dimension_numbers = #tpu.dot_dimension_numbers<[1], [0], [0], [1], [0, 0, 1, 1], [], []>} : vector<64x4xbf16>, vector<4x128xbf16>, vector<64x128xf32> -> vector<64x128xf32>
    %7 = arith.addf %0, %6 : vector<64x128xf32>
    %c0_8 = arith.constant 0 : index
    %c1 = arith.constant 1 : index
    %c0_9 = arith.constant 0 : index
    %c0_10 = arith.constant 0 : index
    %c0_11 = arith.constant 0 : index
    %8 = vector.load %arg2[%c0_8, %c1, %c0_9, %c0_10, %c0_11] : memref<1x4x9x9x4xbf16, #tpu.memory_space<vmem>>, vector<1x1x8x8x4xbf16>
    %9 = vector.shape_cast %8 : vector<1x1x8x8x4xbf16> to vector<8x8x4xbf16>
    %10 = vector.shape_cast %9 : vector<8x8x4xbf16> to vector<64x4xbf16>
    %c1_12 = arith.constant 1 : index
    %c0_13 = arith.constant 0 : index
    %c0_14 = arith.constant 0 : index
    %11 = vector.load %arg3[%c1_12, %c0_13, %c0_14] : memref<9x4x128xbf16, #tpu.memory_space<vmem>>, vector<1x4x128xbf16>
    %12 = vector.shape_cast %11 : vector<1x4x128xbf16> to vector<4x128xbf16>
    %cst_15 = arith.constant dense<0.000000e+00> : vector<64x128xf32>
    %13 = tpu.matmul %10, %12, %cst_15 {dimension_numbers = #tpu.dot_dimension_numbers<[1], [0], [0], [1], [0, 0, 1, 1], [], []>} : vector<64x4xbf16>, vector<4x128xbf16>, vector<64x128xf32> -> vector<64x128xf32>
    %14 = arith.addf %7, %13 : vector<64x128xf32>
    %c0_16 = arith.constant 0 : index
    %c0_17 = arith.constant 0 : index
    %c0_18 = arith.constant 0 : index
    %c1_19 = arith.constant 1 : index
    %c0_20 = arith.constant 0 : index
    %15 = vector.load %arg2[%c0_16, %c0_17, %c0_18, %c1_19, %c0_20] : memref<1x4x9x9x4xbf16, #tpu.memory_space<vmem>>, vector<1x1x8x8x4xbf16>
    %16 = vector.shape_cast %15 : vector<1x1x8x8x4xbf16> to vector<8x8x4xbf16>
    %17 = vector.shape_cast %16 : vector<8x8x4xbf16> to vector<64x4xbf16>
    %c2 = arith.constant 2 : index
    %c0_21 = arith.constant 0 : index
    %c0_22 = arith.constant 0 : index
    %18 = vector.load %arg3[%c2, %c0_21, %c0_22] : memref<9x4x128xbf16, #tpu.memory_space<vmem>>, vector<1x4x128xbf16>
    %19 = vector.shape_cast %18 : vector<1x4x128xbf16> to vector<4x128xbf16>
    %cst_23 = arith.constant dense<0.000000e+00> : vector<64x128xf32>
    %20 = tpu.matmul %17, %19, %cst_23 {dimension_numbers = #tpu.dot_dimension_numbers<[1], [0], [0], [1], [0, 0, 1, 1], [], []>} : vector<64x4xbf16>, vector<4x128xbf16>, vector<64x128xf32> -> vector<64x128xf32>
    %21 = arith.addf %14, %20 : vector<64x128xf32>
    %c0_24 = arith.constant 0 : index
    %c2_25 = arith.constant 2 : index
    %c0_26 = arith.constant 0 : index
    %c0_27 = arith.constant 0 : index
    %c0_28 = arith.constant 0 : index
    %22 = vector.load %arg2[%c0_24, %c2_25, %c0_26, %c0_27, %c0_28] : memref<1x4x9x9x4xbf16, #tpu.memory_space<vmem>>, vector<1x1x8x8x4xbf16>
    %23 = vector.shape_cast %22 : vector<1x1x8x8x4xbf16> to vector<8x8x4xbf16>
    %24 = vector.shape_cast %23 : vector<8x8x4xbf16> to vector<64x4xbf16>
    %c3 = arith.constant 3 : index
    %c0_29 = arith.constant 0 : index
    %c0_30 = arith.constant 0 : index
    %25 = vector.load %arg3[%c3, %c0_29, %c0_30] : memref<9x4x128xbf16, #tpu.memory_space<vmem>>, vector<1x4x128xbf16>
    %26 = vector.shape_cast %25 : vector<1x4x128xbf16> to vector<4x128xbf16>
    %cst_31 = arith.constant dense<0.000000e+00> : vector<64x128xf32>
    %27 = tpu.matmul %24, %26, %cst_31 {dimension_numbers = #tpu.dot_dimension_numbers<[1], [0], [0], [1], [0, 0, 1, 1], [], []>} : vector<64x4xbf16>, vector<4x128xbf16>, vector<64x128xf32> -> vector<64x128xf32>
    %28 = arith.addf %21, %27 : vector<64x128xf32>
    %c0_32 = arith.constant 0 : index
    %c3_33 = arith.constant 3 : index
    %c0_34 = arith.constant 0 : index
    %c0_35 = arith.constant 0 : index
    %c0_36 = arith.constant 0 : index
    %29 = vector.load %arg2[%c0_32, %c3_33, %c0_34, %c0_35, %c0_36] : memref<1x4x9x9x4xbf16, #tpu.memory_space<vmem>>, vector<1x1x8x8x4xbf16>
    %30 = vector.shape_cast %29 : vector<1x1x8x8x4xbf16> to vector<8x8x4xbf16>
    %31 = vector.shape_cast %30 : vector<8x8x4xbf16> to vector<64x4xbf16>
    %c4 = arith.constant 4 : index
    %c0_37 = arith.constant 0 : index
    %c0_38 = arith.constant 0 : index
    %32 = vector.load %arg3[%c4, %c0_37, %c0_38] : memref<9x4x128xbf16, #tpu.memory_space<vmem>>, vector<1x4x128xbf16>
    %33 = vector.shape_cast %32 : vector<1x4x128xbf16> to vector<4x128xbf16>
    %cst_39 = arith.constant dense<0.000000e+00> : vector<64x128xf32>
    %34 = tpu.matmul %31, %33, %cst_39 {dimension_numbers = #tpu.dot_dimension_numbers<[1], [0], [0], [1], [0, 0, 1, 1], [], []>} : vector<64x4xbf16>, vector<4x128xbf16>, vector<64x128xf32> -> vector<64x128xf32>
    %35 = arith.addf %28, %34 : vector<64x128xf32>
    %c0_40 = arith.constant 0 : index
    %c2_41 = arith.constant 2 : index
    %c0_42 = arith.constant 0 : index
    %c1_43 = arith.constant 1 : index
    %c0_44 = arith.constant 0 : index
    %36 = vector.load %arg2[%c0_40, %c2_41, %c0_42, %c1_43, %c0_44] : memref<1x4x9x9x4xbf16, #tpu.memory_space<vmem>>, vector<1x1x8x8x4xbf16>
    %37 = vector.shape_cast %36 : vector<1x1x8x8x4xbf16> to vector<8x8x4xbf16>
    %38 = vector.shape_cast %37 : vector<8x8x4xbf16> to vector<64x4xbf16>
    %c5 = arith.constant 5 : index
    %c0_45 = arith.constant 0 : index
    %c0_46 = arith.constant 0 : index
    %39 = vector.load %arg3[%c5, %c0_45, %c0_46] : memref<9x4x128xbf16, #tpu.memory_space<vmem>>, vector<1x4x128xbf16>
    %40 = vector.shape_cast %39 : vector<1x4x128xbf16> to vector<4x128xbf16>
    %cst_47 = arith.constant dense<0.000000e+00> : vector<64x128xf32>
    %41 = tpu.matmul %38, %40, %cst_47 {dimension_numbers = #tpu.dot_dimension_numbers<[1], [0], [0], [1], [0, 0, 1, 1], [], []>} : vector<64x4xbf16>, vector<4x128xbf16>, vector<64x128xf32> -> vector<64x128xf32>
    %42 = arith.addf %35, %41 : vector<64x128xf32>
    %c0_48 = arith.constant 0 : index
    %c0_49 = arith.constant 0 : index
    %c1_50 = arith.constant 1 : index
    %c0_51 = arith.constant 0 : index
    %c0_52 = arith.constant 0 : index
    %43 = vector.load %arg2[%c0_48, %c0_49, %c1_50, %c0_51, %c0_52] : memref<1x4x9x9x4xbf16, #tpu.memory_space<vmem>>, vector<1x1x8x8x4xbf16>
    %44 = vector.shape_cast %43 : vector<1x1x8x8x4xbf16> to vector<8x8x4xbf16>
    %45 = vector.shape_cast %44 : vector<8x8x4xbf16> to vector<64x4xbf16>
    %c6 = arith.constant 6 : index
    %c0_53 = arith.constant 0 : index
    %c0_54 = arith.constant 0 : index
    %46 = vector.load %arg3[%c6, %c0_53, %c0_54] : memref<9x4x128xbf16, #tpu.memory_space<vmem>>, vector<1x4x128xbf16>
    %47 = vector.shape_cast %46 : vector<1x4x128xbf16> to vector<4x128xbf16>
    %cst_55 = arith.constant dense<0.000000e+00> : vector<64x128xf32>
    %48 = tpu.matmul %45, %47, %cst_55 {dimension_numbers = #tpu.dot_dimension_numbers<[1], [0], [0], [1], [0, 0, 1, 1], [], []>} : vector<64x4xbf16>, vector<4x128xbf16>, vector<64x128xf32> -> vector<64x128xf32>
    %49 = arith.addf %42, %48 : vector<64x128xf32>
    %c0_56 = arith.constant 0 : index
    %c1_57 = arith.constant 1 : index
    %c1_58 = arith.constant 1 : index
    %c0_59 = arith.constant 0 : index
    %c0_60 = arith.constant 0 : index
    %50 = vector.load %arg2[%c0_56, %c1_57, %c1_58, %c0_59, %c0_60] : memref<1x4x9x9x4xbf16, #tpu.memory_space<vmem>>, vector<1x1x8x8x4xbf16>
    %51 = vector.shape_cast %50 : vector<1x1x8x8x4xbf16> to vector<8x8x4xbf16>
    %52 = vector.shape_cast %51 : vector<8x8x4xbf16> to vector<64x4xbf16>
    %c7 = arith.constant 7 : index
    %c0_61 = arith.constant 0 : index
    %c0_62 = arith.constant 0 : index
    %53 = vector.load %arg3[%c7, %c0_61, %c0_62] : memref<9x4x128xbf16, #tpu.memory_space<vmem>>, vector<1x4x128xbf16>
    %54 = vector.shape_cast %53 : vector<1x4x128xbf16> to vector<4x128xbf16>
    %cst_63 = arith.constant dense<0.000000e+00> : vector<64x128xf32>
    %55 = tpu.matmul %52, %54, %cst_63 {dimension_numbers = #tpu.dot_dimension_numbers<[1], [0], [0], [1], [0, 0, 1, 1], [], []>} : vector<64x4xbf16>, vector<4x128xbf16>, vector<64x128xf32> -> vector<64x128xf32>
    %56 = arith.addf %49, %55 : vector<64x128xf32>
    %c0_64 = arith.constant 0 : index
    %c0_65 = arith.constant 0 : index
    %c1_66 = arith.constant 1 : index
    %c1_67 = arith.constant 1 : index
    %c0_68 = arith.constant 0 : index
    %57 = vector.load %arg2[%c0_64, %c0_65, %c1_66, %c1_67, %c0_68] : memref<1x4x9x9x4xbf16, #tpu.memory_space<vmem>>, vector<1x1x8x8x4xbf16>
    %58 = vector.shape_cast %57 : vector<1x1x8x8x4xbf16> to vector<8x8x4xbf16>
    %59 = vector.shape_cast %58 : vector<8x8x4xbf16> to vector<64x4xbf16>
    %c8 = arith.constant 8 : index
    %c0_69 = arith.constant 0 : index
    %c0_70 = arith.constant 0 : index
    %60 = vector.load %arg3[%c8, %c0_69, %c0_70] : memref<9x4x128xbf16, #tpu.memory_space<vmem>>, vector<1x4x128xbf16>
    %61 = vector.shape_cast %60 : vector<1x4x128xbf16> to vector<4x128xbf16>
    %cst_71 = arith.constant dense<0.000000e+00> : vector<64x128xf32>
    %62 = tpu.matmul %59, %61, %cst_71 {dimension_numbers = #tpu.dot_dimension_numbers<[1], [0], [0], [1], [0, 0, 1, 1], [], []>} : vector<64x4xbf16>, vector<4x128xbf16>, vector<64x128xf32> -> vector<64x128xf32>
    %63 = arith.addf %56, %62 : vector<64x128xf32>
    %c0_72 = arith.constant 0 : index
    %c0_73 = arith.constant 0 : index
    %64 = vector.load %arg4[%c0_72, %c0_73] : memref<1x128xf32, #tpu.memory_space<vmem>>, vector<1x128xf32>
    %65 = vector.broadcast %64 : vector<1x128xf32> to vector<64x128xf32>
    %66 = arith.addf %63, %65 : vector<64x128xf32>
    %cst_74 = arith.constant 0.000000e+00 : f32
    %67 = vector.broadcast %cst_74 : f32 to vector<64x128xf32>
    %68 = arith.subf %67, %66 : vector<64x128xf32>
    %69 = math.exp %68 : vector<64x128xf32>
    %cst_75 = arith.constant 1.000000e+00 : f32
    %70 = vector.broadcast %cst_75 : f32 to vector<64x128xf32>
    %71 = arith.addf %70, %69 : vector<64x128xf32>
    %72 = tpu.reciprocal %71 {approx = true} : vector<64x128xf32> -> vector<64x128xf32>
    %73 = arith.mulf %66, %72 : vector<64x128xf32>
    %74 = arith.truncf %73 : vector<64x128xf32> to vector<64x128xbf16>
    %c0_76 = arith.constant 0 : index
    %c0_77 = arith.constant 0 : index
    %c0_78 = arith.constant 0 : index
    %75 = vector.load %arg5[%c0_76, %c0_77, %c0_78] : memref<1x64x128xbf16, #tpu.memory_space<vmem>>, vector<1x64x128xbf16>
    %76 = vector.shape_cast %75 : vector<1x64x128xbf16> to vector<64x128xbf16>
    %77 = vector.shape_cast %74 : vector<64x128xbf16> to vector<1x64x128xbf16>
    tpu.vector_store %arg5[%c0_76, %c0_77, %c0_78], %77 {strides = array<i32>} : memref<1x64x128xbf16, #tpu.memory_space<vmem>>, vector<1x64x128xbf16>,
    return
  }
  func.func @transform_0(%arg0: i32, %arg1: i32) -> (i32, i32, i32, i32, i32) {
    %c0_i32 = arith.constant 0 : i32
    %c0_i32_0 = arith.constant 0 : i32
    %c0_i32_1 = arith.constant 0 : i32
    %c0_i32_2 = arith.constant 0 : i32
    %c0_i32_3 = arith.constant 0 : i32
    return %arg0, %c0_i32, %c0_i32_0, %c0_i32_1, %c0_i32_2 : i32, i32, i32, i32, i32
  }
  func.func @transform_1(%arg0: i32, %arg1: i32) -> (i32, i32, i32) {
    %c0_i32 = arith.constant 0 : i32
    %c0_i32_0 = arith.constant 0 : i32
    %c0_i32_1 = arith.constant 0 : i32
    return %c0_i32, %c0_i32_0, %arg1 : i32, i32, i32
  }
  func.func @transform_2(%arg0: i32, %arg1: i32) -> (i32, i32) {
    %c0_i32 = arith.constant 0 : i32
    %c0_i32_0 = arith.constant 0 : i32
    return %c0_i32, %arg1 : i32, i32
  }
  func.func @transform_3(%arg0: i32, %arg1: i32) -> (i32, i32, i32) {
    %c0_i32 = arith.constant 0 : i32
    %c0_i32_0 = arith.constant 0 : i32
    return %arg0, %c0_i32, %arg1 : i32, i32, i32
  }
}

module attributes {stable_mosaic.version = 11 : i64} {
  func.func @_mm_bias_silu_kernel(%arg0: i32, %arg1: i32, %arg2: memref<64x4xbf16, #tpu.memory_space<vmem>>, %arg3: memref<4x128xbf16, #tpu.memory_space<vmem>>, %arg4: memref<1x128xf32, #tpu.memory_space<vmem>>, %arg5: memref<64x128xbf16, #tpu.memory_space<vmem>>) attributes {dimension_semantics = [#tpu.dimension_semantics<parallel>, #tpu.dimension_semantics<parallel>], iteration_bounds = array<i64: 2, 1>, scalar_prefetch = 0 : i64, scratch_operands = 0 : i64, tpu.core_type = #tpu.core_type<tc>, window_params = [{transform_indices = @transform_0, window_bounds = array<i64: 64, 4>}, {transform_indices = @transform_1, window_bounds = array<i64: 4, 128>}, {transform_indices = @transform_2, window_bounds = array<i64: 1, 128>}, {transform_indices = @transform_3, window_bounds = array<i64: 64, 128>}]} {
    %c0 = arith.constant 0 : index
    %c0_0 = arith.constant 0 : index
    %0 = vector.load %arg2[%c0, %c0_0] : memref<64x4xbf16, #tpu.memory_space<vmem>>, vector<64x4xbf16>
    %c0_1 = arith.constant 0 : index
    %c0_2 = arith.constant 0 : index
    %1 = vector.load %arg3[%c0_1, %c0_2] : memref<4x128xbf16, #tpu.memory_space<vmem>>, vector<4x128xbf16>
    %cst = arith.constant dense<0.000000e+00> : vector<64x128xf32>
    %2 = tpu.matmul %0, %1, %cst {dimension_numbers = #tpu.dot_dimension_numbers<[1], [0], [0], [1], [0, 0, 1, 1], [], []>} : vector<64x4xbf16>, vector<4x128xbf16>, vector<64x128xf32> -> vector<64x128xf32>
    %c0_3 = arith.constant 0 : index
    %c0_4 = arith.constant 0 : index
    %3 = vector.load %arg4[%c0_3, %c0_4] : memref<1x128xf32, #tpu.memory_space<vmem>>, vector<1x128xf32>
    %4 = vector.broadcast %3 : vector<1x128xf32> to vector<64x128xf32>
    %5 = arith.addf %2, %4 : vector<64x128xf32>
    %cst_5 = arith.constant 0.000000e+00 : f32
    %6 = vector.broadcast %cst_5 : f32 to vector<64x128xf32>
    %7 = arith.subf %6, %5 : vector<64x128xf32>
    %8 = math.exp %7 : vector<64x128xf32>
    %cst_6 = arith.constant 1.000000e+00 : f32
    %9 = vector.broadcast %cst_6 : f32 to vector<64x128xf32>
    %10 = arith.addf %9, %8 : vector<64x128xf32>
    %11 = tpu.reciprocal %10 {approx = true} : vector<64x128xf32> -> vector<64x128xf32>
    %12 = arith.mulf %5, %11 : vector<64x128xf32>
    %13 = arith.truncf %12 : vector<64x128xf32> to vector<64x128xbf16>
    %c0_7 = arith.constant 0 : index
    %c0_8 = arith.constant 0 : index
    %14 = vector.load %arg5[%c0_7, %c0_8] : memref<64x128xbf16, #tpu.memory_space<vmem>>, vector<64x128xbf16>
    tpu.vector_store %arg5[%c0_7, %c0_8], %13 {strides = array<i32>} : memref<64x128xbf16, #tpu.memory_space<vmem>>, vector<64x128xbf16>,
    return
  }
  func.func @transform_0(%arg0: i32, %arg1: i32) -> (i32, i32) {
    %c0_i32 = arith.constant 0 : i32
    %c0_i32_0 = arith.constant 0 : i32
    return %arg0, %c0_i32 : i32, i32
  }
  func.func @transform_1(%arg0: i32, %arg1: i32) -> (i32, i32) {
    %c0_i32 = arith.constant 0 : i32
    %c0_i32_0 = arith.constant 0 : i32
    return %c0_i32, %arg1 : i32, i32
  }
  func.func @transform_2(%arg0: i32, %arg1: i32) -> (i32, i32) {
    %c0_i32 = arith.constant 0 : i32
    %c0_i32_0 = arith.constant 0 : i32
    return %c0_i32, %arg1 : i32, i32
  }
  func.func @transform_3(%arg0: i32, %arg1: i32) -> (i32, i32) {
    %c0_i32 = arith.constant 0 : i32
    return %arg0, %arg1 : i32, i32
  }
}

module attributes {stable_mosaic.version = 11 : i64} {
  func.func @kernel(%arg0: i32, %arg1: i32, %arg2: memref<1x1x10x10x8xbf16, #tpu.memory_space<vmem>>, %arg3: memref<9x8x128xbf16, #tpu.memory_space<vmem>>, %arg4: memref<1x128xf32, #tpu.memory_space<vmem>>, %arg5: memref<1x64x128xf32, #tpu.memory_space<vmem>>) attributes {dimension_semantics = [#tpu.dimension_semantics<parallel>, #tpu.dimension_semantics<parallel>], iteration_bounds = array<i64: 2, 1>, scalar_prefetch = 0 : i64, scratch_operands = 0 : i64, tpu.core_type = #tpu.core_type<tc>, window_params = [{transform_indices = @transform_0, window_bounds = array<i64: 1, 1, 10, 10, 8>}, {transform_indices = @transform_1, window_bounds = array<i64: 9, 8, 128>}, {transform_indices = @transform_2, window_bounds = array<i64: 1, 128>}, {transform_indices = @transform_3, window_bounds = array<i64: 1, 64, 128>}]} {
    %cst = arith.constant 0.000000e+00 : f32
    %0 = vector.broadcast %cst : f32 to vector<64x128xf32>
    %c0 = arith.constant 0 : index
    %c0_0 = arith.constant 0 : index
    %c0_1 = arith.constant 0 : index
    %c0_2 = arith.constant 0 : index
    %c0_3 = arith.constant 0 : index
    %1 = vector.load %arg2[%c0, %c0_0, %c0_1, %c0_2, %c0_3] : memref<1x1x10x10x8xbf16, #tpu.memory_space<vmem>>, vector<1x1x8x8x8xbf16>
    %2 = vector.shape_cast %1 : vector<1x1x8x8x8xbf16> to vector<8x8x8xbf16>
    %3 = vector.shape_cast %2 : vector<8x8x8xbf16> to vector<64x8xbf16>
    %c0_4 = arith.constant 0 : index
    %c0_5 = arith.constant 0 : index
    %c0_6 = arith.constant 0 : index
    %4 = vector.load %arg3[%c0_4, %c0_5, %c0_6] : memref<9x8x128xbf16, #tpu.memory_space<vmem>>, vector<1x8x128xbf16>
    %5 = vector.shape_cast %4 : vector<1x8x128xbf16> to vector<8x128xbf16>
    %cst_7 = arith.constant dense<0.000000e+00> : vector<64x128xf32>
    %6 = tpu.matmul %3, %5, %cst_7 {dimension_numbers = #tpu.dot_dimension_numbers<[1], [0], [0], [1], [0, 0, 1, 1], [], []>} : vector<64x8xbf16>, vector<8x128xbf16>, vector<64x128xf32> -> vector<64x128xf32>
    %7 = arith.addf %0, %6 : vector<64x128xf32>
    %c0_8 = arith.constant 0 : index
    %c0_9 = arith.constant 0 : index
    %c0_10 = arith.constant 0 : index
    %c1 = arith.constant 1 : index
    %c0_11 = arith.constant 0 : index
    %8 = vector.load %arg2[%c0_8, %c0_9, %c0_10, %c1, %c0_11] : memref<1x1x10x10x8xbf16, #tpu.memory_space<vmem>>, vector<1x1x8x8x8xbf16>
    %9 = vector.shape_cast %8 : vector<1x1x8x8x8xbf16> to vector<8x8x8xbf16>
    %10 = vector.shape_cast %9 : vector<8x8x8xbf16> to vector<64x8xbf16>
    %c1_12 = arith.constant 1 : index
    %c0_13 = arith.constant 0 : index
    %c0_14 = arith.constant 0 : index
    %11 = vector.load %arg3[%c1_12, %c0_13, %c0_14] : memref<9x8x128xbf16, #tpu.memory_space<vmem>>, vector<1x8x128xbf16>
    %12 = vector.shape_cast %11 : vector<1x8x128xbf16> to vector<8x128xbf16>
    %cst_15 = arith.constant dense<0.000000e+00> : vector<64x128xf32>
    %13 = tpu.matmul %10, %12, %cst_15 {dimension_numbers = #tpu.dot_dimension_numbers<[1], [0], [0], [1], [0, 0, 1, 1], [], []>} : vector<64x8xbf16>, vector<8x128xbf16>, vector<64x128xf32> -> vector<64x128xf32>
    %14 = arith.addf %7, %13 : vector<64x128xf32>
    %c0_16 = arith.constant 0 : index
    %c0_17 = arith.constant 0 : index
    %c0_18 = arith.constant 0 : index
    %c2 = arith.constant 2 : index
    %c0_19 = arith.constant 0 : index
    %15 = vector.load %arg2[%c0_16, %c0_17, %c0_18, %c2, %c0_19] : memref<1x1x10x10x8xbf16, #tpu.memory_space<vmem>>, vector<1x1x8x8x8xbf16>
    %16 = vector.shape_cast %15 : vector<1x1x8x8x8xbf16> to vector<8x8x8xbf16>
    %17 = vector.shape_cast %16 : vector<8x8x8xbf16> to vector<64x8xbf16>
    %c2_20 = arith.constant 2 : index
    %c0_21 = arith.constant 0 : index
    %c0_22 = arith.constant 0 : index
    %18 = vector.load %arg3[%c2_20, %c0_21, %c0_22] : memref<9x8x128xbf16, #tpu.memory_space<vmem>>, vector<1x8x128xbf16>
    %19 = vector.shape_cast %18 : vector<1x8x128xbf16> to vector<8x128xbf16>
    %cst_23 = arith.constant dense<0.000000e+00> : vector<64x128xf32>
    %20 = tpu.matmul %17, %19, %cst_23 {dimension_numbers = #tpu.dot_dimension_numbers<[1], [0], [0], [1], [0, 0, 1, 1], [], []>} : vector<64x8xbf16>, vector<8x128xbf16>, vector<64x128xf32> -> vector<64x128xf32>
    %21 = arith.addf %14, %20 : vector<64x128xf32>
    %c0_24 = arith.constant 0 : index
    %c0_25 = arith.constant 0 : index
    %c1_26 = arith.constant 1 : index
    %c0_27 = arith.constant 0 : index
    %c0_28 = arith.constant 0 : index
    %22 = vector.load %arg2[%c0_24, %c0_25, %c1_26, %c0_27, %c0_28] : memref<1x1x10x10x8xbf16, #tpu.memory_space<vmem>>, vector<1x1x8x8x8xbf16>
    %23 = vector.shape_cast %22 : vector<1x1x8x8x8xbf16> to vector<8x8x8xbf16>
    %24 = vector.shape_cast %23 : vector<8x8x8xbf16> to vector<64x8xbf16>
    %c3 = arith.constant 3 : index
    %c0_29 = arith.constant 0 : index
    %c0_30 = arith.constant 0 : index
    %25 = vector.load %arg3[%c3, %c0_29, %c0_30] : memref<9x8x128xbf16, #tpu.memory_space<vmem>>, vector<1x8x128xbf16>
    %26 = vector.shape_cast %25 : vector<1x8x128xbf16> to vector<8x128xbf16>
    %cst_31 = arith.constant dense<0.000000e+00> : vector<64x128xf32>
    %27 = tpu.matmul %24, %26, %cst_31 {dimension_numbers = #tpu.dot_dimension_numbers<[1], [0], [0], [1], [0, 0, 1, 1], [], []>} : vector<64x8xbf16>, vector<8x128xbf16>, vector<64x128xf32> -> vector<64x128xf32>
    %28 = arith.addf %21, %27 : vector<64x128xf32>
    %c0_32 = arith.constant 0 : index
    %c0_33 = arith.constant 0 : index
    %c1_34 = arith.constant 1 : index
    %c1_35 = arith.constant 1 : index
    %c0_36 = arith.constant 0 : index
    %29 = vector.load %arg2[%c0_32, %c0_33, %c1_34, %c1_35, %c0_36] : memref<1x1x10x10x8xbf16, #tpu.memory_space<vmem>>, vector<1x1x8x8x8xbf16>
    %30 = vector.shape_cast %29 : vector<1x1x8x8x8xbf16> to vector<8x8x8xbf16>
    %31 = vector.shape_cast %30 : vector<8x8x8xbf16> to vector<64x8xbf16>
    %c4 = arith.constant 4 : index
    %c0_37 = arith.constant 0 : index
    %c0_38 = arith.constant 0 : index
    %32 = vector.load %arg3[%c4, %c0_37, %c0_38] : memref<9x8x128xbf16, #tpu.memory_space<vmem>>, vector<1x8x128xbf16>
    %33 = vector.shape_cast %32 : vector<1x8x128xbf16> to vector<8x128xbf16>
    %cst_39 = arith.constant dense<0.000000e+00> : vector<64x128xf32>
    %34 = tpu.matmul %31, %33, %cst_39 {dimension_numbers = #tpu.dot_dimension_numbers<[1], [0], [0], [1], [0, 0, 1, 1], [], []>} : vector<64x8xbf16>, vector<8x128xbf16>, vector<64x128xf32> -> vector<64x128xf32>
    %35 = arith.addf %28, %34 : vector<64x128xf32>
    %c0_40 = arith.constant 0 : index
    %c0_41 = arith.constant 0 : index
    %c1_42 = arith.constant 1 : index
    %c2_43 = arith.constant 2 : index
    %c0_44 = arith.constant 0 : index
    %36 = vector.load %arg2[%c0_40, %c0_41, %c1_42, %c2_43, %c0_44] : memref<1x1x10x10x8xbf16, #tpu.memory_space<vmem>>, vector<1x1x8x8x8xbf16>
    %37 = vector.shape_cast %36 : vector<1x1x8x8x8xbf16> to vector<8x8x8xbf16>
    %38 = vector.shape_cast %37 : vector<8x8x8xbf16> to vector<64x8xbf16>
    %c5 = arith.constant 5 : index
    %c0_45 = arith.constant 0 : index
    %c0_46 = arith.constant 0 : index
    %39 = vector.load %arg3[%c5, %c0_45, %c0_46] : memref<9x8x128xbf16, #tpu.memory_space<vmem>>, vector<1x8x128xbf16>
    %40 = vector.shape_cast %39 : vector<1x8x128xbf16> to vector<8x128xbf16>
    %cst_47 = arith.constant dense<0.000000e+00> : vector<64x128xf32>
    %41 = tpu.matmul %38, %40, %cst_47 {dimension_numbers = #tpu.dot_dimension_numbers<[1], [0], [0], [1], [0, 0, 1, 1], [], []>} : vector<64x8xbf16>, vector<8x128xbf16>, vector<64x128xf32> -> vector<64x128xf32>
    %42 = arith.addf %35, %41 : vector<64x128xf32>
    %c0_48 = arith.constant 0 : index
    %c0_49 = arith.constant 0 : index
    %c2_50 = arith.constant 2 : index
    %c0_51 = arith.constant 0 : index
    %c0_52 = arith.constant 0 : index
    %43 = vector.load %arg2[%c0_48, %c0_49, %c2_50, %c0_51, %c0_52] : memref<1x1x10x10x8xbf16, #tpu.memory_space<vmem>>, vector<1x1x8x8x8xbf16>
    %44 = vector.shape_cast %43 : vector<1x1x8x8x8xbf16> to vector<8x8x8xbf16>
    %45 = vector.shape_cast %44 : vector<8x8x8xbf16> to vector<64x8xbf16>
    %c6 = arith.constant 6 : index
    %c0_53 = arith.constant 0 : index
    %c0_54 = arith.constant 0 : index
    %46 = vector.load %arg3[%c6, %c0_53, %c0_54] : memref<9x8x128xbf16, #tpu.memory_space<vmem>>, vector<1x8x128xbf16>
    %47 = vector.shape_cast %46 : vector<1x8x128xbf16> to vector<8x128xbf16>
    %cst_55 = arith.constant dense<0.000000e+00> : vector<64x128xf32>
    %48 = tpu.matmul %45, %47, %cst_55 {dimension_numbers = #tpu.dot_dimension_numbers<[1], [0], [0], [1], [0, 0, 1, 1], [], []>} : vector<64x8xbf16>, vector<8x128xbf16>, vector<64x128xf32> -> vector<64x128xf32>
    %49 = arith.addf %42, %48 : vector<64x128xf32>
    %c0_56 = arith.constant 0 : index
    %c0_57 = arith.constant 0 : index
    %c2_58 = arith.constant 2 : index
    %c1_59 = arith.constant 1 : index
    %c0_60 = arith.constant 0 : index
    %50 = vector.load %arg2[%c0_56, %c0_57, %c2_58, %c1_59, %c0_60] : memref<1x1x10x10x8xbf16, #tpu.memory_space<vmem>>, vector<1x1x8x8x8xbf16>
    %51 = vector.shape_cast %50 : vector<1x1x8x8x8xbf16> to vector<8x8x8xbf16>
    %52 = vector.shape_cast %51 : vector<8x8x8xbf16> to vector<64x8xbf16>
    %c7 = arith.constant 7 : index
    %c0_61 = arith.constant 0 : index
    %c0_62 = arith.constant 0 : index
    %53 = vector.load %arg3[%c7, %c0_61, %c0_62] : memref<9x8x128xbf16, #tpu.memory_space<vmem>>, vector<1x8x128xbf16>
    %54 = vector.shape_cast %53 : vector<1x8x128xbf16> to vector<8x128xbf16>
    %cst_63 = arith.constant dense<0.000000e+00> : vector<64x128xf32>
    %55 = tpu.matmul %52, %54, %cst_63 {dimension_numbers = #tpu.dot_dimension_numbers<[1], [0], [0], [1], [0, 0, 1, 1], [], []>} : vector<64x8xbf16>, vector<8x128xbf16>, vector<64x128xf32> -> vector<64x128xf32>
    %56 = arith.addf %49, %55 : vector<64x128xf32>
    %c0_64 = arith.constant 0 : index
    %c0_65 = arith.constant 0 : index
    %c2_66 = arith.constant 2 : index
    %c2_67 = arith.constant 2 : index
    %c0_68 = arith.constant 0 : index
    %57 = vector.load %arg2[%c0_64, %c0_65, %c2_66, %c2_67, %c0_68] : memref<1x1x10x10x8xbf16, #tpu.memory_space<vmem>>, vector<1x1x8x8x8xbf16>
    %58 = vector.shape_cast %57 : vector<1x1x8x8x8xbf16> to vector<8x8x8xbf16>
    %59 = vector.shape_cast %58 : vector<8x8x8xbf16> to vector<64x8xbf16>
    %c8 = arith.constant 8 : index
    %c0_69 = arith.constant 0 : index
    %c0_70 = arith.constant 0 : index
    %60 = vector.load %arg3[%c8, %c0_69, %c0_70] : memref<9x8x128xbf16, #tpu.memory_space<vmem>>, vector<1x8x128xbf16>
    %61 = vector.shape_cast %60 : vector<1x8x128xbf16> to vector<8x128xbf16>
    %cst_71 = arith.constant dense<0.000000e+00> : vector<64x128xf32>
    %62 = tpu.matmul %59, %61, %cst_71 {dimension_numbers = #tpu.dot_dimension_numbers<[1], [0], [0], [1], [0, 0, 1, 1], [], []>} : vector<64x8xbf16>, vector<8x128xbf16>, vector<64x128xf32> -> vector<64x128xf32>
    %63 = arith.addf %56, %62 : vector<64x128xf32>
    %c0_72 = arith.constant 0 : index
    %c0_73 = arith.constant 0 : index
    %64 = vector.load %arg4[%c0_72, %c0_73] : memref<1x128xf32, #tpu.memory_space<vmem>>, vector<1x128xf32>
    %65 = vector.broadcast %64 : vector<1x128xf32> to vector<64x128xf32>
    %66 = arith.addf %63, %65 : vector<64x128xf32>
    %cst_74 = arith.constant 0.000000e+00 : f32
    %67 = vector.broadcast %cst_74 : f32 to vector<64x128xf32>
    %68 = arith.subf %67, %66 : vector<64x128xf32>
    %69 = math.exp %68 : vector<64x128xf32>
    %cst_75 = arith.constant 1.000000e+00 : f32
    %70 = vector.broadcast %cst_75 : f32 to vector<64x128xf32>
    %71 = arith.addf %70, %69 : vector<64x128xf32>
    %72 = tpu.reciprocal %71 {approx = true} : vector<64x128xf32> -> vector<64x128xf32>
    %73 = arith.mulf %66, %72 : vector<64x128xf32>
    %c0_76 = arith.constant 0 : index
    %c0_77 = arith.constant 0 : index
    %c0_78 = arith.constant 0 : index
    %74 = vector.load %arg5[%c0_76, %c0_77, %c0_78] : memref<1x64x128xf32, #tpu.memory_space<vmem>>, vector<1x64x128xf32>
    %75 = vector.shape_cast %74 : vector<1x64x128xf32> to vector<64x128xf32>
    %76 = vector.shape_cast %73 : vector<64x128xf32> to vector<1x64x128xf32>
    tpu.vector_store %arg5[%c0_76, %c0_77, %c0_78], %76 {strides = array<i32>} : memref<1x64x128xf32, #tpu.memory_space<vmem>>, vector<1x64x128xf32>,
    return
  }
  func.func @transform_0(%arg0: i32, %arg1: i32) -> (i32, i32, i32, i32, i32) {
    %c0_i32 = arith.constant 0 : i32
    %c0_i32_0 = arith.constant 0 : i32
    %c0_i32_1 = arith.constant 0 : i32
    %c0_i32_2 = arith.constant 0 : i32
    %c0_i32_3 = arith.constant 0 : i32
    return %arg0, %c0_i32, %c0_i32_0, %c0_i32_1, %c0_i32_2 : i32, i32, i32, i32, i32
  }
  func.func @transform_1(%arg0: i32, %arg1: i32) -> (i32, i32, i32) {
    %c0_i32 = arith.constant 0 : i32
    %c0_i32_0 = arith.constant 0 : i32
    %c0_i32_1 = arith.constant 0 : i32
    return %c0_i32, %c0_i32_0, %arg1 : i32, i32, i32
  }
  func.func @transform_2(%arg0: i32, %arg1: i32) -> (i32, i32) {
    %c0_i32 = arith.constant 0 : i32
    %c0_i32_0 = arith.constant 0 : i32
    return %c0_i32, %arg1 : i32, i32
  }
  func.func @transform_3(%arg0: i32, %arg1: i32) -> (i32, i32, i32) {
    %c0_i32 = arith.constant 0 : i32
    %c0_i32_0 = arith.constant 0 : i32
    return %arg0, %c0_i32, %arg1 : i32, i32, i32
  }
}

</mosaic_0001>

<bundles_post_ra>
// kernel: multipool_forward.8
= control target key start
LH: loop header
LB: loop body
LE: loop exit
PB: predicated region body
PF: predicated region fallthrough
CT: control target
= control target key end

     0   :  { %s710_s12 = smov 0   ;;  %s788_s0 = inlined_call_operand.vmem [shape: bf16[2,18,8,4], index: 0, kind: input, shape index: {}]   ;;  %s789_s1 = inlined_call_operand.vmem [shape: bf16[2,18,8,4], index: 1, kind: input, shape index: {}]   ;;  %s790_s2 = inlined_call_operand.vmem [shape: bf16[2,18,8,4], index: 2, kind: input, shape index: {}]   ;;  %s791_s3 = inlined_call_operand.vmem [shape: bf16[2,8,8,4], index: 3, kind: output, shape index: {}]  }
   0x1 LB: > { %s543_s13 = sadd.s32 4294967295, %s688_s12   ;;  %p547_p0 = scmp.ge.s32.totalorder %s688_s12, 1  ;;  %s688_s12 = sphi %s710_s12, %s13_s12  }
   0x2   : > { %p157_p1 = scmp.lt.s32.totalorder %s688_s12, 3 }
   0x4   : > { %p158_p2 = pnand %p547_p0, %p157_p1 }
   0x5   : > { %p191_p3 = scmp.lt.s32.totalorder (!%p158_p2), %s543_s13, 1 }
   0x6   : > { %161 = sbr.rel (%p158_p2) target bundleno = 51 (0x33), region = 32 }
   0xb   : > { %s793_s13 = smov (!%p191_p3, %s543_s13), 1  ;;  %vm455_vm0 = vcmask 27648  }
   0xc   : > { %s673_s14 = smul.u32 72, %s793_s13  ;;  %s555_s24 = sshll.u32 %s793_s13, 5 }
   0xd   : > { %s756_s27 = scalar_lea.vmem %s791_s3, %s555_s24 }
   0xe   : > { %s724_s17 = scalar_lea.vmem %s788_s0, %s673_s14  ;;  %s729_s20 = scalar_lea.vmem %s789_s1, %s673_s14 }
   0xf   : > { %s734_s23 = scalar_lea.vmem %s790_s2, %s673_s14  ;;  %v557_v0 = vld [vmem:[%s724_s17] sm:$0xff]   ;;  %v652_v1 = vld [vmem:[%s724_s17 + $0x8] sm:$0xff]   ;;  %v653_v14 = vld [vmem:[%s724_s17 + $0x10] sm:$0xff]  }
  0x10   : > { %v589_v2 = vld [vmem:[%s729_s20] sm:$0xff]   ;;  %v558_v3 = vunpack.c.l.bf16 %v557_v0  ;;  %v559_v4 = vunpack.c.h.bf16 %v557_v0  ;;  %v562_v5 = vunpack.c.l.bf16 %v652_v1  ;;  %v659_v7 = vld [vmem:[%s729_s20 + $0x8] sm:$0xff]   ;;  %v660_v15 = vld [vmem:[%s729_s20 + $0x10] sm:$0xff]   ;;  %v563_v19 = vunpack.c.h.bf16 %v652_v1 }
  0x11   : > { %v590_v6 = vunpack.c.l.bf16 %v589_v2  ;;  %v621_v8 = vld [vmem:[%s734_s23] sm:$0xff]   ;;  %v666_v9 = vld [vmem:[%s734_s23 + $0x8] sm:$0xff]   ;;  %v591_v10 = vunpack.c.h.bf16 %v589_v2  ;;  %v594_v11 = vunpack.c.l.bf16 %v659_v7  ;;  %v667_v16 = vld [vmem:[%s734_s23 + $0x10] sm:$0xff]   ;;  %v566_v20 = vunpack.c.l.bf16 %v653_v14 }
  0x12   : > { %v622_v12 = vunpack.c.l.bf16 %v621_v8  ;;  %v623_v13 = vunpack.c.h.bf16 %v621_v8  ;;  %v626_v18 = vunpack.c.l.bf16 %v666_v9  ;;  %v595_v23 = vunpack.c.h.bf16 %v659_v7  ;;  %v654_v25 = vld [vmem:[%s724_s17 + $0x18] sm:$0xff]   ;;  %v655_v36 = vld [vmem:[%s724_s17 + $0x20] sm:$0xff]   ;;  %v656_v55 = vld [vmem:[%s724_s17 + $0x28] sm:$0xff]  }
  0x13   : > { %v279_v17 = vmax.f32 %v558_v3, %v590_v6  ;;  %v280_v21 = vmax.f32 %v559_v4, %v591_v10  ;;  %v281_v22 = vmax.f32 %v562_v5, %v594_v11  ;;  %v598_v24 = vunpack.c.l.bf16 %v660_v15  ;;  %v661_v26 = vld [vmem:[%s729_s20 + $0x18] sm:$0xff]   ;;  %v662_v41 = vld [vmem:[%s729_s20 + $0x20] sm:$0xff]   ;;  %v663_v60 = vld [vmem:[%s729_s20 + $0x28] sm:$0xff]  }
  0x14   : > { %v627_v28 = vunpack.c.h.bf16 %v666_v9  ;;  %v630_v29 = vunpack.c.l.bf16 %v667_v16  ;;  %v567_v30 = vunpack.c.h.bf16 %v653_v14  ;;  %v668_v31 = vld [vmem:[%s734_s23 + $0x18] sm:$0xff]   ;;  %v282_v34 = vmax.f32 %v563_v19, %v595_v23  ;;  %v669_v46 = vld [vmem:[%s734_s23 + $0x20] sm:$0xff]   ;;  %v670_v1 = vld [vmem:[%s734_s23 + $0x28] sm:$0xff]  }
  0x15   : > { %v364_v27 = vmax.f32 %v279_v17, %v622_v12  ;;  %v365_v32 = vmax.f32 %v280_v21, %v623_v13  ;;  %v366_v33 = vmax.f32 %v281_v22, %v626_v18  ;;  %v283_v35 = vmax.f32 %v566_v20, %v598_v24  ;;  %v657_v6 = vld [vmem:[%s724_s17 + $0x30] sm:$0xff]  }
  0x16   : > { %v570_v37 = vunpack.c.l.bf16 %v654_v25  ;;  %v599_v38 = vunpack.c.h.bf16 %v660_v15  ;;  %v602_v39 = vunpack.c.l.bf16 %v661_v26  ;;  %v631_v40 = vunpack.c.h.bf16 %v667_v16  ;;  %v664_v11 = vld [vmem:[%s729_s20 + $0x30] sm:$0xff]  }
  0x17   : > { %v414_v42 = vmax.f32 %v364_v27, %v365_v32  ;;  %v367_v43 = vmax.f32 %v282_v34, %v627_v28  ;;  %v368_v44 = vmax.f32 %v283_v35, %v630_v29  ;;  %v634_v45 = vunpack.c.l.bf16 %v668_v31  ;;  %v671_v16 = vld [vmem:[%s734_s23 + $0x30] sm:$0xff]   ;;  %v672_v35 = vld [vmem:[%s734_s23 + $0x38] sm:$0xff]  }
  0x18   : > { %v284_v47 = vmax.f32 %v567_v30, %v599_v38  ;;  %v285_v48 = vmax.f32 %v570_v37, %v602_v39  ;;  %v571_v49 = vunpack.c.h.bf16 %v654_v25  ;;  %v574_v50 = vunpack.c.l.bf16 %v655_v36  ;;  %v658_v25 = vld [vmem:[%s724_s17 + $0x38] sm:$0xff]  }
  0x19   : > { %v439_v51 = vmax.f32 %v414_v42, %v366_v33  ;;  %v415_v52 = vmax.f32 %v366_v33, %v367_v43  ;;  %v603_v53 = vunpack.c.h.bf16 %v661_v26  ;;  %v606_v54 = vunpack.c.l.bf16 %v662_v41  ;;  %v665_v26 = vld [vmem:[%s729_s20 + $0x38] sm:$0xff]  }
  0x1a   : > { %v369_v56 = vmax.f32 %v284_v47, %v631_v40  ;;  %v370_v57 = vmax.f32 %v285_v48, %v634_v45  ;;  %v635_v58 = vunpack.c.h.bf16 %v668_v31  ;;  %v638_v59 = vunpack.c.l.bf16 %v669_v46  ;;  %v227_v40 = vld [vmem:[%s724_s17 + $0x40] sm:$0xf] }
  0x1b   : > { %v447_v61 = vpack.c.bf16 %v439_v51, %v439_v51  ;;  %v440_v62 = vmax.f32 %v415_v52, %v368_v44  ;;  %v286_v63 = vmax.f32 %v571_v49, %v603_v53  ;;  %v287_v0 = vmax.f32 %v574_v50, %v606_v54  ;;  %v244_v45 = vld [vmem:[%s729_s20 + $0x40] sm:$0xf] }
  0x1c   : > { %v416_v2 = vmax.f32 %v368_v44, %v369_v56  ;;  %v575_v3 = vunpack.c.h.bf16 %v655_v36  ;;  %v578_v4 = vunpack.c.l.bf16 %v656_v55  ;;  %v607_v5 = vunpack.c.h.bf16 %v662_v41  ;;  %v329_v50 = vld [vmem:[%s734_s23 + $0x40] sm:$0xf] }
  0x1d   : > { %456 = vst.msk [vmem:[%s756_s27] sm:$0xf] %vm455_vm0, %v447_v61  ;;  %v448_v7 = vpack.c.bf16 %v440_v62, %v440_v62  ;;  %v371_v8 = vmax.f32 %v286_v63, %v635_v58  ;;  %v372_v9 = vmax.f32 %v287_v0, %v638_v59  ;;  %v610_v10 = vunpack.c.l.bf16 %v663_v60 }
  0x1e   : > { %v441_v12 = vmax.f32 %v416_v2, %v370_v57  ;;  %v288_v13 = vmax.f32 %v575_v3, %v607_v5  ;;  %v639_v14 = vunpack.c.h.bf16 %v669_v46  ;;  %v642_v15 = vunpack.c.l.bf16 %v670_v1 }
  0x1f   : > { %457 = vst.msk [vmem:[%s756_s27 + $0x4] sm:$0xf] %vm455_vm0, %v448_v7  ;;  %v417_v17 = vmax.f32 %v370_v57, %v371_v8  ;;  %v289_v18 = vmax.f32 %v578_v4, %v610_v10  ;;  %v579_v19 = vunpack.c.h.bf16 %v656_v55  ;;  %v582_v20 = vunpack.c.l.bf16 %v657_v6 }
  0x20   : > { %v449_v21 = vpack.c.bf16 %v441_v12, %v441_v12  ;;  %v373_v22 = vmax.f32 %v288_v13, %v639_v14  ;;  %v611_v23 = vunpack.c.h.bf16 %v663_v60  ;;  %v614_v24 = vunpack.c.l.bf16 %v664_v11 }
  0x21   : > { %v442_v27 = vmax.f32 %v417_v17, %v372_v9  ;;  %v374_v28 = vmax.f32 %v289_v18, %v642_v15  ;;  %v643_v29 = vunpack.c.h.bf16 %v670_v1  ;;  %v646_v30 = vunpack.c.l.bf16 %v671_v16 }
  0x22   : > { %458 = vst.msk [vmem:[%s756_s27 + $0x8] sm:$0xf] %vm455_vm0, %v449_v21  ;;  %v418_v31 = vmax.f32 %v372_v9, %v373_v22  ;;  %v290_v32 = vmax.f32 %v579_v19, %v611_v23  ;;  %v291_v33 = vmax.f32 %v582_v20, %v614_v24  ;;  %v583_v34 = vunpack.c.h.bf16 %v657_v6 }
  0x23   : > { %v450_v36 = vpack.c.bf16 %v442_v27, %v442_v27  ;;  %v586_v37 = vunpack.c.l.bf16 %v658_v25  ;;  %v615_v38 = vunpack.c.h.bf16 %v664_v11  ;;  %v618_v39 = vunpack.c.l.bf16 %v665_v26 }
  0x24   : > { %v443_v41 = vmax.f32 %v418_v31, %v374_v28  ;;  %v375_v42 = vmax.f32 %v290_v32, %v643_v29  ;;  %v376_v43 = vmax.f32 %v291_v33, %v646_v30  ;;  %v647_v44 = vunpack.c.h.bf16 %v671_v16 }
  0x25   : > { %459 = vst.msk [vmem:[%s756_s27 + $0xc] sm:$0xf] %vm455_vm0, %v450_v36  ;;  %v292_v46 = vmax.f32 %v583_v34, %v615_v38  ;;  %v293_v47 = vmax.f32 %v586_v37, %v618_v39  ;;  %v650_v48 = vunpack.c.l.bf16 %v672_v35  ;;  %v587_v49 = vunpack.c.h.bf16 %v658_v25 }
  0x26   : > { %v451_v51 = vpack.c.bf16 %v443_v41, %v443_v41  ;;  %v419_v52 = vmax.f32 %v374_v28, %v375_v42  ;;  %v619_v53 = vunpack.c.h.bf16 %v665_v26  ;;  %v261_v54 = vunpack.c.l.bf16 %v227_v40 }
  0x27   : > { %v377_v55 = vmax.f32 %v292_v46, %v647_v44  ;;  %v278_v56 = vunpack.c.l.bf16 %v244_v45  ;;  %v651_v57 = vunpack.c.h.bf16 %v672_v35  ;;  %v378_v59 = vmax.f32 %v293_v47, %v650_v48 }
  0x28   : > { %460 = vst.msk [vmem:[%s756_s27 + $0x10] sm:$0xf] %vm455_vm0, %v451_v51  ;;  %v444_v58 = vmax.f32 %v419_v52, %v376_v43  ;;  %v294_v60 = vmax.f32 %v587_v49, %v619_v53  ;;  %v363_v61 = vunpack.c.l.bf16 %v329_v50 }
  0x29   : > { %v420_v62 = vmax.f32 %v376_v43, %v377_v55  ;;  %v295_v63 = vmax.f32 %v261_v54, %v278_v56 }
  0x2a   : > { %v452_v0 = vpack.c.bf16 %v444_v58, %v444_v58  ;;  %v379_v1 = vmax.f32 %v294_v60, %v651_v57 }
  0x2b   : > { %v445_v2 = vmax.f32 %v420_v62, %v378_v59  ;;  %v380_v3 = vmax.f32 %v295_v63, %v363_v61 }
  0x2c   : > { %461 = vst.msk [vmem:[%s756_s27 + $0x14] sm:$0xf] %vm455_vm0, %v452_v0  ;;  %v421_v4 = vmax.f32 %v378_v59, %v379_v1 }
  0x2d   : > { %v453_v5 = vpack.c.bf16 %v445_v2, %v445_v2 }
  0x2e   : > { %v446_v6 = vmax.f32 %v421_v4, %v380_v3 }
  0x2f   : > { %462 = vst.msk [vmem:[%s756_s27 + $0x18] sm:$0xf] %vm455_vm0, %v453_v5 }
  0x30   : > { %v454_v7 = vpack.c.bf16 %v446_v6, %v446_v6 }
  0x32   : > { %463 = vst.msk [vmem:[%s756_s27 + $0x1c] sm:$0xf] %vm455_vm0, %v454_v7 }
  0x33 PF: > { %s13_s12 = sadd.s32 1, %s688_s12  }
  0x34   : > { %p10_p4 = scmp.ge.s32.totalorder %s13_s12, 4  }
  0x36   :  { %12 = sbr.rel (!%p10_p4) target bundleno = 1 (0x1), region = 68 }

// kernel: multipool_forward.9
= control target key start
LH: loop header
LB: loop body
LE: loop exit
PB: predicated region body
PF: predicated region fallthrough
CT: control target
= control target key end

     0   :  { %s473_s12 = smov 0   ;;  %s537_s0 = inlined_call_operand.vmem [shape: bf16[2,10,4,4], index: 0, kind: input, shape index: {}]   ;;  %s538_s1 = inlined_call_operand.vmem [shape: bf16[2,10,4,4], index: 1, kind: input, shape index: {}]   ;;  %s539_s2 = inlined_call_operand.vmem [shape: bf16[2,10,4,4], index: 2, kind: input, shape index: {}]   ;;  %s540_s3 = inlined_call_operand.vmem [shape: bf16[2,4,4,4], index: 3, kind: output, shape index: {}]  }
   0x1 LB: > { %s423_s13 = sadd.s32 4294967295, %s451_s12   ;;  %p427_p0 = scmp.ge.s32.totalorder %s451_s12, 1  ;;  %s451_s12 = sphi %s473_s12, %s13_s12  }
   0x2   : > { %p157_p1 = scmp.lt.s32.totalorder %s451_s12, 3 }
   0x4   : > { %p158_p2 = pnand %p427_p0, %p157_p1 }
   0x5   : > { %p191_p3 = scmp.lt.s32.totalorder (!%p158_p2), %s423_s13, 1 }
   0x6   : > { %161 = sbr.rel (%p158_p2) target bundleno = 39 (0x27), region = 32 }
   0xb   : > { %s542_s13 = smov (!%p191_p3, %s423_s13), 1  ;;  %vm339_vm0 = vcmask 25600  }
   0xc   : > { %s436_s14 = smul.u32 20, %s542_s13  ;;  %s435_s24 = sshll.u32 %s542_s13, 3 }
   0xd   : > { %s210_s27 = scalar_lea.vmem %s540_s3, %s435_s24 }
   0xe   : > { %s487_s17 = scalar_lea.vmem %s537_s0, %s436_s14  ;;  %s492_s20 = scalar_lea.vmem %s538_s1, %s436_s14 }
   0xf   : > { %s497_s23 = scalar_lea.vmem %s539_s2, %s436_s14  ;;  %v211_v0 = vld [vmem:[%s487_s17] sm:$0x3]  ;;  %v212_v1 = vld [vmem:[%s487_s17 + $0x2] sm:$0x3]  ;;  %v213_v2 = vld [vmem:[%s487_s17 + $0x4] sm:$0x3] }
  0x10   : > { %v220_v3 = vld [vmem:[%s492_s20] sm:$0x3]  ;;  %v221_v4 = vld [vmem:[%s492_s20 + $0x2] sm:$0x3]  ;;  %v222_v5 = vld [vmem:[%s492_s20 + $0x4] sm:$0x3]  ;;  %v229_v6 = vunpack.c.l.bf16 %v211_v0  ;;  %v230_v7 = vunpack.c.l.bf16 %v212_v1  ;;  %v231_v8 = vunpack.c.l.bf16 %v213_v2 }
  0x11   : > { %v238_v9 = vunpack.c.l.bf16 %v220_v3  ;;  %v239_v10 = vunpack.c.l.bf16 %v221_v4  ;;  %v240_v11 = vunpack.c.l.bf16 %v222_v5  ;;  %v265_v12 = vld [vmem:[%s497_s23] sm:$0x3]  ;;  %v266_v13 = vld [vmem:[%s497_s23 + $0x2] sm:$0x3]  ;;  %v267_v14 = vld [vmem:[%s497_s23 + $0x4] sm:$0x3] }
  0x12   : > { %v283_v15 = vunpack.c.l.bf16 %v265_v12  ;;  %v284_v16 = vunpack.c.l.bf16 %v266_v13  ;;  %v285_v17 = vunpack.c.l.bf16 %v267_v14  ;;  %v214_v18 = vld [vmem:[%s487_s17 + $0x6] sm:$0x3]  ;;  %v215_v19 = vld [vmem:[%s487_s17 + $0x8] sm:$0x3]  ;;  %v216_v32 = vld [vmem:[%s487_s17 + $0xa] sm:$0x3] }
  0x13   : > { %v223_v20 = vld [vmem:[%s492_s20 + $0x6] sm:$0x3]  ;;  %v247_v21 = vmax.f32 %v229_v6, %v238_v9  ;;  %v248_v22 = vmax.f32 %v230_v7, %v239_v10  ;;  %v249_v23 = vmax.f32 %v231_v8, %v240_v11  ;;  %v224_v24 = vld [vmem:[%s492_s20 + $0x8] sm:$0x3]  ;;  %v232_v25 = vunpack.c.l.bf16 %v214_v18  ;;  %v217_v33 = vld [vmem:[%s487_s17 + $0xc] sm:$0x3] }
  0x14   : > { %v268_v26 = vld [vmem:[%s497_s23 + $0x6] sm:$0x3]  ;;  %v269_v27 = vld [vmem:[%s497_s23 + $0x8] sm:$0x3]  ;;  %v233_v28 = vunpack.c.l.bf16 %v215_v19  ;;  %v241_v29 = vunpack.c.l.bf16 %v223_v20  ;;  %v242_v30 = vunpack.c.l.bf16 %v224_v24  ;;  %v225_v34 = vld [vmem:[%s492_s20 + $0xa] sm:$0x3]  ;;  %v234_v44 = vunpack.c.l.bf16 %v216_v32 }
  0x15   : > { %v286_v31 = vunpack.c.l.bf16 %v268_v26  ;;  %v292_v35 = vmax.f32 %v247_v21, %v283_v15  ;;  %v293_v36 = vmax.f32 %v248_v22, %v284_v16  ;;  %v294_v37 = vmax.f32 %v249_v23, %v285_v17  ;;  %v226_v39 = vld [vmem:[%s492_s20 + $0xc] sm:$0x3]  ;;  %v270_v40 = vld [vmem:[%s497_s23 + $0xa] sm:$0x3]  ;;  %v218_v46 = vld [vmem:[%s487_s17 + $0xe] sm:$0x3] }
  0x16   : > { %v287_v38 = vunpack.c.l.bf16 %v269_v27  ;;  %v271_v41 = vld [vmem:[%s497_s23 + $0xc] sm:$0x3]  ;;  %v250_v42 = vmax.f32 %v232_v25, %v241_v29  ;;  %v251_v43 = vmax.f32 %v233_v28, %v242_v30  ;;  %v235_v45 = vunpack.c.l.bf16 %v217_v33  ;;  %v219_v47 = vld [vmem:[%s487_s17 + $0x10] sm:$0x3]  ;;  %v227_v52 = vld [vmem:[%s492_s20 + $0xe] sm:$0x3] }
  0x17   : > { %v318_v48 = vmax.f32 %v292_v35, %v293_v36  ;;  %v243_v49 = vunpack.c.l.bf16 %v225_v34  ;;  %v244_v50 = vunpack.c.l.bf16 %v226_v39  ;;  %v288_v51 = vunpack.c.l.bf16 %v270_v40  ;;  %v228_v53 = vld [vmem:[%s492_s20 + $0x10] sm:$0x3]  ;;  %v272_v54 = vld [vmem:[%s497_s23 + $0xe] sm:$0x3] }
  0x18   : > { %v295_v55 = vmax.f32 %v250_v42, %v286_v31  ;;  %v296_v56 = vmax.f32 %v251_v43, %v287_v38  ;;  %v289_v57 = vunpack.c.l.bf16 %v271_v41  ;;  %v236_v58 = vunpack.c.l.bf16 %v218_v46  ;;  %v273_v59 = vld [vmem:[%s497_s23 + $0x10] sm:$0x3] }
  0x19   : > { %v331_v60 = vmax.f32 %v318_v48, %v294_v37  ;;  %v252_v61 = vmax.f32 %v234_v44, %v243_v49  ;;  %v253_v62 = vmax.f32 %v235_v45, %v244_v50  ;;  %v237_v63 = vunpack.c.l.bf16 %v219_v47 }
  0x1a   : > { %v319_v0 = vmax.f32 %v294_v37, %v295_v55  ;;  %v245_v1 = vunpack.c.l.bf16 %v227_v52  ;;  %v246_v2 = vunpack.c.l.bf16 %v228_v53  ;;  %v290_v3 = vunpack.c.l.bf16 %v272_v54 }
  0x1b   : > { %v335_v4 = vpack.c.bf16 %v331_v60, %v331_v60  ;;  %v297_v5 = vmax.f32 %v252_v61, %v288_v51  ;;  %v291_v6 = vunpack.c.l.bf16 %v273_v59  ;;  %v298_v8 = vmax.f32 %v253_v62, %v289_v57 }
  0x1c   : > { %v332_v7 = vmax.f32 %v319_v0, %v296_v56  ;;  %v254_v9 = vmax.f32 %v236_v58, %v245_v1  ;;  %v255_v10 = vmax.f32 %v237_v63, %v246_v2 }
  0x1d   : > { %340 = vst.msk [vmem:[%s210_s27] sm:$0x3] %vm339_vm0, %v335_v4  ;;  %v320_v11 = vmax.f32 %v296_v56, %v297_v5 }
  0x1e   : > { %v336_v12 = vpack.c.bf16 %v332_v7, %v332_v7  ;;  %v299_v13 = vmax.f32 %v254_v9, %v290_v3  ;;  %v300_v14 = vmax.f32 %v255_v10, %v291_v6 }
  0x1f   : > { %v333_v15 = vmax.f32 %v320_v11, %v298_v8 }
  0x20   : > { %341 = vst.msk [vmem:[%s210_s27 + $0x2] sm:$0x3] %vm339_vm0, %v336_v12  ;;  %v321_v16 = vmax.f32 %v298_v8, %v299_v13 }
  0x21   : > { %v337_v17 = vpack.c.bf16 %v333_v15, %v333_v15 }
  0x22   : > { %v334_v18 = vmax.f32 %v321_v16, %v300_v14 }
  0x23   : > { %342 = vst.msk [vmem:[%s210_s27 + $0x4] sm:$0x3] %vm339_vm0, %v337_v17 }
  0x24   : > { %v338_v19 = vpack.c.bf16 %v334_v18, %v334_v18 }
  0x26   : > { %343 = vst.msk [vmem:[%s210_s27 + $0x6] sm:$0x3] %vm339_vm0, %v338_v19 }
  0x27 PF: > { %s13_s12 = sadd.s32 1, %s451_s12  }
  0x28   : > { %p10_p4 = scmp.ge.s32.totalorder %s13_s12, 4  }
  0x2a   :  { %12 = sbr.rel (!%p10_p4) target bundleno = 1 (0x1), region = 68 }

// kernel: multipool_forward.10
= control target key start
LH: loop header
LB: loop body
LE: loop exit
PB: predicated region body
PF: predicated region fallthrough
CT: control target
= control target key end

     0   :  { %s395_s12 = smov 0   ;;  %s422_s0 = inlined_call_operand.vmem [shape: bf16[2,6,2,4], index: 0, kind: input, shape index: {}]   ;;  %s423_s1 = inlined_call_operand.vmem [shape: bf16[2,6,2,4], index: 1, kind: input, shape index: {}]   ;;  %s424_s2 = inlined_call_operand.vmem [shape: bf16[2,6,2,4], index: 2, kind: input, shape index: {}]   ;;  %s425_s3 = inlined_call_operand.vmem [shape: bf16[2,2,2,4], index: 3, kind: output, shape index: {}]  }
   0x1 LB: > { %s350_s13 = sadd.s32 4294967295, %s373_s12   ;;  %p354_p0 = scmp.ge.s32.totalorder %s373_s12, 1  ;;  %s373_s12 = sphi %s395_s12, %s13_s12  }
   0x2   : > { %p154_p1 = scmp.lt.s32.totalorder %s373_s12, 3 }
   0x4   : > { %p155_p2 = pnand %p354_p0, %p154_p1 }
   0x5   : > { %p184_p3 = scmp.lt.s32.totalorder (!%p155_p2), %s350_s13, 1 }
   0x6   : > { %158 = sbr.rel (%p155_p2) target bundleno = 33 (0x21), region = 32 }
   0xb   : > { %s427_s13 = smov (!%p184_p3, %s350_s13), 1  ;;  %vm270_vm0 = vcmask 24576  }
   0xc   : > { %s358_s14 = smul.u32 6, %s427_s13  ;;  %s355_s24 = sshll.u32 %s427_s13, 1 }
   0xd   : > { %s199_s27 = scalar_lea.vmem %s425_s3, %s355_s24 }
   0xe   : > { %s187_s17 = scalar_lea.vmem %s422_s0, %s358_s14  ;;  %s191_s20 = scalar_lea.vmem %s423_s1, %s358_s14 }
   0xf   : > { %s195_s23 = scalar_lea.vmem %s424_s2, %s358_s14  ;;  %v200_v0 = vld [vmem:[%s187_s17] sm:$0x1]  ;;  %v201_v1 = vld [vmem:[%s187_s17 + $0x1] sm:$0x1]  ;;  %v202_v2 = vld [vmem:[%s187_s17 + $0x2] sm:$0x1] }
  0x10   : > { %v205_v3 = vld [vmem:[%s191_s20] sm:$0x1]  ;;  %v206_v4 = vld [vmem:[%s191_s20 + $0x1] sm:$0x1]  ;;  %v207_v5 = vld [vmem:[%s191_s20 + $0x2] sm:$0x1]  ;;  %v210_v6 = vunpack.c.l.bf16 %v200_v0  ;;  %v211_v7 = vunpack.c.l.bf16 %v201_v1  ;;  %v212_v8 = vunpack.c.l.bf16 %v202_v2 }
  0x11   : > { %v215_v9 = vunpack.c.l.bf16 %v205_v3  ;;  %v216_v10 = vunpack.c.l.bf16 %v206_v4  ;;  %v217_v11 = vunpack.c.l.bf16 %v207_v5  ;;  %v230_v12 = vld [vmem:[%s195_s23] sm:$0x1]  ;;  %v231_v13 = vld [vmem:[%s195_s23 + $0x1] sm:$0x1]  ;;  %v232_v14 = vld [vmem:[%s195_s23 + $0x2] sm:$0x1] }
  0x12   : > { %v240_v15 = vunpack.c.l.bf16 %v230_v12  ;;  %v241_v16 = vunpack.c.l.bf16 %v231_v13  ;;  %v242_v17 = vunpack.c.l.bf16 %v232_v14  ;;  %v203_v18 = vld [vmem:[%s187_s17 + $0x3] sm:$0x1]  ;;  %v204_v19 = vld [vmem:[%s187_s17 + $0x4] sm:$0x1] }
  0x13   : > { %v208_v20 = vld [vmem:[%s191_s20 + $0x3] sm:$0x1]  ;;  %v220_v21 = vmax.f32 %v210_v6, %v215_v9  ;;  %v221_v22 = vmax.f32 %v211_v7, %v216_v10  ;;  %v222_v23 = vmax.f32 %v212_v8, %v217_v11  ;;  %v209_v24 = vld [vmem:[%s191_s20 + $0x4] sm:$0x1]  ;;  %v213_v25 = vunpack.c.l.bf16 %v203_v18 }
  0x14   : > { %v233_v26 = vld [vmem:[%s195_s23 + $0x3] sm:$0x1]  ;;  %v234_v27 = vld [vmem:[%s195_s23 + $0x4] sm:$0x1]  ;;  %v214_v28 = vunpack.c.l.bf16 %v204_v19  ;;  %v218_v29 = vunpack.c.l.bf16 %v208_v20  ;;  %v219_v30 = vunpack.c.l.bf16 %v209_v24 }
  0x15   : > { %v243_v31 = vunpack.c.l.bf16 %v233_v26  ;;  %v245_v32 = vmax.f32 %v220_v21, %v240_v15  ;;  %v246_v33 = vmax.f32 %v221_v22, %v241_v16  ;;  %v244_v34 = vunpack.c.l.bf16 %v234_v27 }
  0x16   : > { %v247_v35 = vmax.f32 %v222_v23, %v242_v17  ;;  %v223_v36 = vmax.f32 %v213_v25, %v218_v29  ;;  %v224_v37 = vmax.f32 %v214_v28, %v219_v30 }
  0x17   : > { %v259_v38 = vmax.f32 %v245_v32, %v246_v33 }
  0x18   : > { %v248_v39 = vmax.f32 %v223_v36, %v243_v31  ;;  %v249_v40 = vmax.f32 %v224_v37, %v244_v34 }
  0x19   : > { %v266_v41 = vmax.f32 %v259_v38, %v247_v35 }
  0x1a   : > { %v260_v42 = vmax.f32 %v247_v35, %v248_v39 }
  0x1b   : > { %v268_v43 = vpack.c.bf16 %v266_v41, %v266_v41 }
  0x1c   : > { %v267_v44 = vmax.f32 %v260_v42, %v249_v40 }
  0x1d   : > { %271 = vst.msk [vmem:[%s199_s27] sm:$0x1] %vm270_vm0, %v268_v43 }
  0x1e   : > { %v269_v45 = vpack.c.bf16 %v267_v44, %v267_v44 }
  0x20   : > { %272 = vst.msk [vmem:[%s199_s27 + $0x1] sm:$0x1] %vm270_vm0, %v269_v45 }
  0x21 PF: > { %s13_s12 = sadd.s32 1, %s373_s12  }
  0x22   : > { %p10_p4 = scmp.ge.s32.totalorder %s13_s12, 4  }
  0x24   :  { %12 = sbr.rel (!%p10_p4) target bundleno = 1 (0x1), region = 68 }

// kernel: multipool_forward.13
= control target key start
LH: loop header
LB: loop body
LE: loop exit
PB: predicated region body
PF: predicated region fallthrough
CT: control target
= control target key end

     0   :  { %s479_s12 = smov 0   ;;  %s481_s13 = smov 0   ;;  %s518_s0 = inlined_call_operand.vmem [shape: bf16[32,4], index: 0, kind: input, shape index: {}]   ;;  %s519_s1 = inlined_call_operand.vmem [shape: bf16[4,128], index: 1, kind: input, shape index: {}]   ;;  %s520_s2 = inlined_call_operand.vmem [shape: f32[1,128], index: 2, kind: input, shape index: {}]   ;;  %s521_s3 = inlined_call_operand.vmem [shape: bf16[32,128], index: 3, kind: output, shape index: {}]  }
   0x1   :  { %s483_s14 = smov 0  }
   0x2 LB: > { %s25_s15 = sadd.s32 1, %s453_s13  ;;  %p384_p0 = scmp.ge.s32.totalorder %s457_s14, 1  ;;  %s457_s14 = sphi %s483_s14, %s13_s14   ;;  %s453_s13 = sphi %s481_s13, %s523_s13   ;;  %s449_s12 = sphi %s479_s12, %s522_s12  }
   0x3   : > { %p27_p1 = scmp.ge.s32.totalorder %s25_s15, 2  ;;  %p169_p2 = scmp.lt.s32.totalorder %s457_s14, 3 }
   0x5   : > { %s525_s15 = smov (%p27_p1, %s25_s15), 0  ;;  %p170_p3 = pnand %p384_p0, %p169_p2 }
   0x6   : > { %s385_s18 = sshll.u32 (!%p170_p3), %s449_s12, 1 }
   0x7   : > { %173 = sbr.rel (%p170_p3) target bundleno = 178 (0xb2), region = 32  ;;  %p204_p4 = scmp.lt.s32.totalorder (!%p170_p3), %s385_s18, 3 }
   0xc   : > { %v228_v0 = vld [vmem:[%s519_s1] sm:$0x3]  ;;  %vm242_vm0 = vcmask 1041408   ;;  %s527_s18 = smov (!%p204_p4, %s385_s18), 3  ;;  %vm238_vm1 = vcmask 31744  }
   0xd   : > { %v244_v1 = vsel %vm242_vm0, %v228_v0, 0  ;;  %s386_s19 = sshll.u32 %s527_s18, 2  ;;  %v426_v3 = vld [vmem:[%s520_s2] ss:$0 sm:$0xff] }
   0xe   : > { %253 = vmatpush.bf16.msra.mxu0 %v244_v1  ;;  %s207_s22 = scalar_lea.vmem %s518_s0, %s386_s19  ;;  %s223_s27 = scalar_lea.vmem %s521_s3, %s386_s19 }
   0xf   : > { %v396_v2 = vld [vmem:[%s207_s22] sm:$0xff] }
  0x11   : > { %393 = vmatmul.msk.bf16.vlgmr.msra.gmra.mxu0 %vm238_vm1, %v396_v2 }
  0x8e   : > { %v255_v4 = vpop.f32.mrf.mxu0 }
  0x8f   : > { %v256_v5 = vadd.f32 %v426_v3, %v255_v4 }
  0x91   : > { %v260_v6 = vsub.f32 0.0, %v256_v5 }
  0x93   : > { %v262_v7 = vmul.f32 1.442695, %v260_v6 }
  0x95   : > { %427 = vpow2.f32 %v262_v7 }
  0x96   : > { %v257_v8 = vpop.f32.mrf.mxu0 }
  0x97   : > { %v258_v9 = vadd.f32 %v426_v3, %v257_v8 }
  0x99   : > { %v261_v10 = vsub.f32 0.0, %v258_v9 }
  0x9b   : > { %v264_v11 = vmul.f32 1.442695, %v261_v10  ;;  %v428_v12 = vpop.eup %427 }
  0x9c   : > { %v266_v13 = vadd.f32 1.0, %v428_v12 }
  0x9d   : > { %429 = vpow2.f32 %v264_v11 }
  0x9e   : > { %431 = vrcp.f32 %v266_v13 }
  0xa3   : > { %v430_v14 = vpop.eup %429 }
  0xa4   : > { %v267_v15 = vadd.f32 1.0, %v430_v14  ;;  %v432_v16 = vpop.eup %431 }
  0xa5   : > { %v270_v18 = vmul.f32 %v432_v16, %v256_v5 }
  0xa6   : > { %433 = vrcp.f32 %v267_v15 }
  0xac   : > { %v434_v17 = vpop.eup %433 }
  0xad   : > { %v271_v19 = vmul.f32 %v434_v17, %v258_v9 }
  0xaf   : > { %v400_v20 = vpack.c.bf16 %v271_v19, %v270_v18 }
  0xb1   : > { %401 = vst [vmem:[%s223_s27] sm:$0xff] %v400_v20  }
  0xb2 PF: > { %s13_s14 = sadd.s32 1, %s457_s14   ;;  %s522_s12 = smov %s453_s13 }
  0xb3   : > { %p10_p5 = scmp.ge.s32.totalorder %s13_s14, 4   ;;  %s523_s13 = smov %s525_s15 }
  0xb5   :  { %12 = sbr.rel (!%p10_p5) target bundleno = 2 (0x2), region = 68 }

// kernel: multipool_forward.14
= control target key start
LH: loop header
LB: loop body
LE: loop exit
PB: predicated region body
PF: predicated region fallthrough
CT: control target
= control target key end

     0   :  { %vm31_vm0 = vcmask 1041408   ;;  %vm27_vm1 = vcmask 31744   ;;  %s121_s1 = inlined_call_operand.vmem [shape: bf16[4,128], index: 1, kind: input, shape index: {}]   ;;  %s122_s0 = inlined_call_operand.vmem [shape: bf16[16,4], index: 0, kind: input, shape index: {}]   ;;  %s123_s2 = inlined_call_operand.vmem [shape: f32[1,128], index: 2, kind: input, shape index: {}]   ;;  %s124_s3 = inlined_call_operand.vmem [shape: bf16[16,128], index: 3, kind: output, shape index: {}]  }
   0x1   :  { %v17_v0 = vld [vmem:[%s121_s1] sm:$0x3] }
   0x2   :  { %v33_v1 = vsel %vm31_vm0, %v17_v0, 0  ;;  %v74_v2 = vld [vmem:[%s122_s0] sm:$0xff] }
   0x3   :  { %42 = vmatpush.bf16.msra.mxu0 %v33_v1  ;;  %v80_v3 = vld [vmem:[%s123_s2] ss:$0 sm:$0xff] }
   0x6   :  { %73 = vmatmul.msk.bf16.vlgmr.msra.gmra.mxu0 %vm27_vm1, %v74_v2 }
  0x83   :  { %v44_v4 = vpop.f32.mrf.mxu0 }
  0x84   :  { %v45_v5 = vadd.f32 %v80_v3, %v44_v4 }
  0x86   :  { %v49_v6 = vsub.f32 0.0, %v45_v5 }
  0x88   :  { %v51_v7 = vmul.f32 1.442695, %v49_v6 }
  0x8a   :  { %81 = vpow2.f32 %v51_v7 }
  0x8b   :  { %v46_v8 = vpop.f32.mrf.mxu0 }
  0x8c   :  { %v47_v9 = vadd.f32 %v80_v3, %v46_v8 }
  0x8e   :  { %v50_v10 = vsub.f32 0.0, %v47_v9 }
  0x90   :  { %v53_v11 = vmul.f32 1.442695, %v50_v10  ;;  %v82_v12 = vpop.eup %81 }
  0x91   :  { %v55_v13 = vadd.f32 1.0, %v82_v12 }
  0x92   :  { %83 = vpow2.f32 %v53_v11 }
  0x93   :  { %85 = vrcp.f32 %v55_v13 }
  0x98   :  { %v84_v14 = vpop.eup %83 }
  0x99   :  { %v56_v15 = vadd.f32 1.0, %v84_v14  ;;  %v86_v16 = vpop.eup %85 }
  0x9a   :  { %v59_v18 = vmul.f32 %v86_v16, %v45_v5 }
  0x9b   :  { %87 = vrcp.f32 %v56_v15 }
  0xa1   :  { %v88_v17 = vpop.eup %87 }
  0xa2   :  { %v60_v19 = vmul.f32 %v88_v17, %v47_v9 }
  0xa4   :  { %v78_v20 = vpack.c.bf16 %v60_v19, %v59_v18 }
  0xa6   :  { %79 = vst [vmem:[%s124_s3] sm:$0xff] %v78_v20  }

// kernel: multipool_forward.11
= control target key start
LH: loop header
LB: loop body
LE: loop exit
PB: predicated region body
PF: predicated region fallthrough
CT: control target
= control target key end

     0   :  { %s635_s12 = smov 0   ;;  %s637_s13 = smov 0   ;;  %s697_s0 = inlined_call_operand.vmem [shape: bf16[128,4], index: 0, kind: input, shape index: {}]   ;;  %s698_s1 = inlined_call_operand.vmem [shape: bf16[4,128], index: 1, kind: input, shape index: {}]   ;;  %s699_s2 = inlined_call_operand.vmem [shape: f32[1,128], index: 2, kind: input, shape index: {}]   ;;  %s700_s3 = inlined_call_operand.vmem [shape: bf16[128,128], index: 3, kind: output, shape index: {}]  }
   0x1   :  { %s639_s14 = smov 0  }
   0x2 LB: > { %s25_s15 = sadd.s32 1, %s609_s13  ;;  %p477_p0 = scmp.ge.s32.totalorder %s613_s14, 1  ;;  %s613_s14 = sphi %s639_s14, %s13_s14   ;;  %s609_s13 = sphi %s637_s13, %s702_s13   ;;  %s605_s12 = sphi %s635_s12, %s701_s12  }
   0x3   : > { %p27_p1 = scmp.ge.s32.totalorder %s25_s15, 2  ;;  %p169_p2 = scmp.lt.s32.totalorder %s613_s14, 3 }
   0x5   : > { %s704_s15 = smov (%p27_p1, %s25_s15), 0  ;;  %p170_p3 = pnand %p477_p0, %p169_p2 }
   0x6   : > { %s478_s18 = sshll.u32 (!%p170_p3), %s605_s12, 3 }
   0x7   : > { %173 = sbr.rel (%p170_p3) target bundleno = 187 (0xbb), region = 32  ;;  %p204_p4 = scmp.lt.s32.totalorder (!%p170_p3), %s478_s18, 15 }
   0xc   : > { %v234_v0 = vld [vmem:[%s698_s1] sm:$0x3]  ;;  %vm272_vm0 = vcmask 1041408   ;;  %s706_s18 = smov (!%p204_p4, %s478_s18), 15  ;;  %vm259_vm1 = vcmask 31744  }
   0xd   : > { %v274_v1 = vsel %vm272_vm0, %v234_v0, 0  ;;  %s479_s19 = sshll.u32 %s706_s18, 2  ;;  %v558_v6 = vld [vmem:[%s699_s2] ss:$0 sm:$0xff] }
   0xe   : > { %283 = vmatpush.bf16.msra.mxu0 %v274_v1  ;;  %531 = vmatpush.bf16.msra.mxu1 %v274_v1  ;;  %s207_s22 = scalar_lea.vmem %s697_s0, %s479_s19  ;;  %s223_s27 = scalar_lea.vmem %s700_s3, %s479_s19 }
   0xf   : > { %532 = vmatpush.bf16.msra.mxu2 %v274_v1  ;;  %533 = vmatpush.bf16.msra.mxu3 %v274_v1  ;;  %v504_v2 = vld [vmem:[%s207_s22] sm:$0xff]  ;;  %v505_v3 = vld [vmem:[%s207_s22 + $0x8] sm:$0xff]  ;;  %v506_v4 = vld [vmem:[%s207_s22 + $0x10] sm:$0xff] }
  0x10   : > { %v507_v5 = vld [vmem:[%s207_s22 + $0x18] sm:$0xff] }
  0x11   : > { %498 = vmatmul.msk.bf16.vlgmr.msra.gmra.mxu0 %vm259_vm1, %v504_v2  ;;  %499 = vmatmul.msk.bf16.vlgmr.msra.gmra.mxu1 %vm259_vm1, %v505_v3 }
  0x12   : > { %500 = vmatmul.msk.bf16.vlgmr.msra.gmra.mxu2 %vm259_vm1, %v506_v4  ;;  %501 = vmatmul.msk.bf16.vlgmr.msra.gmra.mxu3 %vm259_vm1, %v507_v5 }
  0x8e   : > { %v285_v7 = vpop.f32.mrf.mxu0  ;;  %v290_v8 = vpop.f32.mrf.mxu1 }
  0x8f   : > { %v667_v9 = vadd.f32 %v558_v6, %v285_v7  ;;  %v669_v10 = vadd.f32 %v558_v6, %v290_v8 }
  0x91   : > { %v305_v11 = vsub.f32 0.0, %v667_v9  ;;  %v307_v12 = vsub.f32 0.0, %v669_v10 }
  0x93   : > { %v313_v13 = vmul.f32 1.442695, %v305_v11  ;;  %v317_v20 = vmul.f32 1.442695, %v307_v12 }
  0x95   : > { %v295_v14 = vpop.f32.mrf.mxu2  ;;  %v300_v15 = vpop.f32.mrf.mxu3  ;;  %559 = vpow2.f32 %v313_v13 }
  0x96   : > { %v673_v16 = vadd.f32 %v558_v6, %v295_v14  ;;  %v675_v17 = vadd.f32 %v558_v6, %v300_v15  ;;  %v287_v18 = vpop.f32.mrf.mxu0  ;;  %v292_v19 = vpop.f32.mrf.mxu1  ;;  %561 = vpow2.f32 %v317_v20 }
  0x97   : > { %v288_v21 = vadd.f32 %v558_v6, %v287_v18  ;;  %v293_v22 = vadd.f32 %v558_v6, %v292_v19 }
  0x98   : > { %v309_v23 = vsub.f32 0.0, %v673_v16  ;;  %v311_v24 = vsub.f32 0.0, %v675_v17 }
  0x99   : > { %v306_v25 = vsub.f32 0.0, %v288_v21  ;;  %v308_v26 = vsub.f32 0.0, %v293_v22 }
  0x9a   : > { %v321_v27 = vmul.f32 1.442695, %v309_v23  ;;  %v325_v28 = vmul.f32 1.442695, %v311_v24 }
  0x9b   : > { %v315_v29 = vmul.f32 1.442695, %v306_v25  ;;  %v319_v30 = vmul.f32 1.442695, %v308_v26  ;;  %v560_v35 = vpop.eup %559 }
  0x9c   : > { %563 = vpow2.f32 %v321_v27  ;;  %v562_v38 = vpop.eup %561  ;;  %v329_v39 = vadd.f32 1.0, %v560_v35 }
  0x9d   : > { %v297_v31 = vpop.f32.mrf.mxu2  ;;  %v302_v32 = vpop.f32.mrf.mxu3  ;;  %565 = vpow2.f32 %v325_v28  ;;  %v331_v43 = vadd.f32 1.0, %v562_v38 }
  0x9e   : > { %v298_v33 = vadd.f32 %v558_v6, %v297_v31  ;;  %v303_v34 = vadd.f32 %v558_v6, %v302_v32  ;;  %567 = vpow2.f32 %v315_v29 }
  0x9f   : > { %569 = vpow2.f32 %v319_v30 }
  0xa0   : > { %v310_v36 = vsub.f32 0.0, %v298_v33  ;;  %v312_v37 = vsub.f32 0.0, %v303_v34 }
  0xa2   : > { %v323_v40 = vmul.f32 1.442695, %v310_v36  ;;  %v327_v41 = vmul.f32 1.442695, %v312_v37  ;;  %v564_v42 = vpop.eup %563 }
  0xa3   : > { %v566_v44 = vpop.eup %565  ;;  %v333_v47 = vadd.f32 1.0, %v564_v42 }
  0xa4   : > { %571 = vpow2.f32 %v323_v40  ;;  %v568_v45 = vpop.eup %567  ;;  %v335_v51 = vadd.f32 1.0, %v566_v44 }
  0xa5   : > { %573 = vrcp.f32 %v329_v39  ;;  %v570_v46 = vpop.eup %569  ;;  %v330_v48 = vadd.f32 1.0, %v568_v45 }
  0xa6   : > { %575 = vpow2.f32 %v327_v41  ;;  %v332_v49 = vadd.f32 1.0, %v570_v46 }
  0xa7   : > { %577 = vrcp.f32 %v331_v43 }
  0xa8   : > { %579 = vrcp.f32 %v330_v48 }
  0xa9   : > { %581 = vrcp.f32 %v332_v49 }
  0xaa   : > { %v572_v50 = vpop.eup %571  ;;  %583 = vrcp.f32 %v333_v47 }
  0xab   : > { %v334_v52 = vadd.f32 1.0, %v572_v50  ;;  %v574_v53 = vpop.eup %573 }
  0xac   : > { %v576_v54 = vpop.eup %575  ;;  %v345_v59 = vmul.f32 %v574_v53, %v667_v9 }
  0xad   : > { %585 = vrcp.f32 %v334_v52  ;;  %v578_v55 = vpop.eup %577  ;;  %v336_v56 = vadd.f32 1.0, %v576_v54 }
  0xae   : > { %587 = vrcp.f32 %v335_v51  ;;  %v580_v57 = vpop.eup %579  ;;  %v347_v62 = vmul.f32 %v578_v55, %v669_v10 }
  0xaf   : > { %v582_v58 = vpop.eup %581  ;;  %v346_v60 = vmul.f32 %v580_v57, %v288_v21  ;;  %589 = vrcp.f32 %v336_v56 }
  0xb0   : > { %v584_v61 = vpop.eup %583  ;;  %v348_v63 = vmul.f32 %v582_v58, %v293_v22 }
  0xb1   : > { %v511_v0 = vpack.c.bf16 %v346_v60, %v345_v59  ;;  %v349_v4 = vmul.f32 %v584_v61, %v673_v16 }
  0xb2   : > { %v516_v2 = vpack.c.bf16 %v348_v63, %v347_v62 }
  0xb3   : > { %v586_v1 = vpop.eup %585  ;;  %512 = vst [vmem:[%s223_s27] sm:$0xff] %v511_v0  }
  0xb4   : > { %v588_v3 = vpop.eup %587  ;;  %v350_v5 = vmul.f32 %v586_v1, %v298_v33  ;;  %528 = vst [vmem:[%s223_s27 + $0x8] sm:$0xff] %v516_v2  }
  0xb5   : > { %v590_v6 = vpop.eup %589  ;;  %v351_v8 = vmul.f32 %v588_v3, %v675_v17 }
  0xb6   : > { %v521_v7 = vpack.c.bf16 %v350_v5, %v349_v4  ;;  %v352_v9 = vmul.f32 %v590_v6, %v303_v34 }
  0xb8   : > { %529 = vst [vmem:[%s223_s27 + $0x10] sm:$0xff] %v521_v7   ;;  %v526_v10 = vpack.c.bf16 %v352_v9, %v351_v8 }
  0xba   : > { %530 = vst [vmem:[%s223_s27 + $0x18] sm:$0xff] %v526_v10  }
  0xbb PF: > { %s13_s14 = sadd.s32 1, %s613_s14   ;;  %s701_s12 = smov %s609_s13 }
  0xbc   : > { %p10_p5 = scmp.ge.s32.totalorder %s13_s14, 4   ;;  %s702_s13 = smov %s704_s15 }
  0xbe   :  { %12 = sbr.rel (!%p10_p5) target bundleno = 2 (0x2), region = 68 }

// kernel: multipool_forward.12
= control target key start
LH: loop header
LB: loop body
LE: loop exit
PB: predicated region body
PF: predicated region fallthrough
CT: control target
= control target key end

     0   :  { %s1848_s12 = smov 0   ;;  %s1850_s13 = smov 0   ;;  %s2180_s0 = inlined_call_operand.vmem [shape: bf16[2,4,9,9,4], index: 0, kind: input, shape index: {}]   ;;  %s2181_s1 = inlined_call_operand.vmem [shape: bf16[9,4,128], index: 1, kind: input, shape index: {}]   ;;  %s2182_s2 = inlined_call_operand.vmem [shape: f32[1,128], index: 2, kind: input, shape index: {}]   ;;  %s2183_s3 = inlined_call_operand.vmem [shape: bf16[2,64,128], index: 3, kind: output, shape index: {}]  }
   0x1   :  { %s1852_s14 = smov 0  }
   0x2 LB: > { %s25_s15 = sadd.s32 1, %s1822_s13  ;;  %p1477_p0 = scmp.ge.s32.totalorder %s1826_s14, 1  ;;  %s1826_s14 = sphi %s1852_s14, %s13_s14   ;;  %s1822_s13 = sphi %s1850_s13, %s2187_s13   ;;  %s1818_s12 = sphi %s1848_s12, %s2186_s12  }
   0x3   : > { %p27_p1 = scmp.ge.s32.totalorder %s25_s15, 2  ;;  %p168_p2 = scmp.lt.s32.totalorder %s1826_s14, 3 }
   0x5   : > { %s2189_s15 = smov (%p27_p1, %s25_s15), 0  ;;  %p169_p3 = pnand %p1477_p0, %p168_p2 }
   0x6   : > { %p202_p4 = scmp.lt.s32.totalorder (!%p169_p3), %s1818_s12, 1 }
   0x7   : > { %172 = sbr.rel (%p169_p3) target bundleno = 322 (0x142), region = 32 }
   0xc   : > { %v1489_v0 = vld [vmem:[%s2181_s1 + $0x2] sm:$0x3]  ;;  %vm276_vm0 = vcmask 1041408   ;;  %v1530_v2 = vld [vmem:[%s2181_s1 + $0x4] sm:$0x3]  ;;  %s2191_s12 = smov (!%p202_p4, %s1818_s12), 1 }
   0xd   : > { %v278_v1 = vsel %vm276_vm0, %v1489_v0, 0  ;;  %v1543_v3 = vld [vmem:[%s2181_s1 + $0x6] sm:$0x3]  ;;  %v531_v4 = vsel %vm276_vm0, %v1530_v2, 0  ;;  %v231_v6 = vld [vmem:[%s2181_s1] sm:$0x3] }
   0xe   : > { %1743 = vmatpush.bf16.msra.mxu1 %v278_v1  ;;  %1744 = vmatpush.bf16.msra.mxu2 %v278_v1  ;;  %v614_v5 = vsel %vm276_vm0, %v1543_v3, 0  ;;  %v342_v7 = vsel %vm276_vm0, %v231_v6, 0  ;;  %v1572_v8 = vld [vmem:[%s2181_s1 + $0x8] sm:$0x3]  ;;  %s1746_s26 = smul.u32 288, %s2191_s12  ;;  %vm263_vm1 = vcmask 31744  }
   0xf   : > { %1745 = vmatpush.bf16.msra.mxu3 %v278_v1  ;;  %287 = vmatpush.bf16.msra.mxu0 %v278_v1  ;;  %v697_v9 = vsel %vm276_vm0, %v1572_v8, 0  ;;  %v1622_v10 = vld [vmem:[%s2181_s1 + $0xc] sm:$0x3]  ;;  %v1651_v11 = vld [vmem:[%s2181_s1 + $0xe] sm:$0x3]  ;;  %s1695_s17 = sshll.u32 %s2191_s12, 5 }
  0x10   : > { %s1895_s4 = scalar_lea.vmem %s2180_s0, %s1746_s26  ;;  %v1609_v12 = vld [vmem:[%s2181_s1 + $0xa] sm:$0x3]  ;;  %v974_v24 = vsel %vm276_vm0, %v1622_v10, 0  ;;  %v1057_v28 = vsel %vm276_vm0, %v1651_v11, 0  ;;  %v1688_v38 = vld [vmem:[%s2181_s1 + $0x10] sm:$0x3]  ;;  %s2150_s20 = scalar_lea.vmem %s2183_s3, %s1695_s17 }
  0x11   : > { %v1496_v13 = vld [vmem:[%s1895_s4 + $0x58] sm:$0xf]  ;;  %v1701_v14 = vld [vmem:[%s1895_s4 + $0x5c] sm:$0xf0]  ;;  %v1500_v15 = vld [vmem:[%s1895_s4 + $0x68] sm:$0xf] }
  0x12   : > { %540 = vmatpush.bf16.msrb.mxu2 %v531_v4  ;;  %351 = vmatpush.bf16.msrb.mxu1 %v342_v7  ;;  %v1497_v16 = vor.u32 %v1701_v14, %v1496_v13  ;;  %v1702_v17 = vld [vmem:[%s1895_s4 + $0x6c] sm:$0xf0]  ;;  %v1504_v18 = vld [vmem:[%s1895_s4 + $0x78] sm:$0xf]  ;;  %v1703_v19 = vld [vmem:[%s1895_s4 + $0x7c] sm:$0xf0] }
  0x13   : > { %623 = vmatpush.bf16.msrb.mxu3 %v614_v5  ;;  %706 = vmatpush.bf16.msrb.mxu0 %v697_v9  ;;  %v1501_v20 = vor.u32 %v1702_v17, %v1500_v15  ;;  %v1505_v21 = vor.u32 %v1703_v19, %v1504_v18  ;;  %v1492_v22 = vld [vmem:[%s1895_s4 + $0x48] sm:$0xf]  ;;  %v1700_v23 = vld [vmem:[%s1895_s4 + $0x4c] sm:$0xf0]  ;;  %v373_v26 = vld [vmem:[%s1895_s4] sm:$0xf] }
  0x14   : > { %1507 = vmatmul.msk.bf16.vlgmr.msra.gmra.mxu1 %vm263_vm1, %v1497_v16  ;;  %v1493_v25 = vor.u32 %v1700_v23, %v1492_v22  ;;  %v374_v27 = vld [vmem:[%s1895_s4 + $0x4] sm:$0x1]  ;;  %v891_v29 = vsel %vm276_vm0, %v1609_v12, 0  ;;  %v375_v30 = vld [vmem:[%s1895_s4 + $0x8] sm:$0xf]  ;;  %v393_v32 = vshrl.u32 %v373_v26, 16 }
  0x15   : > { %1508 = vmatmul.msk.bf16.vlgmr.msra.gmra.mxu2 %vm263_vm1, %v1501_v20  ;;  %1509 = vmatmul.msk.bf16.vlgmr.msra.gmra.mxu3 %vm263_vm1, %v1505_v21  ;;  %v376_v31 = vld [vmem:[%s1895_s4 + $0xc] sm:$0x1]  ;;  %v396_v33 = vshll.u32 %v373_v26, 16  ;;  %v402_v34 = vshll.u32 %v374_v27, 16  ;;  %v407_v35 = vshrl.u32 %v375_v30, 16  ;;  %v410_v36 = vshll.u32 %v375_v30, 16 }
  0x16   : > { %1506 = vmatmul.msk.bf16.vlgmr.msra.gmra.mxu0 %vm263_vm1, %v1493_v25  ;;  %v416_v37 = vshll.u32 %v376_v31, 16  ;;  %983 = vmatpush.bf16.msra.mxu2 %v974_v24  ;;  %vm389_vm2 = vsmask.f32 3328  ;;  %vm390_vm3 = vsmask.f32 7440  ;;  %v395_v39 = vrot.slane %v393_v32, 4 }
  0x17   : > { %v398_v40 = vrot.slane %v396_v33, 5  ;;  %1066 = vmatpush.bf16.msra.mxu3 %v1057_v28  ;;  %900 = vmatpush.bf16.msra.mxu1 %v891_v29  ;;  %v409_v41 = vrot.slane %v407_v35, 4  ;;  %v412_v42 = vrot.slane %v410_v36, 5  ;;  %v404_v44 = vrot.slane %v402_v34, 5  ;;  %vm1926_vm4 = vmor %vm389_vm2, %vm390_vm3  ;;  %v377_v49 = vld [vmem:[%s1895_s4 + $0x10] sm:$0xf] }
  0x18   : > { %v1251_v45 = vsel %vm276_vm0, %v1688_v38, 0  ;;  %v418_v48 = vrot.slane %v416_v37, 5  ;;  %v379_v50 = vld [vmem:[%s1895_s4 + $0x18] sm:$0xf]  ;;  %v1512_v51 = vld [vmem:[%s1895_s4] sm:$0xf] }
  0x19   : > { %v399_v43 = vor.u32 %v398_v40, %v395_v39  ;;  %v413_v47 = vor.u32 %v412_v42, %v409_v41  ;;  %1260 = vmatpush.bf16.msra.mxu0 %v1251_v45  ;;  %v421_v53 = vshrl.u32 %v377_v49, 16  ;;  %v424_v54 = vshll.u32 %v377_v49, 16  ;;  %v1696_v55 = vld [vmem:[%s1895_s4 + $0x4] sm:$0xf0]  ;;  %v1546_v60 = vld [vmem:[%s1895_s4 + $0x90] sm:$0xf] }
  0x1a   : > { %v435_v57 = vshrl.u32 %v379_v50, 16  ;;  %v438_v58 = vshll.u32 %v379_v50, 16  ;;  %v1704_v61 = vld [vmem:[%s1895_s4 + $0x94] sm:$0xf0]  ;;  %v1708_v3 = vld [vmem:[%s1895_s4 + $0xdc] sm:$0xf0]  ;;  %v1513_v9 = vor.u32 %v1696_v55, %v1512_v51 }
  0x1b   : > { %v400_v52 = vrot.slane %v399_v43, 4  ;;  %v414_v56 = vrot.slane %v413_v47, 4  ;;  %v423_v62 = vrot.slane %v421_v53, 4  ;;  %v426_v63 = vrot.slane %v424_v54, 5  ;;  %v1575_v2 = vld [vmem:[%s1895_s4 + $0xd8] sm:$0xf] }
  0x1c   : > { %v437_v4 = vrot.slane %v435_v57, 4  ;;  %v440_v5 = vrot.slane %v438_v58, 5  ;;  %v378_v7 = vld [vmem:[%s1895_s4 + $0x14] sm:$0x1]  ;;  %v380_v8 = vld [vmem:[%s1895_s4 + $0x1c] sm:$0x1]  ;;  %v1547_v11 = vor.u32 %v1704_v61, %v1546_v60  ;;  %v1576_v12 = vor.u32 %v1708_v3, %v1575_v2 }
  0x1d   : > { %v405_v59 = vsel %vm1926_vm4, %v400_v52, %v404_v44  ;;  %v419_v0 = vsel %vm1926_vm4, %v414_v56, %v418_v48  ;;  %v427_v13 = vor.u32 %v426_v63, %v423_v62  ;;  %v430_v14 = vshll.u32 %v378_v7, 16  ;;  %v381_v21 = vld [vmem:[%s1895_s4 + $0x20] sm:$0xf]  ;;  %v383_v22 = vld [vmem:[%s1895_s4 + $0x28] sm:$0xf] }
  0x1e   : > { %v506_v1 = vunpack.c.l.b16 %v405_v59  ;;  %v507_v6 = vunpack.c.l.b16 %v419_v0  ;;  %v441_v15 = vor.u32 %v440_v5, %v437_v4  ;;  %v444_v16 = vshll.u32 %v380_v8, 16  ;;  %v1516_v29 = vld [vmem:[%s1895_s4 + $0x10] sm:$0xf]  ;;  %v1697_v30 = vld [vmem:[%s1895_s4 + $0x14] sm:$0xf0] }
  0x1f   : > { %v428_v17 = vrot.slane %v427_v13, 4  ;;  %v432_v18 = vrot.slane %v430_v14, 5  ;;  %v449_v23 = vshrl.u32 %v381_v21, 16  ;;  %v452_v24 = vshll.u32 %v381_v21, 16  ;;  %v1550_v33 = vld [vmem:[%s1895_s4 + $0xa0] sm:$0xf] }
  0x20   : > { %v514_v10 = vpack.c.b16 %v507_v6, %v506_v1  ;;  %v442_v19 = vrot.slane %v441_v15, 4  ;;  %v446_v20 = vrot.slane %v444_v16, 5  ;;  %v463_v27 = vshrl.u32 %v383_v22, 16  ;;  %v1705_v34 = vld [vmem:[%s1895_s4 + $0xa4] sm:$0xf0] }
  0x21   : > { %v433_v25 = vsel %vm1926_vm4, %v428_v17, %v432_v18  ;;  %v466_v28 = vshll.u32 %v383_v22, 16  ;;  %v1579_v35 = vld [vmem:[%s1895_s4 + $0xe8] sm:$0xf]  ;;  %v1709_v36 = vld [vmem:[%s1895_s4 + $0xec] sm:$0xf0]  ;;  %v451_v37 = vrot.slane %v449_v23, 4  ;;  %v1517_v43 = vor.u32 %v1697_v30, %v1516_v29 }
  0x22   : > { %v447_v26 = vsel %vm1926_vm4, %v442_v19, %v446_v20  ;;  %v508_v31 = vunpack.c.l.b16 %v433_v25  ;;  %v454_v38 = vrot.slane %v452_v24, 5  ;;  %v465_v39 = vrot.slane %v463_v27, 4  ;;  %v382_v41 = vld [vmem:[%s1895_s4 + $0x24] sm:$0x1]  ;;  %v384_v42 = vld [vmem:[%s1895_s4 + $0x2c] sm:$0x1] }
  0x23   : > { %v509_v32 = vunpack.c.l.b16 %v447_v26  ;;  %v468_v40 = vrot.slane %v466_v28, 5  ;;  %v1551_v45 = vor.u32 %v1705_v34, %v1550_v33  ;;  %v1580_v47 = vor.u32 %v1709_v36, %v1579_v35  ;;  %v385_v52 = vld [vmem:[%s1895_s4 + $0x30] sm:$0xf]  ;;  %v387_v53 = vld [vmem:[%s1895_s4 + $0x38] sm:$0xf] }
  0x24   : > { %1526 = vmatmul.msk.bf16.vlgmr.msrb.gmra.mxu1 %vm263_vm1, %v1513_v9  ;;  %v455_v48 = vor.u32 %v454_v38, %v451_v37  ;;  %v458_v49 = vshll.u32 %v382_v41, 16  ;;  %v472_v51 = vshll.u32 %v384_v42, 16  ;;  %v477_v58 = vshrl.u32 %v385_v52, 16  ;;  %v386_v4 = vld [vmem:[%s1895_s4 + $0x34] sm:$0x1] }
  0x25   : > { %1531 = vmatmul.msk.bf16.vlgmr.msrb.gmra.mxu2 %vm263_vm1, %v514_v10  ;;  %1560 = vmatmul.msk.bf16.vlgmr.msrb.gmra.mxu3 %vm263_vm1, %v1547_v11  ;;  %v515_v44 = vpack.c.b16 %v509_v32, %v508_v31  ;;  %v469_v50 = vor.u32 %v468_v40, %v465_v39  ;;  %v480_v59 = vshll.u32 %v385_v52, 16  ;;  %v491_v60 = vshrl.u32 %v387_v53, 16  ;;  %v388_v5 = vld [vmem:[%s1895_s4 + $0x3c] sm:$0x1]  ;;  %v1520_v6 = vld [vmem:[%s1895_s4 + $0x20] sm:$0xf] }
  0x26   : > { %1589 = vmatmul.msk.bf16.vlgmr.msrb.gmra.mxu0 %vm263_vm1, %v1576_v12  ;;  %v456_v54 = vrot.slane %v455_v48, 4  ;;  %v460_v55 = vrot.slane %v458_v49, 5  ;;  %v474_v57 = vrot.slane %v472_v51, 5  ;;  %v494_v61 = vshll.u32 %v387_v53, 16  ;;  %v1698_v7 = vld [vmem:[%s1895_s4 + $0x24] sm:$0xf0] }
  0x27   : > { %v470_v56 = vrot.slane %v469_v50, 4  ;;  %v479_v0 = vrot.slane %v477_v58, 4  ;;  %v482_v1 = vrot.slane %v480_v59, 5  ;;  %v493_v2 = vrot.slane %v491_v60, 4  ;;  %v1554_v10 = vld [vmem:[%s1895_s4 + $0xb0] sm:$0xf] }
  0x28   : > { %v461_v62 = vsel %vm1926_vm4, %v456_v54, %v460_v55  ;;  %v496_v3 = vrot.slane %v494_v61, 5  ;;  %v1706_v11 = vld [vmem:[%s1895_s4 + $0xb4] sm:$0xf0]  ;;  %v1710_v13 = vld [vmem:[%s1895_s4 + $0xfc] sm:$0xf0]  ;;  %v486_v15 = vshll.u32 %v386_v4, 16  ;;  %v1521_v18 = vor.u32 %v1698_v7, %v1520_v6 }
  0x29   : > { %v475_v63 = vsel %vm1926_vm4, %v470_v56, %v474_v57  ;;  %v510_v8 = vunpack.c.l.b16 %v461_v62  ;;  %v1583_v12 = vld [vmem:[%s1895_s4 + $0xf8] sm:$0xf]  ;;  %v483_v14 = vor.u32 %v482_v1, %v479_v0  ;;  %v500_v17 = vshll.u32 %v388_v5, 16  ;;  %v1593_v26 = vld [vmem:[%s1895_s4 + $0x90] sm:$0xf] }
  0x2a   : > { %v511_v9 = vunpack.c.l.b16 %v475_v63  ;;  %v497_v16 = vor.u32 %v496_v3, %v493_v2  ;;  %v1555_v20 = vor.u32 %v1706_v11, %v1554_v10  ;;  %v1584_v21 = vor.u32 %v1710_v13, %v1583_v12  ;;  %v1595_v27 = vld [vmem:[%s1895_s4 + $0x98] sm:$0xf]  ;;  %v1672_v28 = vld [vmem:[%s1895_s4 + $0x8] sm:$0xf]  ;;  %v1674_v29 = vld [vmem:[%s1895_s4 + $0x10] sm:$0xf] }
  0x2b   : > { %v484_v22 = vrot.slane %v483_v14, 4  ;;  %v488_v23 = vrot.slane %v486_v15, 5  ;;  %v502_v25 = vrot.slane %v500_v17, 5  ;;  %v753_v32 = vshrl.u32 %v1593_v26, 16  ;;  %v1524_v40 = vld [vmem:[%s1895_s4 + $0x30] sm:$0xf] }
  0x2c   : > { %v516_v19 = vpack.c.b16 %v511_v9, %v510_v8  ;;  %v498_v24 = vrot.slane %v497_v16, 4  ;;  %v756_v33 = vshll.u32 %v1593_v26, 16  ;;  %v767_v34 = vshrl.u32 %v1595_v27, 16  ;;  %v1699_v41 = vld [vmem:[%s1895_s4 + $0x34] sm:$0xf0] }
  0x2d   : > { %v489_v30 = vsel %vm1926_vm4, %v484_v22, %v488_v23  ;;  %v770_v35 = vshll.u32 %v1595_v27, 16  ;;  %v1113_v36 = vshrl.u32 %v1672_v28, 16  ;;  %v1116_v37 = vshll.u32 %v1672_v28, 16  ;;  %v1596_v52 = vld [vmem:[%s1895_s4 + $0x9c] sm:$0x1] }
  0x2e   : > { %v503_v31 = vsel %vm1926_vm4, %v498_v24, %v502_v25  ;;  %v1127_v38 = vshrl.u32 %v1674_v29, 16  ;;  %v1130_v39 = vshll.u32 %v1674_v29, 16  ;;  %v512_v42 = vunpack.c.l.b16 %v489_v30  ;;  %v1673_v57 = vld [vmem:[%s1895_s4 + $0xc] sm:$0x1]  ;;  %v1675_v58 = vld [vmem:[%s1895_s4 + $0x14] sm:$0x1] }
  0x2f   : > { %v755_v48 = vrot.slane %v753_v32, 4  ;;  %v758_v49 = vrot.slane %v756_v33, 5  ;;  %v769_v50 = vrot.slane %v767_v34, 4  ;;  %v772_v51 = vrot.slane %v770_v35, 5  ;;  %v1587_v62 = vld [vmem:[%s1895_s4 + $0x108] sm:$0xf] }
  0x30   : > { %v1115_v53 = vrot.slane %v1113_v36, 4  ;;  %v1118_v54 = vrot.slane %v1116_v37, 5  ;;  %v1129_v55 = vrot.slane %v1127_v38, 4  ;;  %v1132_v56 = vrot.slane %v1130_v39, 5  ;;  %v1711_v63 = vld [vmem:[%s1895_s4 + $0x10c] sm:$0xf0] }
  0x31   : > { %v1525_v59 = vor.u32 %v1699_v41, %v1524_v40  ;;  %v759_v0 = vor.u32 %v758_v49, %v755_v48  ;;  %v773_v2 = vor.u32 %v772_v51, %v769_v50  ;;  %v776_v3 = vshll.u32 %v1596_v52, 16  ;;  %v1597_v9 = vld [vmem:[%s1895_s4 + $0xa0] sm:$0xf]  ;;  %v1599_v10 = vld [vmem:[%s1895_s4 + $0xa8] sm:$0xf] }
  0x32   : > { %v1119_v4 = vor.u32 %v1118_v54, %v1115_v53  ;;  %v1122_v5 = vshll.u32 %v1673_v57, 16  ;;  %v1133_v6 = vor.u32 %v1132_v56, %v1129_v55  ;;  %v1136_v7 = vshll.u32 %v1675_v58, 16  ;;  %v1676_v23 = vld [vmem:[%s1895_s4 + $0x18] sm:$0xf]  ;;  %v1678_v24 = vld [vmem:[%s1895_s4 + $0x20] sm:$0xf] }
  0x33   : > { %v1588_v8 = vor.u32 %v1711_v63, %v1587_v62  ;;  %v760_v11 = vrot.slane %v759_v0, 4  ;;  %v774_v13 = vrot.slane %v773_v2, 4  ;;  %v778_v14 = vrot.slane %v776_v3, 5  ;;  %v1598_v29 = vld [vmem:[%s1895_s4 + $0xa4] sm:$0x1] }
  0x34   : > { %1527 = vmatmul.msk.bf16.gmra.mxu1 %vm263_vm1, %v1517_v43  ;;  %v513_v43 = vunpack.c.l.b16 %v503_v31  ;;  %v1120_v15 = vrot.slane %v1119_v4, 4  ;;  %v1124_v16 = vrot.slane %v1122_v5, 5  ;;  %v1134_v17 = vrot.slane %v1133_v6, 4  ;;  %v1600_v34 = vld [vmem:[%s1895_s4 + $0xac] sm:$0x1] }
  0x35   : > { %1532 = vmatmul.msk.bf16.gmra.mxu2 %vm263_vm1, %v515_v44  ;;  %1561 = vmatmul.msk.bf16.gmra.mxu3 %vm263_vm1, %v1551_v45  ;;  %v1558_v44 = vld [vmem:[%s1895_s4 + $0xc0] sm:$0xf]  ;;  %v1707_v45 = vld [vmem:[%s1895_s4 + $0xc4] sm:$0xf0]  ;;  %v798_v22 = vshll.u32 %v1599_v10, 16  ;;  %v779_v26 = vsel %vm1926_vm4, %v774_v13, %v778_v14  ;;  %v1141_v35 = vshrl.u32 %v1676_v23, 16 }
  0x36   : > { %1590 = vmatmul.msk.bf16.gmra.mxu0 %vm263_vm1, %v1580_v47  ;;  %v1594_v47 = vld [vmem:[%s1895_s4 + $0x94] sm:$0x1]  ;;  %v517_v60 = vpack.c.b16 %v513_v43, %v512_v42  ;;  %v1559_v61 = vor.u32 %v1707_v45, %v1558_v44  ;;  %v1125_v27 = vsel %vm1926_vm4, %v1120_v15, %v1124_v16  ;;  %v1144_v36 = vshll.u32 %v1676_v23, 16  ;;  %v1625_v41 = vld [vmem:[%s1895_s4 + $0x8] sm:$0xf] }
  0x37   : > { %v762_v1 = vshll.u32 %v1594_v47, 16  ;;  %v800_v33 = vrot.slane %v798_v22, 5  ;;  %v1155_v37 = vshrl.u32 %v1678_v24, 16  ;;  %v1158_v38 = vshll.u32 %v1678_v24, 16  ;;  %v1712_v42 = vld [vmem:[%s1895_s4 + $0xc] sm:$0xf0] }
  0x38   : > { %v867_v40 = vunpack.c.l.b16 %v779_v26  ;;  %v1226_v43 = vunpack.c.l.b16 %v1125_v27  ;;  %v1654_v45 = vld [vmem:[%s1895_s4 + $0x50] sm:$0xf]  ;;  %v1716_v47 = vld [vmem:[%s1895_s4 + $0x54] sm:$0xf0]  ;;  %v790_v49 = vshll.u32 %v1598_v29, 16  ;;  %v804_v51 = vshll.u32 %v1600_v34, 16 }
  0x39   : > { %v764_v12 = vrot.slane %v762_v1, 5  ;;  %v1143_v52 = vrot.slane %v1141_v35, 4  ;;  %v1146_v53 = vrot.slane %v1144_v36, 5  ;;  %v1157_v54 = vrot.slane %v1155_v37, 4  ;;  %v1677_v57 = vld [vmem:[%s1895_s4 + $0x1c] sm:$0x1] }
  0x3a   : > { %v1160_v55 = vrot.slane %v1158_v38, 5  ;;  %v1679_v58 = vld [vmem:[%s1895_s4 + $0x24] sm:$0x1]  ;;  %v792_v63 = vrot.slane %v790_v49, 5  ;;  %v806_v1 = vrot.slane %v804_v51, 5  ;;  %v1150_v3 = vshll.u32 %v1677_v57, 16 }
  0x3b   : > { %v765_v25 = vsel %vm1926_vm4, %v760_v11, %v764_v12  ;;  %v1147_v2 = vor.u32 %v1146_v53, %v1143_v52  ;;  %v1164_v5 = vshll.u32 %v1679_v58, 16  ;;  %v1601_v6 = vld [vmem:[%s1895_s4 + $0xb0] sm:$0xf]  ;;  %v1713_v29 = vld [vmem:[%s1895_s4 + $0x1c] sm:$0xf0] }
  0x3c   : > { %v866_v39 = vunpack.c.l.b16 %v765_v25  ;;  %v1161_v4 = vor.u32 %v1160_v55, %v1157_v54  ;;  %v1152_v12 = vrot.slane %v1150_v3, 5  ;;  %v1682_v15 = vld [vmem:[%s1895_s4 + $0x30] sm:$0xf]  ;;  %v809_v16 = vshrl.u32 %v1601_v6, 16  ;;  %v1602_v35 = vld [vmem:[%s1895_s4 + $0xb4] sm:$0x1] }
  0x3d   : > { %v1148_v11 = vrot.slane %v1147_v2, 4  ;;  %v1166_v14 = vrot.slane %v1164_v5, 5  ;;  %v1183_v22 = vshrl.u32 %v1682_v15, 16  ;;  %v1186_v23 = vshll.u32 %v1682_v15, 16  ;;  %v1604_v36 = vld [vmem:[%s1895_s4 + $0xbc] sm:$0x1] }
  0x3e   : > { %v874_v56 = vpack.c.b16 %v867_v40, %v866_v39  ;;  %v1162_v13 = vrot.slane %v1161_v4, 4  ;;  %v1717_v39 = vld [vmem:[%s1895_s4 + $0x64] sm:$0xf0]  ;;  %v818_v49 = vshll.u32 %v1602_v35, 16  ;;  %v832_v51 = vshll.u32 %v1604_v36, 16 }
  0x3f   : > { %v1153_v26 = vsel %vm1926_vm4, %v1148_v11, %v1152_v12  ;;  %v1605_v3 = vld [vmem:[%s1895_s4 + $0xc0] sm:$0xf]  ;;  %v1607_v4 = vld [vmem:[%s1895_s4 + $0xc8] sm:$0xf] }
  0x40   : > { %v1167_v27 = vsel %vm1926_vm4, %v1162_v13, %v1166_v14  ;;  %v1228_v40 = vunpack.c.l.b16 %v1153_v26  ;;  %v851_v11 = vshrl.u32 %v1607_v4, 16  ;;  %v854_v12 = vshll.u32 %v1607_v4, 16  ;;  %v1666_v4 = vld [vmem:[%s1895_s4 + $0x80] sm:$0xf] }
  0x44   : > { %1528 = vmatmul.msk.bf16.gmra.mxu1 %vm263_vm1, %v1521_v18  ;;  %v1138_v18 = vrot.slane %v1136_v7, 5  ;;  %v1603_v7 = vld [vmem:[%s1895_s4 + $0xb8] sm:$0xf] }
  0x45   : > { %1533 = vmatmul.msk.bf16.gmra.mxu2 %vm263_vm1, %v516_v19  ;;  %1562 = vmatmul.msk.bf16.gmra.mxu3 %vm263_vm1, %v1555_v20  ;;  %v781_v19 = vshrl.u32 %v1597_v9, 16  ;;  %v784_v20 = vshll.u32 %v1597_v9, 16 }
  0x46   : > { %1591 = vmatmul.msk.bf16.gmra.mxu0 %vm263_vm1, %v1584_v21  ;;  %v795_v21 = vshrl.u32 %v1599_v10, 16  ;;  %v1139_v28 = vsel %vm1926_vm4, %v1134_v17, %v1138_v18  ;;  %v1680_v10 = vld [vmem:[%s1895_s4 + $0x28] sm:$0xf]  ;;  %v812_v17 = vshll.u32 %v1601_v6, 16  ;;  %v823_v18 = vshrl.u32 %v1603_v7, 16 }
  0x47   : > { %v783_v30 = vrot.slane %v781_v19, 4  ;;  %v786_v31 = vrot.slane %v784_v20, 5  ;;  %v1227_v44 = vunpack.c.l.b16 %v1139_v28  ;;  %v826_v19 = vshll.u32 %v1603_v7, 16  ;;  %v1629_v28 = vld [vmem:[%s1895_s4 + $0x18] sm:$0xf] }
  0x48   : > { %v797_v32 = vrot.slane %v795_v21, 4  ;;  %v1169_v20 = vshrl.u32 %v1680_v10, 16  ;;  %v1172_v21 = vshll.u32 %v1680_v10, 16  ;;  %v1630_v52 = vor.u32 %v1713_v29, %v1629_v28  ;;  %v1684_v7 = vld [vmem:[%s1895_s4 + $0x38] sm:$0xf] }
  0x49   : > { %v787_v48 = vor.u32 %v786_v31, %v783_v30  ;;  %v1658_v30 = vld [vmem:[%s1895_s4 + $0x60] sm:$0xf]  ;;  %v811_v31 = vrot.slane %v809_v16, 4  ;;  %v828_v34 = vrot.slane %v826_v19, 5  ;;  %v840_v10 = vshll.u32 %v1605_v3, 16 }
  0x4a   : > { %v801_v50 = vor.u32 %v800_v33, %v797_v32  ;;  %v814_v32 = vrot.slane %v812_v17, 5  ;;  %v825_v33 = vrot.slane %v823_v18, 4  ;;  %v1171_v37 = vrot.slane %v1169_v20, 4 }
  0x4b   : > { %v788_v62 = vrot.slane %v787_v48, 4  ;;  %v1174_v38 = vrot.slane %v1172_v21, 5  ;;  %v1659_v53 = vor.u32 %v1717_v39, %v1658_v30  ;;  %v1197_v15 = vshrl.u32 %v1684_v7, 16  ;;  %v1633_v21 = vld [vmem:[%s1895_s4 + $0x28] sm:$0xf] }
  0x4c   : > { %v802_v0 = vrot.slane %v801_v50, 4  ;;  %v815_v48 = vor.u32 %v814_v32, %v811_v31  ;;  %v829_v50 = vor.u32 %v828_v34, %v825_v33  ;;  %v1200_v16 = vshll.u32 %v1684_v7, 16  ;;  %v1606_v31 = vld [vmem:[%s1895_s4 + $0xc4] sm:$0x1]  ;;  %v1608_v32 = vld [vmem:[%s1895_s4 + $0xcc] sm:$0x1] }
  0x4d   : > { %v1175_v54 = vor.u32 %v1174_v38, %v1171_v37  ;;  %v842_v26 = vrot.slane %v840_v10, 5  ;;  %v856_v28 = vrot.slane %v854_v12, 5  ;;  %v1199_v33 = vrot.slane %v1197_v15, 4 }
  0x4e   : > { %v807_v9 = vsel %vm1926_vm4, %v802_v0, %v806_v1  ;;  %v1202_v34 = vrot.slane %v1200_v16, 5 }
  0x4f   : > { %v869_v25 = vunpack.c.l.b16 %v807_v9  ;;  %v837_v9 = vshrl.u32 %v1605_v3, 16  ;;  %v1715_v3 = vld [vmem:[%s1895_s4 + $0x3c] sm:$0xf0] }
  0x54   : > { %1529 = vmatmul.msk.bf16.gmra.mxu1 %vm263_vm1, %v1525_v59  ;;  %v1626_v59 = vor.u32 %v1712_v42, %v1625_v41  ;;  %v1229_v41 = vunpack.c.l.b16 %v1167_v27  ;;  %v1681_v42 = vld [vmem:[%s1895_s4 + $0x2c] sm:$0x1]  ;;  %v853_v27 = vrot.slane %v851_v11, 4 }
  0x55   : > { %1534 = vmatmul.msk.bf16.gmra.mxu2 %vm263_vm1, %v517_v60  ;;  %1563 = vmatmul.msk.bf16.gmra.mxu3 %vm263_vm1, %v1559_v61  ;;  %v1655_v60 = vor.u32 %v1716_v47, %v1654_v45  ;;  %v1234_v61 = vpack.c.b16 %v1227_v44, %v1226_v43  ;;  %v1185_v43 = vrot.slane %v1183_v22, 4  ;;  %v1188_v44 = vrot.slane %v1186_v23, 5  ;;  %v1683_v47 = vld [vmem:[%s1895_s4 + $0x34] sm:$0x1]  ;;  %v1714_v22 = vld [vmem:[%s1895_s4 + $0x2c] sm:$0xf0] }
  0x56   : > { %1592 = vmatmul.msk.bf16.gmra.mxu0 %vm263_vm1, %v1588_v8  ;;  %v793_v8 = vsel %vm1926_vm4, %v788_v62, %v792_v63  ;;  %v1178_v55 = vshll.u32 %v1681_v42, 16  ;;  %v1192_v58 = vshll.u32 %v1683_v47, 16  ;;  %v834_v62 = vrot.slane %v832_v51, 5  ;;  %v1662_v23 = vld [vmem:[%s1895_s4 + $0x70] sm:$0xf] }
  0x57   : > { %v868_v24 = vunpack.c.l.b16 %v793_v8  ;;  %v1189_v57 = vor.u32 %v1188_v44, %v1185_v43  ;;  %v1176_v63 = vrot.slane %v1175_v54, 4  ;;  %v1686_v8 = vld [vmem:[%s1895_s4 + $0x40] sm:$0xf]  ;;  %v1634_v38 = vor.u32 %v1714_v22, %v1633_v21 }
  0x58   : > { %v1180_v0 = vrot.slane %v1178_v55, 5  ;;  %v1194_v2 = vrot.slane %v1192_v58, 5  ;;  %v1211_v17 = vshrl.u32 %v1686_v8, 16  ;;  %v1214_v18 = vshll.u32 %v1686_v8, 16 }
  0x59   : > { %v875_v45 = vpack.c.b16 %v869_v25, %v868_v24  ;;  %v1190_v1 = vrot.slane %v1189_v57, 4  ;;  %v1718_v24 = vld [vmem:[%s1895_s4 + $0x74] sm:$0xf0]  ;;  %v839_v25 = vrot.slane %v837_v9, 4  ;;  %v846_v43 = vshll.u32 %v1606_v31, 16 }
  0x5a   : > { %v1181_v13 = vsel %vm1926_vm4, %v1176_v63, %v1180_v0  ;;  %v1213_v35 = vrot.slane %v1211_v17, 4  ;;  %v1216_v36 = vrot.slane %v1214_v18, 5  ;;  %v1663_v39 = vor.u32 %v1718_v24, %v1662_v23 }
  0x5b   : > { %v1195_v14 = vsel %vm1926_vm4, %v1190_v1, %v1194_v2  ;;  %v1230_v29 = vunpack.c.l.b16 %v1181_v13  ;;  %v843_v42 = vor.u32 %v842_v26, %v839_v25  ;;  %v857_v44 = vor.u32 %v856_v28, %v853_v27  ;;  %v1637_v2 = vld [vmem:[%s1895_s4 + $0x38] sm:$0xf] }
  0x5c   : > { %v1231_v30 = vunpack.c.l.b16 %v1195_v14  ;;  %v1638_v10 = vor.u32 %v1715_v3, %v1637_v2 }
  0x5d   : > { %v858_v54 = vrot.slane %v857_v44, 4 }
  0x5e   : > { %v1236_v47 = vpack.c.b16 %v1231_v30, %v1230_v29 }
  0x64   : > { %1610 = vmatmul.msk.bf16.vlgmr.msra.gmra.mxu1 %vm263_vm1, %v874_v56  ;;  %v1235_v56 = vpack.c.b16 %v1229_v41, %v1228_v40  ;;  %v1685_v40 = vld [vmem:[%s1895_s4 + $0x3c] sm:$0x1]  ;;  %v1687_v41 = vld [vmem:[%s1895_s4 + $0x44] sm:$0x1] }
  0x65   : > { %1639 = vmatmul.msk.bf16.vlgmr.msra.gmra.mxu2 %vm263_vm1, %v1626_v59  ;;  %1668 = vmatmul.msk.bf16.vlgmr.msra.gmra.mxu3 %vm263_vm1, %v1655_v60  ;;  %v816_v59 = vrot.slane %v815_v48, 4  ;;  %v820_v60 = vrot.slane %v818_v49, 5  ;;  %v1203_v48 = vor.u32 %v1202_v34, %v1199_v33  ;;  %v1206_v49 = vshll.u32 %v1685_v40, 16 }
  0x66   : > { %1689 = vmatmul.msk.bf16.vlgmr.msra.gmra.mxu0 %vm263_vm1, %v1234_v61  ;;  %v830_v61 = vrot.slane %v829_v50, 4  ;;  %v1217_v50 = vor.u32 %v1216_v36, %v1213_v35  ;;  %v1220_v51 = vshll.u32 %v1687_v41, 16 }
  0x67   : > { %v821_v5 = vsel %vm1926_vm4, %v816_v59, %v820_v60  ;;  %v1208_v57 = vrot.slane %v1206_v49, 5 }
  0x68   : > { %v835_v6 = vsel %vm1926_vm4, %v830_v61, %v834_v62  ;;  %v870_v19 = vunpack.c.l.b16 %v821_v5  ;;  %v1218_v58 = vrot.slane %v1217_v50, 4  ;;  %v1222_v59 = vrot.slane %v1220_v51, 5  ;;  %v1719_v5 = vld [vmem:[%s1895_s4 + $0x84] sm:$0xf0] }
  0x69   : > { %v871_v20 = vunpack.c.l.b16 %v835_v6  ;;  %v1667_v11 = vor.u32 %v1719_v5, %v1666_v4 }
  0x6a   : > { %v1223_v63 = vsel %vm1926_vm4, %v1218_v58, %v1222_v59 }
  0x6b   : > { %v876_v37 = vpack.c.b16 %v871_v20, %v870_v19  ;;  %v1233_v7 = vunpack.c.l.b16 %v1223_v63 }
  0x74   : > { %1611 = vmatmul.msk.bf16.gmra.mxu1 %vm263_vm1, %v875_v45  ;;  %v860_v45 = vshll.u32 %v1608_v32, 16 }
  0x75   : > { %1640 = vmatmul.msk.bf16.gmra.mxu2 %vm263_vm1, %v1630_v52  ;;  %1669 = vmatmul.msk.bf16.gmra.mxu3 %vm263_vm1, %v1659_v53  ;;  %v844_v52 = vrot.slane %v843_v42, 4  ;;  %v848_v53 = vrot.slane %v846_v43, 5 }
  0x76   : > { %1690 = vmatmul.msk.bf16.gmra.mxu0 %vm263_vm1, %v1235_v56  ;;  %v862_v55 = vrot.slane %v860_v45, 5  ;;  %v1204_v56 = vrot.slane %v1203_v48, 4 }
  0x77   : > { %v849_v60 = vsel %vm1926_vm4, %v844_v52, %v848_v53 }
  0x78   : > { %v863_v61 = vsel %vm1926_vm4, %v858_v54, %v862_v55  ;;  %v1209_v62 = vsel %vm1926_vm4, %v1204_v56, %v1208_v57  ;;  %v872_v0 = vunpack.c.l.b16 %v849_v60 }
  0x79   : > { %v873_v1 = vunpack.c.l.b16 %v863_v61  ;;  %v1232_v6 = vunpack.c.l.b16 %v1209_v62 }
  0x7b   : > { %v877_v8 = vpack.c.b16 %v873_v1, %v872_v0  ;;  %v1237_v12 = vpack.c.b16 %v1233_v7, %v1232_v6 }
  0x84   : > { %1612 = vmatmul.msk.bf16.gmra.mxu1 %vm263_vm1, %v876_v37 }
  0x85   : > { %1641 = vmatmul.msk.bf16.gmra.mxu2 %vm263_vm1, %v1634_v38  ;;  %1670 = vmatmul.msk.bf16.gmra.mxu3 %vm263_vm1, %v1663_v39 }
  0x86   : > { %1691 = vmatmul.msk.bf16.gmra.mxu0 %vm263_vm1, %v1236_v47 }
  0x91   : > { %v294_v9 = vpop.f32.mrf.mxu1 }
  0x93   : > { %v289_v13 = vpop.f32.mrf.mxu0 }
  0x94   : > { %1613 = vmatmul.msk.bf16.gmra.mxu1 %vm263_vm1, %v877_v8 }
  0x95   : > { %1642 = vmatmul.msk.bf16.gmra.mxu2 %vm263_vm1, %v1638_v10  ;;  %1671 = vmatmul.msk.bf16.gmra.mxu3 %vm263_vm1, %v1667_v11 }
  0x96   : > { %1692 = vmatmul.msk.bf16.gmra.mxu0 %vm263_vm1, %v1237_v12 }
  0x98   : > { %v299_v46 = vpop.f32.mrf.mxu2  ;;  %v304_v14 = vpop.f32.mrf.mxu3 }
  0x99   : > { %v2094_v15 = vpop.f32.mrf.mxu1 }
  0x9b   : > { %v291_v16 = vpop.f32.mrf.mxu0 }
  0xa0   : > { %v2096_v17 = vpop.f32.mrf.mxu2  ;;  %v2098_v18 = vpop.f32.mrf.mxu3 }
  0xa1   : > { %v353_v19 = vpop.f32.mrf.mxu1 }
  0xa2   : > { %v354_v20 = vadd.f32 %v353_v19, %v289_v13 }
  0xa3   : > { %v708_v21 = vpop.f32.mrf.mxu0 }
  0xa8   : > { %v542_v22 = vpop.f32.mrf.mxu2  ;;  %v625_v23 = vpop.f32.mrf.mxu3 }
  0xa9   : > { %v562_v24 = vadd.f32 %v542_v22, %v354_v20  ;;  %v355_v25 = vpop.f32.mrf.mxu1 }
  0xaa   : > { %v356_v5 = vadd.f32 %v355_v25, %v291_v16 }
  0xab   : > { %v645_v26 = vadd.f32 %v625_v23, %v562_v24  ;;  %v710_v27 = vpop.f32.mrf.mxu0 }
  0xad   : > { %v728_v28 = vadd.f32 %v708_v21, %v645_v26 }
  0xb0   : > { %v544_v29 = vpop.f32.mrf.mxu2  ;;  %v627_v30 = vpop.f32.mrf.mxu3 }
  0xb1   : > { %v358_v31 = vpop.f32.mrf.mxu1  ;;  %v563_v7 = vadd.f32 %v544_v29, %v356_v5 }
  0xb2   : > { %v359_v32 = vadd.f32 %v358_v31, %v294_v9 }
  0xb3   : > { %v713_v33 = vpop.f32.mrf.mxu0  ;;  %v646_v11 = vadd.f32 %v627_v30, %v563_v7 }
  0xb5   : > { %v729_v21 = vadd.f32 %v710_v27, %v646_v11 }
  0xb8   : > { %v547_v34 = vpop.f32.mrf.mxu2  ;;  %v630_v35 = vpop.f32.mrf.mxu3 }
  0xb9   : > { %v564_v36 = vadd.f32 %v547_v34, %v359_v32  ;;  %v360_v37 = vpop.f32.mrf.mxu1 }
  0xba   : > { %v361_v29 = vadd.f32 %v360_v37, %v2094_v15 }
  0xbb   : > { %v647_v38 = vadd.f32 %v630_v35, %v564_v36  ;;  %v2100_v39 = vpop.f32.mrf.mxu0 }
  0xbd   : > { %v730_v40 = vadd.f32 %v713_v33, %v647_v38 }
  0xc0   : > { %v549_v41 = vpop.f32.mrf.mxu2  ;;  %v632_v42 = vpop.f32.mrf.mxu3 }
  0xc1   : > { %v363_v43 = vpop.f32.mrf.mxu1  ;;  %v565_v33 = vadd.f32 %v549_v41, %v361_v29 }
  0xc2   : > { %v364_v44 = vadd.f32 %v363_v43, %v299_v46 }
  0xc3   : > { %v718_v45 = vpop.f32.mrf.mxu0  ;;  %v648_v43 = vadd.f32 %v632_v42, %v565_v33 }
  0xc5   : > { %v731_v37 = vadd.f32 %v2100_v39, %v648_v43 }
  0xc8   : > { %v552_v47 = vpop.f32.mrf.mxu2  ;;  %v635_v48 = vpop.f32.mrf.mxu3 }
  0xc9   : > { %v566_v49 = vadd.f32 %v552_v47, %v364_v44  ;;  %v2102_v50 = vpop.f32.mrf.mxu1 }
  0xcb   : > { %v649_v51 = vadd.f32 %v635_v48, %v566_v49  ;;  %v2104_v52 = vpop.f32.mrf.mxu0 }
  0xcd   : > { %v2106_v53 = vadd.f32 %v718_v45, %v649_v51 }
  0xd0   : > { %v2108_v54 = vpop.f32.mrf.mxu2  ;;  %v2110_v55 = vpop.f32.mrf.mxu3 }
  0xd1   : > { %v368_v56 = vpop.f32.mrf.mxu1 }
  0xd2   : > { %v369_v57 = vadd.f32 %v368_v56, %v304_v14  ;;  %v2125_v14 = vld [vmem:[%s2182_s2] ss:$0 sm:$0xff] }
  0xd3   : > { %v723_v58 = vpop.f32.mrf.mxu0 }
  0xd8   : > { %v557_v59 = vpop.f32.mrf.mxu2  ;;  %v640_v60 = vpop.f32.mrf.mxu3 }
  0xd9   : > { %v568_v61 = vadd.f32 %v557_v59, %v369_v57  ;;  %v2112_v62 = vpop.f32.mrf.mxu1 }
  0xdb   : > { %v651_v63 = vadd.f32 %v640_v60, %v568_v61  ;;  %v2114_v0 = vpop.f32.mrf.mxu0 }
  0xdd   : > { %v2116_v1 = vadd.f32 %v723_v58, %v651_v63  ;;  %v366_v63 = vadd.f32 %v2102_v50, %v2096_v17 }
  0xdf   : > { %v567_v7 = vadd.f32 %v2108_v54, %v366_v63 }
  0xe0   : > { %v2118_v2 = vpop.f32.mrf.mxu2  ;;  %v2120_v3 = vpop.f32.mrf.mxu3 }
  0xe1   : > { %v902_v4 = vpop.f32.mrf.mxu1 }
  0xe2   : > { %v922_v8 = vadd.f32 %v902_v4, %v728_v28 }
  0xe3   : > { %v1262_v6 = vpop.f32.mrf.mxu0 }
  0xe8   : > { %v985_v9 = vpop.f32.mrf.mxu2  ;;  %v1068_v10 = vpop.f32.mrf.mxu3 }
  0xe9   : > { %v1005_v12 = vadd.f32 %v985_v9, %v922_v8  ;;  %v904_v13 = vpop.f32.mrf.mxu1 }
  0xea   : > { %v923_v16 = vadd.f32 %v904_v13, %v729_v21 }
  0xeb   : > { %v1088_v46 = vadd.f32 %v1068_v10, %v1005_v12  ;;  %v1264_v19 = vpop.f32.mrf.mxu0  ;;  %v650_v12 = vadd.f32 %v2110_v55, %v567_v7 }
  0xed   : > { %v1282_v20 = vadd.f32 %v1262_v6, %v1088_v46 }
  0xef   : > { %v2128_v22 = vadd.f32 %v2125_v14, %v1282_v20 }
  0xf0   : > { %v987_v23 = vpop.f32.mrf.mxu2  ;;  %v1070_v24 = vpop.f32.mrf.mxu3 }
  0xf1   : > { %v1302_v25 = vsub.f32 0.0, %v2128_v22  ;;  %v1006_v26 = vadd.f32 %v987_v23, %v923_v16  ;;  %v907_v28 = vpop.f32.mrf.mxu1  ;;  %v733_v23 = vadd.f32 %v2104_v52, %v650_v12 }
  0xf2   : > { %v924_v35 = vadd.f32 %v907_v28, %v730_v40 }
  0xf3   : > { %v1310_v30 = vmul.f32 1.442695, %v1302_v25  ;;  %v1089_v31 = vadd.f32 %v1070_v24, %v1006_v26  ;;  %v1267_v32 = vpop.f32.mrf.mxu0 }
  0xf5   : > { %v1283_v34 = vadd.f32 %v1264_v19, %v1089_v31  ;;  %1772 = vpow2.f32 %v1310_v30 }
  0xf7   : > { %v1295_v27 = vadd.f32 %v2125_v14, %v1283_v34  ;;  %v371_v34 = vadd.f32 %v2112_v62, %v2098_v18 }
  0xf8   : > { %v990_v36 = vpop.f32.mrf.mxu2  ;;  %v1073_v38 = vpop.f32.mrf.mxu3 }
  0xf9   : > { %v1303_v44 = vsub.f32 0.0, %v1295_v27  ;;  %v1007_v45 = vadd.f32 %v990_v36, %v924_v35  ;;  %v909_v47 = vpop.f32.mrf.mxu1  ;;  %v569_v43 = vadd.f32 %v2118_v2, %v371_v34 }
  0xfa   : > { %v925_v57 = vadd.f32 %v909_v47, %v731_v37 }
  0xfb   : > { %v1312_v48 = vmul.f32 1.442695, %v1303_v44  ;;  %v1090_v49 = vadd.f32 %v1073_v38, %v1007_v45  ;;  %v1269_v51 = vpop.f32.mrf.mxu0  ;;  %v1773_v56 = vpop.eup %1772 }
  0xfc   : > { %v1326_v58 = vadd.f32 1.0, %v1773_v56 }
  0xfd   : > { %1774 = vpow2.f32 %v1312_v48  ;;  %v1284_v15 = vadd.f32 %v1267_v32, %v1090_v49  ;;  %v652_v49 = vadd.f32 %v2120_v3, %v569_v43 }
  0xfe   : > { %1776 = vrcp.f32 %v1326_v58 }
  0xff   : > { %v2135_v41 = vadd.f32 %v2125_v14, %v1284_v15 }
 0x100   : > { %v992_v40 = vpop.f32.mrf.mxu2  ;;  %v1075_v59 = vpop.f32.mrf.mxu3 }
 0x101   : > { %v1304_v42 = vsub.f32 0.0, %v2135_v41  ;;  %v1008_v60 = vadd.f32 %v992_v40, %v925_v57  ;;  %v912_v61 = vpop.f32.mrf.mxu1  ;;  %v735_v40 = vadd.f32 %v2114_v0, %v652_v49 }
 0x102   : > { %v926_v11 = vadd.f32 %v912_v61, %v2106_v53 }
 0x103   : > { %v1775_v4 = vpop.eup %1774  ;;  %v1314_v5 = vmul.f32 1.442695, %v1304_v42  ;;  %v1091_v6 = vadd.f32 %v1075_v59, %v1008_v60  ;;  %v1272_v9 = vpop.f32.mrf.mxu0 }
 0x104   : > { %v1327_v39 = vadd.f32 1.0, %v1775_v4  ;;  %v1777_v20 = vpop.eup %1776 }
 0x105   : > { %v1285_v8 = vadd.f32 %v1269_v51, %v1091_v6  ;;  %v1342_v25 = vmul.f32 %v1777_v20, %v2128_v22 }
 0x106   : > { %1778 = vrcp.f32 %v1327_v39 }
 0x107   : > { %1780 = vpow2.f32 %v1314_v5  ;;  %v1297_v10 = vadd.f32 %v2125_v14, %v1285_v8 }
 0x108   : > { %v995_v13 = vpop.f32.mrf.mxu2  ;;  %v1078_v17 = vpop.f32.mrf.mxu3 }
 0x109   : > { %v1305_v50 = vsub.f32 0.0, %v1297_v10  ;;  %v1009_v46 = vadd.f32 %v995_v13, %v926_v11  ;;  %v914_v19 = vpop.f32.mrf.mxu1 }
 0x10a   : > { %v927_v29 = vadd.f32 %v914_v19, %v733_v23 }
 0x10b   : > { %v1316_v54 = vmul.f32 1.442695, %v1305_v50  ;;  %v1092_v21 = vadd.f32 %v1078_v17, %v1009_v46  ;;  %v1274_v30 = vpop.f32.mrf.mxu0 }
 0x10c   : > { %v1779_v16 = vpop.eup %1778 }
 0x10d   : > { %v1781_v24 = vpop.eup %1780  ;;  %v1343_v26 = vmul.f32 %v1779_v16, %v1295_v27  ;;  %1782 = vpow2.f32 %v1316_v54  ;;  %v1286_v53 = vadd.f32 %v1272_v9, %v1092_v21 }
 0x10e   : > { %v1328_v31 = vadd.f32 1.0, %v1781_v24 }
 0x10f   : > { %v1723_v55 = vpack.c.bf16 %v1343_v26, %v1342_v25  ;;  %v2153_v28 = vadd.f32 %v2125_v14, %v1286_v53 }
 0x110   : > { %v997_v52 = vpop.f32.mrf.mxu2  ;;  %v1080_v32 = vpop.f32.mrf.mxu3  ;;  %1784 = vrcp.f32 %v1328_v31 }
 0x111   : > { %1724 = vst [vmem:[%s2150_s20] sm:$0xff] %v1723_v55   ;;  %v1306_v22 = vsub.f32 0.0, %v2153_v28  ;;  %v1010_v33 = vadd.f32 %v997_v52, %v927_v29  ;;  %v917_v27 = vpop.f32.mrf.mxu1 }
 0x112   : > { %v928_v48 = vadd.f32 %v917_v27, %v2116_v1 }
 0x113   : > { %v1783_v35 = vpop.eup %1782  ;;  %v1318_v36 = vmul.f32 1.442695, %v1306_v22  ;;  %v1093_v38 = vadd.f32 %v1080_v32, %v1010_v33  ;;  %v1277_v37 = vpop.f32.mrf.mxu0 }
 0x114   : > { %v1329_v44 = vadd.f32 1.0, %v1783_v35 }
 0x115   : > { %v1287_v45 = vadd.f32 %v1274_v30, %v1093_v38 }
 0x116   : > { %1786 = vrcp.f32 %v1329_v44  ;;  %v1785_v15 = vpop.eup %1784 }
 0x117   : > { %1788 = vpow2.f32 %v1318_v36  ;;  %v1299_v47 = vadd.f32 %v2125_v14, %v1287_v45  ;;  %v1344_v60 = vmul.f32 %v1785_v15, %v2135_v41 }
 0x118   : > { %v1000_v51 = vpop.f32.mrf.mxu2  ;;  %v1083_v56 = vpop.f32.mrf.mxu3 }
 0x119   : > { %v1307_v18 = vsub.f32 0.0, %v1299_v47  ;;  %v1011_v62 = vadd.f32 %v1000_v51, %v928_v48  ;;  %v919_v59 = vpop.f32.mrf.mxu1 }
 0x11a   : > { %v929_v4 = vadd.f32 %v919_v59, %v735_v40 }
 0x11b   : > { %v1320_v57 = vmul.f32 1.442695, %v1307_v18  ;;  %v1094_v2 = vadd.f32 %v1083_v56, %v1011_v62  ;;  %v1279_v41 = vpop.f32.mrf.mxu0 }
 0x11c   : > { %v1787_v58 = vpop.eup %1786 }
 0x11d   : > { %v1789_v42 = vpop.eup %1788  ;;  %v1345_v61 = vmul.f32 %v1787_v58, %v1297_v10  ;;  %1790 = vpow2.f32 %v1320_v57  ;;  %v1288_v1 = vadd.f32 %v1277_v37, %v1094_v2 }
 0x11e   : > { %v1330_v5 = vadd.f32 1.0, %v1789_v42 }
 0x11f   : > { %v1728_v3 = vpack.c.bf16 %v1345_v61, %v1344_v60  ;;  %v1300_v63 = vadd.f32 %v2125_v14, %v1288_v1 }
 0x120   : > { %v1002_v6 = vpop.f32.mrf.mxu2  ;;  %v1085_v8 = vpop.f32.mrf.mxu3  ;;  %1792 = vrcp.f32 %v1330_v5 }
 0x121   : > { %1740 = vst [vmem:[%s2150_s20 + $0x8] sm:$0xff] %v1728_v3   ;;  %v1308_v7 = vsub.f32 0.0, %v1300_v63  ;;  %v1012_v39 = vadd.f32 %v1002_v6, %v929_v4 }
 0x123   : > { %v1791_v9 = vpop.eup %1790  ;;  %v1322_v11 = vmul.f32 1.442695, %v1308_v7  ;;  %v1095_v0 = vadd.f32 %v1085_v8, %v1012_v39 }
 0x124   : > { %v1331_v12 = vadd.f32 1.0, %v1791_v9 }
 0x125   : > { %v1289_v10 = vadd.f32 %v1279_v41, %v1095_v0 }
 0x126   : > { %1794 = vrcp.f32 %v1331_v12  ;;  %v1793_v50 = vpop.eup %1792 }
 0x127   : > { %1796 = vpow2.f32 %v1322_v11  ;;  %v1301_v13 = vadd.f32 %v2125_v14, %v1289_v10  ;;  %v1346_v54 = vmul.f32 %v1793_v50, %v2153_v28 }
 0x129   : > { %v1309_v17 = vsub.f32 0.0, %v1301_v13 }
 0x12b   : > { %v1324_v46 = vmul.f32 1.442695, %v1309_v17 }
 0x12c   : > { %v1795_v19 = vpop.eup %1794 }
 0x12d   : > { %v1797_v20 = vpop.eup %1796  ;;  %v1347_v21 = vmul.f32 %v1795_v19, %v1299_v47  ;;  %1798 = vpow2.f32 %v1324_v46 }
 0x12e   : > { %v1332_v23 = vadd.f32 1.0, %v1797_v20 }
 0x12f   : > { %v1733_v16 = vpack.c.bf16 %v1347_v21, %v1346_v54 }
 0x130   : > { %1800 = vrcp.f32 %v1332_v23 }
 0x131   : > { %1741 = vst [vmem:[%s2150_s20 + $0x10] sm:$0xff] %v1733_v16  }
 0x133   : > { %v1799_v24 = vpop.eup %1798 }
 0x134   : > { %v1333_v25 = vadd.f32 1.0, %v1799_v24 }
 0x136   : > { %1802 = vrcp.f32 %v1333_v25  ;;  %v1801_v26 = vpop.eup %1800 }
 0x137   : > { %v1348_v14 = vmul.f32 %v1801_v26, %v1300_v63 }
 0x13c   : > { %v1803_v53 = vpop.eup %1802 }
 0x13d   : > { %v1349_v55 = vmul.f32 %v1803_v53, %v1301_v13 }
 0x13f   : > { %v1738_v29 = vpack.c.bf16 %v1349_v55, %v1348_v14 }
 0x141   : > { %1742 = vst [vmem:[%s2150_s20 + $0x18] sm:$0xff] %v1738_v29  }
 0x142 PF: > { %s13_s14 = sadd.s32 1, %s1826_s14   ;;  %s2186_s12 = smov %s1822_s13 }
 0x143   : > { %p10_p5 = scmp.ge.s32.totalorder %s13_s14, 4   ;;  %s2187_s13 = smov %s2189_s15 }
 0x145   :  { %12 = sbr.rel (!%p10_p5) target bundleno = 2 (0x2), region = 81 }

// kernel: multipool_forward.15
= control target key start
LH: loop header
LB: loop body
LE: loop exit
PB: predicated region body
PF: predicated region fallthrough
CT: control target
= control target key end

     0   :  { %s1885_s12 = smov 0   ;;  %s1887_s13 = smov 0   ;;  %s2342_s0 = inlined_call_operand.vmem [shape: bf16[2,1,10,10,8], index: 0, kind: input, shape index: {}]   ;;  %s2343_s1 = inlined_call_operand.vmem [shape: bf16[9,8,128], index: 1, kind: input, shape index: {}]   ;;  %s2344_s2 = inlined_call_operand.vmem [shape: f32[1,128], index: 2, kind: input, shape index: {}]   ;;  %s2345_s3 = inlined_call_operand.vmem [shape: f32[2,64,128], index: 3, kind: output, shape index: {}]  }
   0x1   :  { %s1889_s14 = smov 0  }
   0x2 LB: > { %s25_s15 = sadd.s32 1, %s1859_s13  ;;  %p1581_p0 = scmp.ge.s32.totalorder %s1863_s14, 1  ;;  %s1863_s14 = sphi %s1889_s14, %s13_s14   ;;  %s1859_s13 = sphi %s1887_s13, %s2351_s13   ;;  %s1855_s12 = sphi %s1885_s12, %s2350_s12  }
   0x3   : > { %p27_p1 = scmp.ge.s32.totalorder %s25_s15, 2  ;;  %p168_p2 = scmp.lt.s32.totalorder %s1863_s14, 3 }
   0x5   : > { %s2353_s15 = smov (%p27_p1, %s25_s15), 0  ;;  %p169_p3 = pnand %p1581_p0, %p168_p2 }
   0x6   : > { %p202_p4 = scmp.lt.s32.totalorder (!%p169_p3), %s1855_s12, 1 }
   0x7   : > { %172 = sbr.rel (%p169_p3) target bundleno = 338 (0x152), region = 32 }
   0xc   : > { %v1585_v0 = vld [vmem:[%s2343_s1 + $0x4] sm:$0xf]  ;;  %vm382_vm0 = vcmask 1043456   ;;  %v1618_v2 = vld [vmem:[%s2343_s1 + $0x8] sm:$0xf]  ;;  %s2355_s12 = smov (!%p202_p4, %s1855_s12), 1 }
   0xd   : > { %v384_v1 = vsel %vm382_vm0, %v1585_v0, 0  ;;  %v565_v3 = vsel %vm382_vm0, %v1618_v2, 0  ;;  %s1783_s20 = smul.u32 80, %s2355_s12  ;;  %v1631_v4 = vld [vmem:[%s2343_s1 + $0xc] sm:$0xf]  ;;  %vm369_vm3 = vcmask 64512  }
   0xe   : > { %1780 = vmatpush.bf16.msra.mxu1 %v384_v1  ;;  %1781 = vmatpush.bf16.msra.mxu2 %v384_v1  ;;  %v231_v5 = vld [vmem:[%s2343_s1] sm:$0xf]  ;;  %v648_v6 = vsel %vm382_vm0, %v1631_v4, 0  ;;  %v1668_v8 = vld [vmem:[%s2343_s1 + $0x10] sm:$0xf]  ;;  %vm503_vm5 = vcmask 1042432  }
   0xf   : > { %1782 = vmatpush.bf16.msra.mxu3 %v384_v1  ;;  %393 = vmatpush.bf16.msra.mxu0 %v384_v1  ;;  %v448_v7 = vsel %vm382_vm0, %v231_v5, 0  ;;  %s1928_s29 = scalar_lea.vmem %s2342_s0, %s1783_s20  ;;  %vm240_vm1 = vsmask.f32 3328  ;;  %vm241_vm2 = vsmask.f32 7440  ;;  %v842_v9 = vsel %vm382_vm0, %v1668_v8, 0 }
  0x10   : > { %v225_v10 = vld [vmem:[%s1928_s29 + $0x10] sm:$0xf]  ;;  %v226_v11 = vld [vmem:[%s1928_s29 + $0x18] sm:$0xf]  ;;  %v1934_v12 = vld [vmem:[%s1928_s29 + $0x14] sm:$0x1] }
  0x11   : > { %v1937_v13 = vld [vmem:[%s1928_s29 + $0x1c] sm:$0x1]  ;;  %v272_v14 = vshrl.u32 %v225_v10, 16  ;;  %v275_v15 = vshll.u32 %v225_v10, 16  ;;  %v281_v16 = vshll.u32 %v1934_v12, 16  ;;  %v286_v17 = vshrl.u32 %v226_v11, 16  ;;  %vm1953_vm4 = vmor %vm240_vm1, %vm241_vm2 }
  0x12   : > { %574 = vmatpush.bf16.msrb.mxu2 %v565_v3  ;;  %457 = vmatpush.bf16.msrb.mxu1 %v448_v7  ;;  %v289_v18 = vshll.u32 %v226_v11, 16  ;;  %v295_v19 = vshll.u32 %v1937_v13, 16  ;;  %v227_v20 = vld [vmem:[%s1928_s29 + $0x20] sm:$0xf]  ;;  %v228_v21 = vld [vmem:[%s1928_s29 + $0x28] sm:$0xf] }
  0x13   : > { %657 = vmatpush.bf16.msrb.mxu3 %v648_v6  ;;  %851 = vmatpush.bf16.msrb.mxu0 %v842_v9  ;;  %v274_v22 = vrot.slane %v272_v14, 4  ;;  %v277_v23 = vrot.slane %v275_v15, 5  ;;  %v283_v24 = vrot.slane %v281_v16, 5  ;;  %v288_v25 = vrot.slane %v286_v17, 4  ;;  %v1944_v26 = vld [vmem:[%s1928_s29 + $0x24] sm:$0x1] }
  0x14   : > { %v291_v27 = vrot.slane %v289_v18, 5  ;;  %v297_v28 = vrot.slane %v295_v19, 5  ;;  %v1947_v29 = vld [vmem:[%s1928_s29 + $0x2c] sm:$0x1]  ;;  %v300_v30 = vshrl.u32 %v227_v20, 16  ;;  %v303_v31 = vshll.u32 %v227_v20, 16 }
  0x15   : > { %v278_v32 = vor.u32 %v277_v23, %v274_v22  ;;  %v309_v33 = vshll.u32 %v1944_v26, 16  ;;  %v314_v34 = vshrl.u32 %v228_v21, 16  ;;  %v317_v35 = vshll.u32 %v228_v21, 16  ;;  %v229_v36 = vld [vmem:[%s1928_s29 + $0x30] sm:$0xf]  ;;  %s1767_s17 = sshll.u32 %s2355_s12, 6 }
  0x16   : > { %v292_v38 = vor.u32 %v291_v27, %v288_v25  ;;  %v302_v39 = vrot.slane %v300_v30, 4  ;;  %v305_v40 = vrot.slane %v303_v31, 5  ;;  %v323_v41 = vshll.u32 %v1947_v29, 16  ;;  %v1959_v46 = vld [vmem:[%s1928_s29 + $0x34] sm:$0x1]  ;;  %s2306_s20 = scalar_lea.vmem %s2345_s3, %s1767_s17 }
  0x17   : > { %v279_v42 = vrot.slane %v278_v32, 4  ;;  %v311_v43 = vrot.slane %v309_v33, 5  ;;  %v316_v44 = vrot.slane %v314_v34, 4  ;;  %v319_v45 = vrot.slane %v317_v35, 5  ;;  %v230_v53 = vld [vmem:[%s1928_s29 + $0x38] sm:$0xf] }
  0x18   : > { %v293_v47 = vrot.slane %v292_v38, 4  ;;  %v306_v48 = vor.u32 %v305_v40, %v302_v39  ;;  %v325_v49 = vrot.slane %v323_v41, 5  ;;  %v328_v50 = vshrl.u32 %v229_v36, 16  ;;  %v1965_v54 = vld [vmem:[%s1928_s29 + $0x3c] sm:$0x1] }
  0x19   : > { %vm504_vm6 = vcmask 1046532   ;;  %v284_v51 = vsel %vm1953_vm4, %v279_v42, %v283_v24  ;;  %v320_v52 = vor.u32 %v319_v45, %v316_v44  ;;  %v331_v55 = vshll.u32 %v229_v36, 16  ;;  %v223_v1 = vld [vmem:[%s1928_s29] sm:$0xf]  ;;  %v232_v6 = vld [vmem:[%s1928_s29 + $0x4] sm:$0x1] }
  0x1a   : > { %v337_v56 = vshll.u32 %v1959_v46, 16  ;;  %v298_v57 = vsel %vm1953_vm4, %v293_v47, %v297_v28  ;;  %v359_v58 = vunpack.c.l.b16 %v284_v51  ;;  %v307_v59 = vrot.slane %v306_v48, 4  ;;  %v224_v11 = vld [vmem:[%s1928_s29 + $0x8] sm:$0xf]  ;;  %v233_v24 = vld [vmem:[%s1928_s29 + $0xc] sm:$0x1]  ;;  %vm1987_vm7 = vmor %vm503_vm5, %vm504_vm6 }
  0x1b   : > { %v330_v60 = vrot.slane %v328_v50, 4  ;;  %v360_v61 = vunpack.c.l.b16 %v298_v57  ;;  %v321_v62 = vrot.slane %v320_v52, 4  ;;  %v333_v63 = vrot.slane %v331_v55, 5  ;;  %v479_v33 = vld [vmem:[%s1928_s29] sm:$0xe] }
  0x1c   : > { %v339_v0 = vrot.slane %v337_v56, 5  ;;  %v312_v2 = vsel %vm1953_vm4, %v307_v59, %v311_v43  ;;  %v342_v3 = vshrl.u32 %v230_v53, 16  ;;  %v345_v4 = vshll.u32 %v230_v53, 16  ;;  %v480_v39 = vld [vmem:[%s1928_s29 + $0x8] sm:$0xe] }
  0x1d   : > { %v351_v5 = vshll.u32 %v1965_v54, 16  ;;  %v366_v7 = vpack.c.b16 %v360_v61, %v359_v58  ;;  %v326_v8 = vsel %vm1953_vm4, %v321_v62, %v325_v49  ;;  %v361_v9 = vunpack.c.l.b16 %v312_v2  ;;  %v1702_v45 = vld [vmem:[%s2343_s1 + $0x18] sm:$0xf]  ;;  %v1652_v55 = vld [vmem:[%s1928_s29 + $0x8] sm:$0xf] }
  0x1e   : > { %v334_v10 = vor.u32 %v333_v63, %v330_v60  ;;  %v362_v14 = vunpack.c.l.b16 %v326_v8  ;;  %v344_v15 = vrot.slane %v342_v3, 4  ;;  %v347_v16 = vrot.slane %v345_v4, 5  ;;  %v1654_v59 = vld [vmem:[%s1928_s29 + $0x10] sm:$0xf]  ;;  %v2006_v63 = vld [vmem:[%s1928_s29 + $0xc] sm:$0x1] }
  0x1f   : > { %v353_v17 = vrot.slane %v351_v5, 5  ;;  %1587 = vmatmul.msk.bf16.vlgmr.msra.gmra.mxu1 %vm369_vm3, %v366_v7  ;;  %v244_v19 = vshrl.u32 %v223_v1, 16  ;;  %v247_v20 = vshll.u32 %v223_v1, 16  ;;  %v253_v21 = vshll.u32 %v232_v6, 16  ;;  %v1592_v3 = vld [vmem:[%s1928_s29] sm:$0xf] }
  0x20   : > { %v335_v18 = vrot.slane %v334_v10, 4  ;;  %v367_v22 = vpack.c.b16 %v362_v14, %v361_v9  ;;  %v348_v23 = vor.u32 %v347_v16, %v344_v15  ;;  %v258_v25 = vshrl.u32 %v224_v11, 16  ;;  %v1768_v4 = vld [vmem:[%s1928_s29 + $0x4] sm:$0xf0]  ;;  %v1689_v14 = vld [vmem:[%s2343_s1 + $0x14] sm:$0xf] }
  0x21   : > { %v261_v27 = vshll.u32 %v224_v11, 16  ;;  %v246_v30 = vrot.slane %v244_v19, 4  ;;  %v249_v31 = vrot.slane %v247_v20, 5  ;;  %v255_v32 = vrot.slane %v253_v21, 5  ;;  %v1739_v11 = vld [vmem:[%s2343_s1 + $0x1c] sm:$0xf] }
  0x22   : > { %v340_v28 = vsel %vm1953_vm4, %v335_v18, %v339_v0  ;;  %1588 = vmatmul.msk.bf16.vlgmr.msra.gmra.mxu2 %vm369_vm3, %v367_v22  ;;  %v349_v34 = vrot.slane %v348_v23, 4  ;;  %v260_v36 = vrot.slane %v258_v25, 4  ;;  %v267_v41 = vshll.u32 %v233_v24, 16  ;;  %v2009_v0 = vld [vmem:[%s1928_s29 + $0x14] sm:$0x1] }
  0x23   : > { %v363_v35 = vunpack.c.l.b16 %v340_v28  ;;  %v263_v38 = vrot.slane %v261_v27, 5  ;;  %v250_v40 = vor.u32 %v249_v31, %v246_v30  ;;  %v508_v42 = vrot.slane %v232_v6, 5  ;;  %v1760_v19 = vld [vmem:[%s2343_s1 + $0x20] sm:$0xf] }
  0x24   : > { %v512_v43 = vrot.slane %v233_v24, 5  ;;  %v354_v47 = vsel %vm1953_vm4, %v349_v34, %v353_v17  ;;  %v1610_v49 = vrot.slane %v479_v33, 9  ;;  %v269_v52 = vrot.slane %v267_v41, 5  ;;  %v1658_v41 = vld [vmem:[%s1928_s29 + $0x20] sm:$0xf] }
  0x25   : > { %v264_v48 = vor.u32 %v263_v38, %v260_v36  ;;  %v364_v50 = vunpack.c.l.b16 %v354_v47  ;;  %v251_v51 = vrot.slane %v250_v40, 4  ;;  %v1611_v53 = vrot.slane %v480_v39, 9  ;;  %v1656_v38 = vld [vmem:[%s1928_s29 + $0x18] sm:$0xf]  ;;  %v1772_v47 = vld [vmem:[%s1928_s29 + $0xc] sm:$0xf0] }
  0x26   : > { %v509_v57 = vsel %vm1987_vm7, %v1610_v49, %v508_v42  ;;  %v1047_v58 = vsel %vm382_vm0, %v1702_v45, 0  ;;  %v704_v6 = vshrl.u32 %v1652_v55, 16  ;;  %v707_v9 = vshll.u32 %v1652_v55, 16  ;;  %v482_v40 = vld [vmem:[%s1928_s29 + $0x18] sm:$0xe] }
  0x27   : > { %v265_v56 = vrot.slane %v264_v48, 4  ;;  %v368_v60 = vpack.c.b16 %v364_v50, %v363_v35  ;;  %v256_v61 = vsel %vm1953_vm4, %v251_v51, %v255_v32  ;;  %v513_v62 = vsel %vm1987_vm7, %v1611_v53, %v512_v43  ;;  %1056 = vmatpush.bf16.msra.mxu2 %v1047_v58  ;;  %v481_v35 = vld [vmem:[%s1928_s29 + $0x10] sm:$0xe]  ;;  %v1634_v45 = vld [vmem:[%s1928_s29 + $0x8] sm:$0xf] }
  0x28   : > { %v357_v2 = vunpack.c.l.b16 %v256_v61  ;;  %v540_v5 = vunpack.c.l.b16 %v509_v57  ;;  %v541_v8 = vunpack.c.l.b16 %v513_v62  ;;  %v718_v10 = vshrl.u32 %v1654_v59, 16 }
  0x29   : > { %v270_v1 = vsel %vm1953_vm4, %v265_v56, %v269_v52  ;;  %1589 = vmatmul.msk.bf16.vlgmr.msra.gmra.mxu3 %vm369_vm3, %v368_v60  ;;  %v706_v15 = vrot.slane %v704_v6, 4  ;;  %v713_v16 = vshll.u32 %v2006_v63, 16  ;;  %v721_v17 = vshll.u32 %v1654_v59, 16  ;;  %v2048_v60 = vld [vmem:[%s1928_s29 + $0x1c] sm:$0x1] }
  0x2a   : > { %v358_v7 = vunpack.c.l.b16 %v270_v1  ;;  %v727_v18 = vshll.u32 %v2009_v0, 16  ;;  %v1593_v21 = vor.u32 %v1768_v4, %v1592_v3  ;;  %v709_v22 = vrot.slane %v707_v9, 5  ;;  %v2053_v4 = vld [vmem:[%s1928_s29 + $0x24] sm:$0x1] }
  0x2b   : > { %v720_v23 = vrot.slane %v718_v10, 4  ;;  %v723_v24 = vrot.slane %v721_v17, 5  ;;  %v1241_v27 = vsel %vm382_vm0, %v1739_v11, 0  ;;  %v964_v28 = vsel %vm382_vm0, %v1689_v14, 0  ;;  %v1660_v17 = vld [vmem:[%s1928_s29 + $0x28] sm:$0xf] }
  0x2c   : > { %v365_v20 = vpack.c.b16 %v358_v7, %v357_v2  ;;  %v710_v25 = vor.u32 %v709_v22, %v706_v15  ;;  %v1363_v30 = vsel %vm382_vm0, %v1760_v19, 0  ;;  %v548_v31 = vpack.c.b16 %v541_v8, %v540_v5  ;;  %1250 = vmatpush.bf16.msra.mxu3 %v1241_v27  ;;  %973 = vmatpush.bf16.msra.mxu1 %v964_v28  ;;  %v1769_v5 = vld [vmem:[%s1928_s29 + $0x14] sm:$0xf0]  ;;  %v1662_v22 = vld [vmem:[%s1928_s29 + $0x30] sm:$0xf] }
  0x2d   : > { %v715_v32 = vrot.slane %v713_v16, 5  ;;  %v724_v33 = vor.u32 %v723_v24, %v720_v23  ;;  %v729_v34 = vrot.slane %v727_v18, 5  ;;  %v1612_v42 = vrot.slane %v481_v35, 9  ;;  %v483_v23 = vld [vmem:[%s1928_s29 + $0x20] sm:$0xe] }
  0x2e   : > { %1586 = vmatmul.msk.bf16.vlgmr.msra.gmra.mxu0 %vm369_vm3, %v365_v20  ;;  %v711_v36 = vrot.slane %v710_v25, 4  ;;  %v516_v43 = vrot.slane %v1934_v12, 5  ;;  %v732_v50 = vshrl.u32 %v1656_v38, 16  ;;  %v735_v51 = vshll.u32 %v1656_v38, 16  ;;  %v484_v24 = vld [vmem:[%s1928_s29 + $0x28] sm:$0xe] }
  0x2f   : > { %1606 = vmatmul.msk.bf16.vlgmr.msrb.gmra.mxu1 %vm369_vm3, %v1593_v21  ;;  %1372 = vmatpush.bf16.msra.mxu0 %v1363_v30  ;;  %v725_v39 = vrot.slane %v724_v33, 4  ;;  %v1613_v52 = vrot.slane %v482_v40, 9  ;;  %v520_v53 = vrot.slane %v1937_v13, 5  ;;  %v746_v12 = vshrl.u32 %v1658_v41, 16  ;;  %v1596_v13 = vld [vmem:[%s1928_s29 + $0x10] sm:$0xf] }
  0x30   : > { %v716_v48 = vsel %vm1953_vm4, %v711_v36, %v715_v32  ;;  %v749_v55 = vshll.u32 %v1658_v41, 16  ;;  %v1635_v56 = vor.u32 %v1772_v47, %v1634_v45  ;;  %v517_v59 = vsel %vm1987_vm7, %v1612_v42, %v516_v43  ;;  %v1638_v28 = vld [vmem:[%s1928_s29 + $0x18] sm:$0xf]  ;;  %v1773_v30 = vld [vmem:[%s1928_s29 + $0x1c] sm:$0xf0] }
  0x31   : > { %v730_v49 = vsel %vm1953_vm4, %v725_v39, %v729_v34  ;;  %v817_v57 = vunpack.c.l.b16 %v716_v48  ;;  %v734_v61 = vrot.slane %v732_v50, 4  ;;  %v737_v62 = vrot.slane %v735_v51, 5  ;;  %v2076_v47 = vld [vmem:[%s1928_s29 + $0x2c] sm:$0x1] }
  0x32   : > { %1619 = vmatmul.msk.bf16.vlgmr.msrb.gmra.mxu2 %vm369_vm3, %v548_v31  ;;  %v818_v58 = vunpack.c.l.b16 %v730_v49  ;;  %v748_v1 = vrot.slane %v746_v12, 4  ;;  %v751_v2 = vrot.slane %v749_v55, 5  ;;  %v521_v3 = vsel %vm1987_vm7, %v1613_v52, %v520_v53  ;;  %v1600_v52 = vld [vmem:[%s1928_s29 + $0x20] sm:$0xf] }
  0x33   : > { %v542_v7 = vunpack.c.l.b16 %v517_v59  ;;  %v741_v8 = vshll.u32 %v2048_v60, 16  ;;  %v543_v9 = vunpack.c.l.b16 %v521_v3  ;;  %v738_v10 = vor.u32 %v737_v62, %v734_v61 }
  0x34   : > { %v825_v6 = vpack.c.b16 %v818_v58, %v817_v57  ;;  %v752_v11 = vor.u32 %v751_v2, %v748_v1  ;;  %v755_v14 = vshll.u32 %v2053_v4, 16  ;;  %v1597_v15 = vor.u32 %v1769_v5, %v1596_v13  ;;  %v485_v2 = vld [vmem:[%s1928_s29 + $0x30] sm:$0xe] }
  0x35   : > { %v743_v16 = vrot.slane %v741_v8, 5  ;;  %v549_v18 = vpack.c.b16 %v543_v9, %v542_v7  ;;  %v739_v19 = vrot.slane %v738_v10, 4  ;;  %v760_v25 = vshrl.u32 %v1660_v17, 16  ;;  %v1664_v7 = vld [vmem:[%s1928_s29 + $0x38] sm:$0xf] }
  0x36   : > { %v753_v20 = vrot.slane %v752_v11, 4  ;;  %v757_v21 = vrot.slane %v755_v14, 5  ;;  %v763_v27 = vshll.u32 %v1660_v17, 16  ;;  %v774_v33 = vshrl.u32 %v1662_v22, 16  ;;  %v1666_v8 = vld [vmem:[%s1928_s29 + $0x40] sm:$0xf] }
  0x37   : > { %v744_v31 = vsel %vm1953_vm4, %v739_v19, %v743_v16  ;;  %v777_v34 = vshll.u32 %v1662_v22, 16  ;;  %v1614_v35 = vrot.slane %v483_v23, 9  ;;  %v524_v36 = vrot.slane %v1944_v26, 5  ;;  %v2083_v26 = vld [vmem:[%s1928_s29 + $0x34] sm:$0x1] }
  0x38   : > { %v758_v32 = vsel %vm1953_vm4, %v753_v20, %v757_v21  ;;  %v1615_v38 = vrot.slane %v484_v24, 9  ;;  %v528_v39 = vrot.slane %v1947_v29, 5  ;;  %v762_v40 = vrot.slane %v760_v25, 4  ;;  %v1770_v29 = vld [vmem:[%s1928_s29 + $0x24] sm:$0xf0] }
  0x39   : > { %1648 = vmatmul.msk.bf16.vlgmr.msrb.gmra.mxu3 %vm369_vm3, %v1635_v56  ;;  %v765_v41 = vrot.slane %v763_v27, 5  ;;  %v1639_v42 = vor.u32 %v1773_v30, %v1638_v28  ;;  %v819_v43 = vunpack.c.l.b16 %v744_v31  ;;  %v820_v45 = vunpack.c.l.b16 %v758_v32  ;;  %v1642_v9 = vld [vmem:[%s1928_s29 + $0x28] sm:$0xf]  ;;  %v1774_v14 = vld [vmem:[%s1928_s29 + $0x2c] sm:$0xf0] }
  0x3a   : > { %v776_v48 = vrot.slane %v774_v33, 4  ;;  %v779_v49 = vrot.slane %v777_v34, 5  ;;  %v525_v50 = vsel %vm1987_vm7, %v1614_v35, %v524_v36  ;;  %v529_v51 = vsel %vm1987_vm7, %v1615_v38, %v528_v39  ;;  %v2110_v27 = vld [vmem:[%s1928_s29 + $0x3c] sm:$0x1]  ;;  %v2113_v28 = vld [vmem:[%s1928_s29 + $0x44] sm:$0x1] }
  0x3b   : > { %v766_v53 = vor.u32 %v765_v41, %v762_v40  ;;  %v769_v12 = vshll.u32 %v2076_v47, 16  ;;  %v826_v55 = vpack.c.b16 %v820_v45, %v819_v43  ;;  %v544_v56 = vunpack.c.l.b16 %v525_v50  ;;  %v1604_v34 = vld [vmem:[%s1928_s29 + $0x30] sm:$0xf]  ;;  %v1771_v35 = vld [vmem:[%s1928_s29 + $0x34] sm:$0xf0] }
  0x3c   : > { %v545_v57 = vunpack.c.l.b16 %v529_v51  ;;  %v780_v58 = vor.u32 %v779_v49, %v776_v48  ;;  %v783_v59 = vshll.u32 %v2083_v26, 16  ;;  %v1601_v61 = vor.u32 %v1770_v29, %v1600_v52  ;;  %v1725_v49 = vld [vmem:[%s1928_s29 + $0x18] sm:$0xf] }
  0x3d   : > { %v767_v62 = vrot.slane %v766_v53, 4  ;;  %v771_v1 = vrot.slane %v769_v12, 5  ;;  %v532_v11 = vrot.slane %v1959_v46, 5  ;;  %v536_v17 = vrot.slane %v1965_v54, 5  ;;  %v1673_v12 = vld [vmem:[%s1928_s29 + $0x8] sm:$0xe] }
  0x3e   : > { %1669 = vmatmul.msk.bf16.vlgmr.msrb.gmra.mxu0 %vm369_vm3, %v825_v6  ;;  %v550_v3 = vpack.c.b16 %v545_v57, %v544_v56  ;;  %v781_v13 = vrot.slane %v780_v58, 4  ;;  %v785_v5 = vrot.slane %v783_v59, 5  ;;  %v486_v6 = vld [vmem:[%s1928_s29 + $0x38] sm:$0xe]  ;;  %v791_v20 = vshll.u32 %v1664_v7, 16 }
  0x3f   : > { %1607 = vmatmul.msk.bf16.gmra.mxu1 %vm369_vm3, %v1597_v15  ;;  %v772_v10 = vsel %vm1953_vm4, %v767_v62, %v771_v1  ;;  %v1616_v15 = vrot.slane %v485_v2, 9  ;;  %v1617_v16 = vrot.slane %v486_v6, 9  ;;  %v802_v21 = vshrl.u32 %v1666_v8, 16  ;;  %v1646_v6 = vld [vmem:[%s1928_s29 + $0x38] sm:$0xf] }
  0x40   : > { %v786_v19 = vsel %vm1953_vm4, %v781_v13, %v785_v5  ;;  %v805_v22 = vshll.u32 %v1666_v8, 16  ;;  %v1643_v23 = vor.u32 %v1774_v14, %v1642_v9  ;;  %v821_v46 = vunpack.c.l.b16 %v772_v10  ;;  %v1724_v5 = vld [vmem:[%s1928_s29 + $0x14] sm:$0x1] }
  0x41   : > { %v822_v24 = vunpack.c.l.b16 %v786_v19  ;;  %v533_v25 = vsel %vm1987_vm7, %v1616_v15, %v532_v11  ;;  %v537_v54 = vsel %vm1987_vm7, %v1617_v16, %v536_v17  ;;  %v793_v31 = vrot.slane %v791_v20, 5 }
  0x42   : > { %1620 = vmatmul.msk.bf16.gmra.mxu2 %vm369_vm3, %v549_v18  ;;  %v788_v18 = vshrl.u32 %v1664_v7, 16  ;;  %v804_v32 = vrot.slane %v802_v21, 4  ;;  %v807_v33 = vrot.slane %v805_v22, 5  ;;  %v546_v36 = vunpack.c.l.b16 %v533_v25  ;;  %v1775_v7 = vld [vmem:[%s1928_s29 + $0x3c] sm:$0xf0] }
  0x43   : > { %v827_v38 = vpack.c.b16 %v822_v24, %v821_v46  ;;  %v547_v39 = vunpack.c.l.b16 %v537_v54  ;;  %v797_v40 = vshll.u32 %v2110_v27, 16  ;;  %v811_v41 = vshll.u32 %v2113_v28, 16  ;;  %v1705_v54 = vld [vmem:[%s1928_s29 + $0x10] sm:$0xf] }
  0x44   : > { %v790_v30 = vrot.slane %v788_v18, 4  ;;  %v808_v45 = vor.u32 %v807_v33, %v804_v32  ;;  %v1605_v48 = vor.u32 %v1771_v35, %v1604_v34  ;;  %v1117_v58 = vshrl.u32 %v1725_v49, 16  ;;  %v1776_v32 = vld [vmem:[%s1928_s29 + $0x14] sm:$0xf0]  ;;  %v1727_v35 = vld [vmem:[%s1928_s29 + $0x20] sm:$0xf] }
  0x45   : > { %v551_v52 = vpack.c.b16 %v547_v39, %v546_v36  ;;  %v799_v29 = vrot.slane %v797_v40, 5  ;;  %v813_v53 = vrot.slane %v811_v41, 5  ;;  %v1120_v59 = vshll.u32 %v1725_v49, 16 }
  0x46   : > { %v794_v43 = vor.u32 %v793_v31, %v790_v30  ;;  %v809_v57 = vrot.slane %v808_v45, 4  ;;  %v911_v62 = vrot.slane %v2009_v0, 5  ;;  %v1681_v1 = vrot.slane %v1673_v12, 9  ;;  %v1726_v0 = vld [vmem:[%s1928_s29 + $0x1c] sm:$0x1] }
  0x47   : > { %v1122_v10 = vrot.slane %v1120_v59, 5  ;;  %v1112_v16 = vshll.u32 %v1724_v5, 16  ;;  %v1647_v17 = vor.u32 %v1775_v7, %v1646_v6  ;;  %v1126_v21 = vshll.u32 %v1726_v0, 16  ;;  %v1744_v30 = vld [vmem:[%s1928_s29 + $0x10] sm:$0xe] }
  0x48   : > { %v795_v56 = vrot.slane %v794_v43, 4  ;;  %v814_v9 = vsel %vm1953_vm4, %v809_v57, %v813_v53  ;;  %v1745_v31 = vld [vmem:[%s1928_s29 + $0x18] sm:$0xe]  ;;  %v1752_v40 = vrot.slane %v1744_v30, 9  ;;  %v1306_v41 = vrot.slane %v1724_v5, 5 }
  0x49   : > { %1649 = vmatmul.msk.bf16.gmra.mxu3 %vm369_vm3, %v1639_v42  ;;  %v1723_v42 = vld [vmem:[%s1928_s29 + $0x10] sm:$0xf]  ;;  %v824_v19 = vunpack.c.l.b16 %v814_v9  ;;  %v1114_v24 = vrot.slane %v1112_v16, 5  ;;  %v1128_v34 = vrot.slane %v1126_v21, 5  ;;  %v1706_v43 = vor.u32 %v1776_v32, %v1705_v54  ;;  %v1675_v45 = vld [vmem:[%s1928_s29 + $0x18] sm:$0xe] }
  0x4a   : > { %v1103_v50 = vshrl.u32 %v1723_v42, 16  ;;  %v1106_v51 = vshll.u32 %v1723_v42, 16  ;;  %v800_v8 = vsel %vm1953_vm4, %v795_v56, %v799_v29  ;;  %v1753_v42 = vrot.slane %v1745_v31, 9  ;;  %v1730_v6 = vld [vmem:[%s1928_s29 + $0x2c] sm:$0x1] }
  0x4b   : > { %v823_v18 = vunpack.c.l.b16 %v800_v8  ;;  %v1131_v49 = vshrl.u32 %v1727_v35, 16  ;;  %v915_v56 = vrot.slane %v2048_v60, 5  ;;  %v1709_v16 = vld [vmem:[%s1928_s29 + $0x20] sm:$0xf]  ;;  %v1731_v21 = vld [vmem:[%s1928_s29 + $0x30] sm:$0xf] }
  0x4c   : > { %v1108_v13 = vrot.slane %v1106_v51, 5  ;;  %v1733_v54 = vld [vmem:[%s1928_s29 + $0x38] sm:$0xf]  ;;  %v1159_v31 = vshrl.u32 %v1731_v21, 16  ;;  %v1162_v32 = vshll.u32 %v1731_v21, 16 }
  0x4d   : > { %v828_v25 = vpack.c.b16 %v824_v19, %v823_v18 }
  0x4e   : > { %1670 = vmatmul.msk.bf16.gmra.mxu0 %vm369_vm3, %v826_v55  ;;  %v1674_v55 = vld [vmem:[%s1928_s29 + $0x10] sm:$0xe] }
  0x4f   : > { %1608 = vmatmul.msk.bf16.gmra.mxu1 %vm369_vm3, %v1601_v61  ;;  %v907_v61 = vrot.slane %v2006_v63, 5  ;;  %v1682_v2 = vrot.slane %v1674_v55, 9  ;;  %v1119_v63 = vrot.slane %v1117_v58, 4  ;;  %v1683_v55 = vrot.slane %v1675_v45, 9 }
  0x50   : > { %v919_v58 = vrot.slane %v2053_v4, 5  ;;  %v923_v45 = vrot.slane %v2076_v47, 5  ;;  %v1734_v47 = vld [vmem:[%s1928_s29 + $0x3c] sm:$0x1] }
  0x51   : > { %v908_v11 = vsel %vm1987_vm7, %v1681_v1, %v907_v61  ;;  %v912_v14 = vsel %vm1987_vm7, %v1682_v2, %v911_v62  ;;  %v1123_v20 = vor.u32 %v1122_v10, %v1119_v63  ;;  %v1307_v61 = vsel %vm1987_vm7, %v1752_v40, %v1306_v41 }
  0x52   : > { %1621 = vmatmul.msk.bf16.gmra.mxu2 %vm369_vm3, %v550_v3  ;;  %v1105_v3 = vrot.slane %v1103_v50, 4  ;;  %v939_v22 = vunpack.c.l.b16 %v908_v11  ;;  %v1134_v50 = vshll.u32 %v1727_v35, 16  ;;  %v1133_v62 = vrot.slane %v1131_v49, 4 }
  0x53   : > { %v1124_v33 = vrot.slane %v1123_v20, 4  ;;  %v1338_v60 = vunpack.c.l.b16 %v1307_v61  ;;  %v916_v4 = vsel %vm1987_vm7, %v1683_v55, %v915_v56  ;;  %v1154_v11 = vshll.u32 %v1730_v6, 16  ;;  %v1746_v20 = vld [vmem:[%s1928_s29 + $0x20] sm:$0xe] }
  0x54   : > { %v1109_v15 = vor.u32 %v1108_v13, %v1105_v3  ;;  %v1136_v1 = vrot.slane %v1134_v50, 5  ;;  %v1728_v3 = vld [vmem:[%s1928_s29 + $0x24] sm:$0x1]  ;;  %v1754_v30 = vrot.slane %v1746_v20, 9  ;;  %v1318_v41 = vrot.slane %v1730_v6, 5 }
  0x55   : > { %v1129_v51 = vsel %vm1953_vm4, %v1124_v33, %v1128_v34  ;;  %v1140_v10 = vshll.u32 %v1728_v3, 16  ;;  %v1314_v35 = vrot.slane %v1728_v3, 5 }
  0x56   : > { %v1110_v46 = vrot.slane %v1109_v15, 4  ;;  %v1217_v59 = vunpack.c.l.b16 %v1129_v51  ;;  %v1137_v63 = vor.u32 %v1136_v1, %v1133_v62  ;;  %v1161_v51 = vrot.slane %v1159_v31, 4 }
  0x57   : > { %v1142_v19 = vrot.slane %v1140_v10, 5  ;;  %v1315_v55 = vsel %vm1987_vm7, %v1754_v30, %v1314_v35  ;;  %v1749_v10 = vld [vmem:[%s1928_s29 + $0x38] sm:$0xe]  ;;  %v1326_v30 = vrot.slane %v1734_v47, 5  ;;  %v931_v35 = vrot.slane %v2110_v27, 5 }
  0x58   : > { %v1115_v39 = vsel %vm1953_vm4, %v1110_v46, %v1114_v24  ;;  %v1138_v18 = vrot.slane %v1137_v63, 4  ;;  %v1156_v46 = vrot.slane %v1154_v11, 5  ;;  %v1747_v24 = vld [vmem:[%s1928_s29 + $0x28] sm:$0xe]  ;;  %v1748_v63 = vld [vmem:[%s1928_s29 + $0x30] sm:$0xe] }
  0x59   : > { %1650 = vmatmul.msk.bf16.gmra.mxu3 %vm369_vm3, %v1643_v23  ;;  %v940_v23 = vunpack.c.l.b16 %v912_v14  ;;  %v1216_v12 = vunpack.c.l.b16 %v1115_v39  ;;  %v941_v14 = vunpack.c.l.b16 %v916_v4  ;;  %v1678_v39 = vld [vmem:[%s1928_s29 + $0x30] sm:$0xe]  ;;  %v1757_v21 = vrot.slane %v1749_v10, 9 }
  0x5a   : > { %v1143_v34 = vsel %vm1953_vm4, %v1138_v18, %v1142_v19  ;;  %v1686_v50 = vrot.slane %v1678_v39, 9  ;;  %v1756_v19 = vrot.slane %v1748_v63, 9 }
  0x5b   : > { %v947_v36 = vpack.c.b16 %v940_v23, %v939_v22  ;;  %v1224_v8 = vpack.c.b16 %v1217_v59, %v1216_v12  ;;  %v1777_v22 = vld [vmem:[%s1928_s29 + $0x24] sm:$0xf0]  ;;  %v1732_v12 = vld [vmem:[%s1928_s29 + $0x34] sm:$0x1] }
  0x5c   : > { %v1710_v33 = vor.u32 %v1777_v22, %v1709_v16  ;;  %v1168_v62 = vshll.u32 %v1732_v12, 16  ;;  %v1322_v20 = vrot.slane %v1732_v12, 5 }
  0x5e   : > { %1671 = vmatmul.msk.bf16.gmra.mxu0 %vm369_vm3, %v827_v38  ;;  %v1729_v38 = vld [vmem:[%s1928_s29 + $0x28] sm:$0xf] }
  0x5f   : > { %1609 = vmatmul.msk.bf16.gmra.mxu1 %vm369_vm3, %v1605_v48  ;;  %v1676_v48 = vld [vmem:[%s1928_s29 + $0x20] sm:$0xe]  ;;  %v1145_v29 = vshrl.u32 %v1729_v38, 16  ;;  %v1148_v53 = vshll.u32 %v1729_v38, 16  ;;  %v1677_v38 = vld [vmem:[%s1928_s29 + $0x28] sm:$0xe] }
  0x60   : > { %v1684_v57 = vrot.slane %v1676_v48, 9  ;;  %v927_v48 = vrot.slane %v2083_v26, 5  ;;  %v1685_v49 = vrot.slane %v1677_v38, 9  ;;  %v935_v38 = vrot.slane %v2113_v28, 5 }
  0x61   : > { %v1147_v13 = vrot.slane %v1145_v29, 4  ;;  %v1150_v5 = vrot.slane %v1148_v53, 5  ;;  %v1218_v29 = vunpack.c.l.b16 %v1143_v34 }
  0x62   : > { %1622 = vmatmul.msk.bf16.gmra.mxu2 %vm369_vm3, %v551_v52  ;;  %v1310_v52 = vrot.slane %v1726_v0, 5  ;;  %v920_v7 = vsel %vm1987_vm7, %v1684_v57, %v919_v58  ;;  %v924_v26 = vsel %vm1987_vm7, %v1685_v49, %v923_v45  ;;  %v928_v59 = vsel %vm1987_vm7, %v1686_v50, %v927_v48  ;;  %v1736_v45 = vld [vmem:[%s1928_s29 + $0x44] sm:$0x1]  ;;  %v1738_v50 = vld [vmem:[%s1928_s29 + $0x4c] sm:$0x1] }
  0x63   : > { %v1151_v0 = vor.u32 %v1150_v5, %v1147_v13  ;;  %v942_v15 = vunpack.c.l.b16 %v920_v7  ;;  %v1182_v5 = vshll.u32 %v1734_v47, 16  ;;  %v943_v6 = vunpack.c.l.b16 %v924_v26 }
  0x64   : > { %v1311_v2 = vsel %vm1987_vm7, %v1753_v42, %v1310_v52  ;;  %v1173_v42 = vshrl.u32 %v1733_v54, 16  ;;  %v1164_v52 = vrot.slane %v1162_v32, 5  ;;  %v1170_v7 = vrot.slane %v1168_v62, 5 }
  0x65   : > { %v1339_v9 = vunpack.c.l.b16 %v1311_v2  ;;  %v1152_v23 = vrot.slane %v1151_v0, 4  ;;  %v1340_v2 = vunpack.c.l.b16 %v1315_v55  ;;  %v1778_v0 = vld [vmem:[%s1928_s29 + $0x34] sm:$0xf0]  ;;  %v1196_v12 = vshll.u32 %v1736_v45, 16 }
  0x66   : > { %v1175_v57 = vrot.slane %v1173_v42, 4  ;;  %v1165_v61 = vor.u32 %v1164_v52, %v1161_v51  ;;  %v1334_v10 = vrot.slane %v1738_v50, 5 }
  0x67   : > { %v1157_v40 = vsel %vm1953_vm4, %v1152_v23, %v1156_v46  ;;  %v1679_v23 = vld [vmem:[%s1928_s29 + $0x38] sm:$0xe]  ;;  %v1680_v46 = vld [vmem:[%s1928_s29 + $0x40] sm:$0xe] }
  0x68   : > { %v1219_v53 = vunpack.c.l.b16 %v1157_v40  ;;  %v1166_v4 = vrot.slane %v1165_v61, 4  ;;  %v1687_v34 = vrot.slane %v1679_v23, 9  ;;  %v1323_v40 = vsel %vm1987_vm7, %v1756_v19, %v1322_v20 }
  0x69   : > { %1651 = vmatmul.msk.bf16.gmra.mxu3 %vm369_vm3, %v1647_v17  ;;  %v1346_v17 = vpack.c.b16 %v1339_v9, %v1338_v60  ;;  %v944_v60 = vunpack.c.l.b16 %v928_v59  ;;  %v1713_v9 = vld [vmem:[%s1928_s29 + $0x30] sm:$0xf]  ;;  %v1342_v51 = vunpack.c.l.b16 %v1323_v40  ;;  %v1198_v59 = vrot.slane %v1196_v12, 5 }
  0x6a   : > { %v1225_v1 = vpack.c.b16 %v1219_v53, %v1218_v29  ;;  %v1171_v18 = vsel %vm1953_vm4, %v1166_v4, %v1170_v7  ;;  %v1714_v22 = vor.u32 %v1778_v0, %v1713_v9  ;;  %v932_v27 = vsel %vm1987_vm7, %v1687_v34, %v931_v35 }
  0x6b   : > { %v949_v16 = vpack.c.b16 %v944_v60, %v943_v6  ;;  %v1330_v7 = vrot.slane %v1736_v45, 5 }
  0x6e   : > { %1672 = vmatmul.msk.bf16.gmra.mxu0 %vm369_vm3, %v828_v25  ;;  %v948_v25 = vpack.c.b16 %v942_v15, %v941_v14  ;;  %v1184_v14 = vrot.slane %v1182_v5, 5  ;;  %v1735_v15 = vld [vmem:[%s1928_s29 + $0x40] sm:$0xf]  ;;  %v1751_v5 = vld [vmem:[%s1928_s29 + $0x48] sm:$0xe] }
  0x6f   : > { %1690 = vmatmul.msk.bf16.vlgmr.msra.gmra.mxu1 %vm369_vm3, %v947_v36  ;;  %v1755_v36 = vrot.slane %v1747_v24, 9  ;;  %v1187_v24 = vshrl.u32 %v1735_v15, 16  ;;  %v1759_v63 = vrot.slane %v1751_v5, 9 }
  0x71   : > { %v1319_v56 = vsel %vm1987_vm7, %v1755_v36, %v1318_v41  ;;  %v1688_v36 = vrot.slane %v1680_v46, 9  ;;  %v1189_v41 = vrot.slane %v1187_v24, 4 }
  0x72   : > { %1719 = vmatmul.msk.bf16.vlgmr.msra.gmra.mxu2 %vm369_vm3, %v1706_v43  ;;  %v1176_v43 = vshll.u32 %v1733_v54, 16  ;;  %v1341_v3 = vunpack.c.l.b16 %v1319_v56  ;;  %v1210_v56 = vshll.u32 %v1738_v50, 16 }
  0x73   : > { %v936_v28 = vsel %vm1987_vm7, %v1688_v36, %v935_v38 }
  0x74   : > { %v1178_v58 = vrot.slane %v1176_v43, 5  ;;  %v1327_v43 = vsel %vm1987_vm7, %v1757_v21, %v1326_v30  ;;  %v1212_v62 = vrot.slane %v1210_v56, 5 }
  0x75   : > { %v1343_v29 = vunpack.c.l.b16 %v1327_v43 }
  0x76   : > { %v1179_v13 = vor.u32 %v1178_v58, %v1175_v57  ;;  %v945_v57 = vunpack.c.l.b16 %v932_v27  ;;  %v946_v58 = vunpack.c.l.b16 %v936_v28 }
  0x77   : > { %v1348_v47 = vpack.c.b16 %v1343_v29, %v1342_v51 }
  0x78   : > { %v1180_v11 = vrot.slane %v1179_v13, 4  ;;  %v1779_v13 = vld [vmem:[%s1928_s29 + $0x44] sm:$0xf0] }
  0x79   : > { %1740 = vmatmul.msk.bf16.vlgmr.msra.gmra.mxu3 %vm369_vm3, %v1224_v8  ;;  %v1347_v8 = vpack.c.b16 %v1341_v3, %v1340_v2  ;;  %v950_v2 = vpack.c.b16 %v946_v58, %v945_v57  ;;  %v1717_v3 = vld [vmem:[%s1928_s29 + $0x40] sm:$0xf] }
  0x7a   : > { %v1185_v54 = vsel %vm1953_vm4, %v1180_v11, %v1184_v14 }
  0x7b   : > { %v1221_v39 = vunpack.c.l.b16 %v1185_v54 }
  0x7e   : > { %1761 = vmatmul.msk.bf16.vlgmr.msra.gmra.mxu0 %vm369_vm3, %v1346_v17  ;;  %v1737_v17 = vld [vmem:[%s1928_s29 + $0x48] sm:$0xf] }
  0x7f   : > { %1691 = vmatmul.msk.bf16.gmra.mxu1 %vm369_vm3, %v948_v25  ;;  %v1190_v25 = vshll.u32 %v1735_v15, 16  ;;  %v1201_v31 = vshrl.u32 %v1737_v17, 16  ;;  %v1204_v32 = vshll.u32 %v1737_v17, 16  ;;  %v1335_v15 = vsel %vm1987_vm7, %v1759_v63, %v1334_v10 }
  0x80   : > { %v1345_v37 = vunpack.c.l.b16 %v1335_v15 }
  0x81   : > { %v1192_v42 = vrot.slane %v1190_v25, 5  ;;  %v1203_v48 = vrot.slane %v1201_v31, 4  ;;  %v1206_v49 = vrot.slane %v1204_v32, 5 }
  0x82   : > { %1720 = vmatmul.msk.bf16.gmra.mxu2 %vm369_vm3, %v1710_v33  ;;  %v1220_v33 = vunpack.c.l.b16 %v1171_v18 }
  0x83   : > { %v1193_v53 = vor.u32 %v1192_v42, %v1189_v41  ;;  %v1207_v55 = vor.u32 %v1206_v49, %v1203_v48 }
  0x84   : > { %v1226_v52 = vpack.c.b16 %v1221_v39, %v1220_v33 }
  0x85   : > { %v1194_v26 = vrot.slane %v1193_v53, 4  ;;  %v1208_v61 = vrot.slane %v1207_v55, 4 }
  0x87   : > { %v1199_v60 = vsel %vm1953_vm4, %v1194_v26, %v1198_v59  ;;  %v1213_v9 = vsel %vm1953_vm4, %v1208_v61, %v1212_v62 }
  0x88   : > { %v1222_v0 = vunpack.c.l.b16 %v1199_v60  ;;  %v1223_v11 = vunpack.c.l.b16 %v1213_v9 }
  0x89   : > { %1741 = vmatmul.msk.bf16.gmra.mxu3 %vm369_vm3, %v1225_v1  ;;  %v1750_v1 = vld [vmem:[%s1928_s29 + $0x40] sm:$0xe] }
  0x8a   : > { %v1758_v4 = vrot.slane %v1750_v1, 9  ;;  %v1227_v17 = vpack.c.b16 %v1223_v11, %v1222_v0 }
  0x8c   : > { %v1331_v14 = vsel %vm1987_vm7, %v1758_v4, %v1330_v7 }
  0x8d   : > { %v1344_v18 = vunpack.c.l.b16 %v1331_v14  ;;  %v2289_v14 = vld [vmem:[%s2344_s2] ss:$0 sm:$0xff] }
  0x8e   : > { %1762 = vmatmul.msk.bf16.gmra.mxu0 %vm369_vm3, %v1347_v8  ;;  %v1718_v8 = vor.u32 %v1779_v13, %v1717_v3 }
  0x8f   : > { %1692 = vmatmul.msk.bf16.gmra.mxu1 %vm369_vm3, %v949_v16  ;;  %v1349_v20 = vpack.c.b16 %v1345_v37, %v1344_v18 }
  0x92   : > { %1721 = vmatmul.msk.bf16.gmra.mxu2 %vm369_vm3, %v1714_v22 }
  0x99   : > { %1742 = vmatmul.msk.bf16.gmra.mxu3 %vm369_vm3, %v1226_v52 }
  0x9c   : > { %v2230_v6 = vpop.f32.mrf.mxu1 }
  0x9e   : > { %1763 = vmatmul.msk.bf16.gmra.mxu0 %vm369_vm3, %v1348_v47 }
  0x9f   : > { %1693 = vmatmul.msk.bf16.gmra.mxu1 %vm369_vm3, %v950_v2 }
  0xa2   : > { %1722 = vmatmul.msk.bf16.gmra.mxu2 %vm369_vm3, %v1718_v8 }
  0xa4   : > { %v2243_v16 = vpop.f32.mrf.mxu1 }
  0xa5   : > { %v2245_v19 = vpop.f32.mrf.mxu2 }
  0xa9   : > { %1743 = vmatmul.msk.bf16.gmra.mxu3 %vm369_vm3, %v1227_v17 }
  0xab   : > { %v395_v21 = vpop.f32.mrf.mxu0 }
  0xac   : > { %v2248_v22 = vpop.f32.mrf.mxu3  ;;  %v459_v23 = vpop.f32.mrf.mxu1 }
  0xad   : > { %v2251_v46 = vpop.f32.mrf.mxu2  ;;  %v460_v56 = vadd.f32 %v459_v23, %v395_v21 }
  0xae   : > { %1764 = vmatmul.msk.bf16.gmra.mxu0 %vm369_vm3, %v1349_v20 }
  0xb3   : > { %v397_v44 = vpop.f32.mrf.mxu0 }
  0xb4   : > { %v2253_v24 = vpop.f32.mrf.mxu3  ;;  %v461_v25 = vpop.f32.mrf.mxu1 }
  0xb5   : > { %v576_v54 = vpop.f32.mrf.mxu2  ;;  %v462_v62 = vadd.f32 %v461_v25, %v397_v44 }
  0xb6   : > { %v596_v47 = vadd.f32 %v576_v54, %v460_v56 }
  0xbb   : > { %v853_v30 = vpop.f32.mrf.mxu0 }
  0xbc   : > { %v659_v31 = vpop.f32.mrf.mxu3  ;;  %v464_v32 = vpop.f32.mrf.mxu1 }
  0xbd   : > { %v578_v33 = vpop.f32.mrf.mxu2  ;;  %v679_v59 = vadd.f32 %v659_v31, %v596_v47  ;;  %v465_v9 = vadd.f32 %v464_v32, %v2230_v6 }
  0xbe   : > { %v597_v3 = vadd.f32 %v578_v33, %v462_v62 }
  0xbf   : > { %v873_v13 = vadd.f32 %v853_v30, %v679_v59 }
  0xc3   : > { %v855_v34 = vpop.f32.mrf.mxu0 }
  0xc4   : > { %v661_v35 = vpop.f32.mrf.mxu3  ;;  %v466_v36 = vpop.f32.mrf.mxu1 }
  0xc5   : > { %v581_v38 = vpop.f32.mrf.mxu2  ;;  %v680_v4 = vadd.f32 %v661_v35, %v597_v3  ;;  %v467_v6 = vadd.f32 %v466_v36, %v2243_v16 }
  0xc6   : > { %v598_v0 = vadd.f32 %v581_v38, %v465_v9 }
  0xc7   : > { %v874_v15 = vadd.f32 %v855_v34, %v680_v4 }
  0xcb   : > { %v858_v39 = vpop.f32.mrf.mxu0 }
  0xcc   : > { %v664_v40 = vpop.f32.mrf.mxu3  ;;  %v469_v41 = vpop.f32.mrf.mxu1 }
  0xcd   : > { %v583_v42 = vpop.f32.mrf.mxu2  ;;  %v681_v20 = vadd.f32 %v664_v40, %v598_v0  ;;  %v470_v62 = vadd.f32 %v469_v41, %v2245_v19 }
  0xce   : > { %v599_v31 = vadd.f32 %v583_v42, %v467_v6 }
  0xcf   : > { %v875_v35 = vadd.f32 %v858_v39, %v681_v20 }
  0xd3   : > { %v2255_v43 = vpop.f32.mrf.mxu0 }
  0xd4   : > { %v666_v45 = vpop.f32.mrf.mxu3  ;;  %v2257_v48 = vpop.f32.mrf.mxu1 }
  0xd5   : > { %v586_v49 = vpop.f32.mrf.mxu2 }
  0xd6   : > { %v600_v3 = vadd.f32 %v586_v49, %v470_v62  ;;  %v472_v49 = vadd.f32 %v2257_v48, %v2251_v46 }
  0xdb   : > { %v2259_v50 = vpop.f32.mrf.mxu0 }
  0xdc   : > { %v2261_v51 = vpop.f32.mrf.mxu3  ;;  %v2263_v27 = vpop.f32.mrf.mxu1 }
  0xdd   : > { %v2265_v28 = vpop.f32.mrf.mxu2 }
  0xde   : > { %v601_v0 = vadd.f32 %v2265_v28, %v472_v49 }
  0xe3   : > { %v2267_v52 = vpop.f32.mrf.mxu0 }
  0xe4   : > { %v2269_v29 = vpop.f32.mrf.mxu3  ;;  %v2271_v53 = vpop.f32.mrf.mxu1 }
  0xe5   : > { %v2273_v12 = vpop.f32.mrf.mxu2  ;;  %v684_v28 = vadd.f32 %v2269_v29, %v601_v0 }
  0xeb   : > { %v2275_v55 = vpop.f32.mrf.mxu0 }
  0xec   : > { %v2277_v57 = vpop.f32.mrf.mxu3  ;;  %v975_v58 = vpop.f32.mrf.mxu1 }
  0xed   : > { %v2279_v26 = vpop.f32.mrf.mxu2  ;;  %v995_v60 = vadd.f32 %v975_v58, %v873_v13  ;;  %v682_v58 = vadd.f32 %v666_v45, %v599_v31 }
  0xef   : > { %v876_v39 = vadd.f32 %v2255_v43, %v682_v58 }
  0xf3   : > { %v2281_v61 = vpop.f32.mrf.mxu0 }
  0xf4   : > { %v2283_v1 = vpop.f32.mrf.mxu3  ;;  %v977_v2 = vpop.f32.mrf.mxu1 }
  0xf5   : > { %v1058_v5 = vpop.f32.mrf.mxu2  ;;  %v996_v37 = vadd.f32 %v977_v2, %v874_v15 }
  0xf6   : > { %v1078_v7 = vadd.f32 %v1058_v5, %v995_v60 }
  0xfb   : > { %v1374_v8 = vpop.f32.mrf.mxu0 }
  0xfc   : > { %v1252_v63 = vpop.f32.mrf.mxu3  ;;  %v980_v10 = vpop.f32.mrf.mxu1 }
  0xfd   : > { %v1272_v11 = vadd.f32 %v1252_v63, %v1078_v7  ;;  %v1060_v17 = vpop.f32.mrf.mxu2  ;;  %v997_v56 = vadd.f32 %v980_v10, %v875_v35  ;;  %v878_v35 = vadd.f32 %v2267_v52, %v684_v28 }
  0xfe   : > { %v1079_v23 = vadd.f32 %v1060_v17, %v996_v37 }
  0xff   : > { %v1394_v18 = vadd.f32 %v1374_v8, %v1272_v11  ;;  %v683_v8 = vadd.f32 %v2261_v51, %v600_v3 }
 0x101   : > { %v1406_v21 = vadd.f32 %v2289_v14, %v1394_v18  ;;  %v877_v17 = vadd.f32 %v2259_v50, %v683_v8 }
 0x103   : > { %v1376_v44 = vpop.f32.mrf.mxu0  ;;  %v1414_v25 = vsub.f32 0.0, %v1406_v21 }
 0x104   : > { %v1254_v54 = vpop.f32.mrf.mxu3  ;;  %v982_v30 = vpop.f32.mrf.mxu1 }
 0x105   : > { %v1422_v32 = vmul.f32 1.442695, %v1414_v25  ;;  %v1273_v33 = vadd.f32 %v1254_v54, %v1079_v23  ;;  %v1063_v38 = vpop.f32.mrf.mxu2  ;;  %v998_v7 = vadd.f32 %v982_v30, %v876_v39  ;;  %v475_v25 = vadd.f32 %v2263_v27, %v2248_v22 }
 0x106   : > { %v1080_v47 = vadd.f32 %v1063_v38, %v997_v56 }
 0x107   : > { %1809 = vpow2.f32 %v1422_v32  ;;  %v1395_v34 = vadd.f32 %v1376_v44, %v1273_v33 }
 0x109   : > { %v1407_v40 = vadd.f32 %v2289_v14, %v1395_v34 }
 0x10b   : > { %v1379_v59 = vpop.f32.mrf.mxu0  ;;  %v1415_v2 = vsub.f32 0.0, %v1407_v40 }
 0x10c   : > { %v1257_v16 = vpop.f32.mrf.mxu3  ;;  %v985_v60 = vpop.f32.mrf.mxu1 }
 0x10d   : > { %v1810_v36 = vpop.eup %1809  ;;  %v1424_v42 = vmul.f32 1.442695, %v1415_v2  ;;  %v1274_v13 = vadd.f32 %v1257_v16, %v1080_v47  ;;  %v1065_v5 = vpop.f32.mrf.mxu2  ;;  %v999_v20 = vadd.f32 %v985_v60, %v877_v17  ;;  %v477_v2 = vadd.f32 %v2271_v53, %v2253_v24 }
 0x10e   : > { %v1438_v4 = vadd.f32 1.0, %v1810_v36  ;;  %v1081_v41 = vadd.f32 %v1065_v5, %v998_v7 }
 0x10f   : > { %1811 = vpow2.f32 %v1424_v42  ;;  %v1396_v45 = vadd.f32 %v1379_v59, %v1274_v13 }
 0x110   : > { %1813 = vrcp.f32 %v1438_v4 }
 0x111   : > { %v1408_v19 = vadd.f32 %v2289_v14, %v1396_v45 }
 0x113   : > { %v1381_v9 = vpop.f32.mrf.mxu0  ;;  %v1416_v63 = vsub.f32 0.0, %v1408_v19 }
 0x114   : > { %v1259_v10 = vpop.f32.mrf.mxu3  ;;  %v987_v23 = vpop.f32.mrf.mxu1 }
 0x115   : > { %v1812_v43 = vpop.eup %1811  ;;  %v1426_v11 = vmul.f32 1.442695, %v1416_v63  ;;  %v1275_v15 = vadd.f32 %v1259_v10, %v1081_v41  ;;  %v1068_v18 = vpop.f32.mrf.mxu2  ;;  %v1000_v47 = vadd.f32 %v987_v23, %v878_v35 }
 0x116   : > { %v1814_v37 = vpop.eup %1813  ;;  %v1439_v51 = vadd.f32 1.0, %v1812_v43  ;;  %v1082_v44 = vadd.f32 %v1068_v18, %v999_v20 }
 0x117   : > { %v1454_v46 = vmul.f32 %v1814_v37, %v1406_v21  ;;  %1815 = vpow2.f32 %v1426_v11  ;;  %v1397_v48 = vadd.f32 %v1381_v9, %v1275_v15  ;;  %v602_v21 = vadd.f32 %v2273_v12, %v475_v25 }
 0x118   : > { %1817 = vrcp.f32 %v1439_v51 }
 0x119   : > { %1462 = vst [vmem:[%s2306_s20] sm:$0xff] %v1454_v46  ;;  %v1409_v50 = vadd.f32 %v2289_v14, %v1397_v48  ;;  %v685_v22 = vadd.f32 %v2277_v57, %v602_v21 }
 0x11b   : > { %v1384_v6 = vpop.f32.mrf.mxu0  ;;  %v1417_v54 = vsub.f32 0.0, %v1409_v50  ;;  %v879_v13 = vadd.f32 %v2275_v55, %v685_v22 }
 0x11c   : > { %v1262_v30 = vpop.f32.mrf.mxu3  ;;  %v990_v62 = vpop.f32.mrf.mxu1 }
 0x11d   : > { %v1816_v31 = vpop.eup %1815  ;;  %v1428_v32 = vmul.f32 1.442695, %v1417_v54  ;;  %v1276_v33 = vadd.f32 %v1262_v30, %v1082_v44  ;;  %v1070_v38 = vpop.f32.mrf.mxu2  ;;  %v1001_v45 = vadd.f32 %v990_v62, %v879_v13 }
 0x11e   : > { %v1818_v29 = vpop.eup %1817  ;;  %v1440_v34 = vadd.f32 1.0, %v1816_v31  ;;  %v1083_v59 = vadd.f32 %v1070_v38, %v1000_v47 }
 0x11f   : > { %v1455_v56 = vmul.f32 %v1818_v29, %v1407_v40  ;;  %1819 = vpow2.f32 %v1428_v32  ;;  %v1398_v58 = vadd.f32 %v1384_v6, %v1276_v33  ;;  %v603_v40 = vadd.f32 %v2279_v26, %v477_v2 }
 0x120   : > { %1821 = vrcp.f32 %v1440_v34 }
 0x121   : > { %1463 = vst [vmem:[%s2306_s20 + $0x8] sm:$0xff] %v1455_v56  ;;  %v1410_v27 = vadd.f32 %v2289_v14, %v1398_v58  ;;  %v686_v24 = vadd.f32 %v2283_v1, %v603_v40 }
 0x123   : > { %v1386_v12 = vpop.f32.mrf.mxu0  ;;  %v1418_v52 = vsub.f32 0.0, %v1410_v27 }
 0x124   : > { %v1264_v16 = vpop.f32.mrf.mxu3  ;;  %v992_v26 = vpop.f32.mrf.mxu1 }
 0x125   : > { %v1820_v36 = vpop.eup %1819  ;;  %v1430_v3 = vmul.f32 1.442695, %v1418_v52  ;;  %v1277_v42 = vadd.f32 %v1264_v16, %v1083_v59  ;;  %v1073_v57 = vpop.f32.mrf.mxu2 }
 0x126   : > { %v1822_v39 = vpop.eup %1821  ;;  %v1441_v5 = vadd.f32 1.0, %v1820_v36  ;;  %v1084_v7 = vadd.f32 %v1073_v57, %v1001_v45 }
 0x127   : > { %v1456_v60 = vmul.f32 %v1822_v39, %v1408_v19  ;;  %1823 = vpow2.f32 %v1430_v3  ;;  %v1399_v4 = vadd.f32 %v1386_v12, %v1277_v42  ;;  %v880_v19 = vadd.f32 %v2281_v61, %v686_v24 }
 0x128   : > { %1825 = vrcp.f32 %v1441_v5 }
 0x129   : > { %1464 = vst [vmem:[%s2306_s20 + $0x10] sm:$0xff] %v1456_v60  ;;  %v1411_v53 = vadd.f32 %v2289_v14, %v1399_v4  ;;  %v1002_v15 = vadd.f32 %v992_v26, %v880_v19 }
 0x12b   : > { %v1419_v8 = vsub.f32 0.0, %v1411_v53  ;;  %v1389_v41 = vpop.f32.mrf.mxu0 }
 0x12c   : > { %v1267_v9 = vpop.f32.mrf.mxu3 }
 0x12d   : > { %v1824_v55 = vpop.eup %1823  ;;  %v1432_v49 = vmul.f32 1.442695, %v1419_v8  ;;  %v1278_v63 = vadd.f32 %v1267_v9, %v1084_v7  ;;  %v1075_v0 = vpop.f32.mrf.mxu2 }
 0x12e   : > { %v1826_v10 = vpop.eup %1825  ;;  %v1442_v43 = vadd.f32 1.0, %v1824_v55  ;;  %v1085_v18 = vadd.f32 %v1075_v0, %v1002_v15 }
 0x12f   : > { %v1457_v11 = vmul.f32 %v1826_v10, %v1409_v50  ;;  %1827 = vpow2.f32 %v1432_v49  ;;  %v1400_v1 = vadd.f32 %v1389_v41, %v1278_v63 }
 0x130   : > { %1829 = vrcp.f32 %v1442_v43 }
 0x131   : > { %1465 = vst [vmem:[%s2306_s20 + $0x18] sm:$0xff] %v1457_v11  ;;  %v1412_v17 = vadd.f32 %v2289_v14, %v1400_v1 }
 0x133   : > { %v1420_v37 = vsub.f32 0.0, %v1412_v17  ;;  %v1391_v28 = vpop.f32.mrf.mxu0 }
 0x134   : > { %v1269_v51 = vpop.f32.mrf.mxu3 }
 0x135   : > { %v1828_v46 = vpop.eup %1827  ;;  %v1434_v48 = vmul.f32 1.442695, %v1420_v37  ;;  %v1279_v20 = vadd.f32 %v1269_v51, %v1085_v18 }
 0x136   : > { %v1830_v23 = vpop.eup %1829  ;;  %v1443_v61 = vadd.f32 1.0, %v1828_v46 }
 0x137   : > { %v1458_v44 = vmul.f32 %v1830_v23, %v1410_v27  ;;  %1831 = vpow2.f32 %v1434_v48  ;;  %v1401_v50 = vadd.f32 %v1391_v28, %v1279_v20 }
 0x138   : > { %1833 = vrcp.f32 %v1443_v61 }
 0x139   : > { %1466 = vst [vmem:[%s2306_s20 + $0x20] sm:$0xff] %v1458_v44  ;;  %v1413_v6 = vadd.f32 %v2289_v14, %v1401_v50 }
 0x13b   : > { %v1421_v25 = vsub.f32 0.0, %v1413_v6 }
 0x13d   : > { %v1832_v54 = vpop.eup %1831  ;;  %v1436_v30 = vmul.f32 1.442695, %v1421_v25 }
 0x13e   : > { %v1834_v31 = vpop.eup %1833  ;;  %v1444_v21 = vadd.f32 1.0, %v1832_v54 }
 0x13f   : > { %v1459_v32 = vmul.f32 %v1834_v31, %v1411_v53  ;;  %1835 = vpow2.f32 %v1436_v30 }
 0x140   : > { %1837 = vrcp.f32 %v1444_v21 }
 0x141   : > { %1467 = vst [vmem:[%s2306_s20 + $0x28] sm:$0xff] %v1459_v32 }
 0x145   : > { %v1836_v33 = vpop.eup %1835 }
 0x146   : > { %v1838_v35 = vpop.eup %1837  ;;  %v1445_v38 = vadd.f32 1.0, %v1836_v33 }
 0x147   : > { %v1460_v29 = vmul.f32 %v1838_v35, %v1412_v17 }
 0x148   : > { %1839 = vrcp.f32 %v1445_v38 }
 0x149   : > { %1468 = vst [vmem:[%s2306_s20 + $0x30] sm:$0xff] %v1460_v29 }
 0x14e   : > { %v1840_v34 = vpop.eup %1839 }
 0x14f   : > { %v1461_v56 = vmul.f32 %v1840_v34, %v1413_v6 }
 0x151   : > { %1469 = vst [vmem:[%s2306_s20 + $0x38] sm:$0xff] %v1461_v56 }
 0x152 PF: > { %s13_s14 = sadd.s32 1, %s1863_s14   ;;  %s2350_s12 = smov %s1859_s13 }
 0x153   : > { %p10_p5 = scmp.ge.s32.totalorder %s13_s14, 4   ;;  %s2351_s13 = smov %s2353_s15 }
 0x155   :  { %12 = sbr.rel (!%p10_p5) target bundleno = 2 (0x2), region = 78 }

</bundles_post_ra>
